<compile_context>
chip_gen: v7x
topology: tpu7x:2x2x1
jax: 0.10.0
libtpu: 0.0.40
codegen_flags: <defaults>
</compile_context>

<pallas_src>
import functools

import numpy as np

import jax
import jax.numpy as jnp
from jax import lax
from jax.experimental import pallas as pl
from jax.experimental.pallas import tpu as pltpu


# ----------------------------------------------------------------------------
# The single fused Pallas kernel: whole forward pass stays in VMEM.
# ----------------------------------------------------------------------------
def _fused_net_kernel(patches_ref, wfe_ref, bfe_ref,
                      sel_c1_ref, wc1_ref, bc1_ref,
                      sel_c2_ref, wc2_ref, bc2_ref,
                      sel_fc_ref, wfc1_ref, bfc1_ref,
                      wfc2_ref, bfc2_ref,
                      out_ref, *, kw_c1, kw_c2, w3):
    f32 = jnp.float32

    # --- front-end: conv_mfcc / conv_delta / conv_delta_delta fused into one
    # block-diagonal matmul.  y_fe[(n, w1), c*3 + stream] == torch.cat(..., 2).
    y_fe = jnp.dot(patches_ref[...], wfe_ref[...], preferred_element_type=f32)
    y_fe = y_fe + bfe_ref[...]

    # --- conv_1 (kernel (3, 10), stride 3) + ReLU.  The width-im2col is one
    # constant 0/1 selection matmul per kernel tap j (row m2 of sel[j] picks
    # row n*W1 + 3*w2 + j of y_fe).
    acc = None
    for j in range(kw_c1):
        t = jnp.dot(sel_c1_ref[j], y_fe, preferred_element_type=f32)   # (M2, 9)
        t = jnp.dot(t, wc1_ref[j], preferred_element_type=f32)         # (M2, 10)
        acc = t if acc is None else acc + t
    a1 = jnp.maximum(acc + bc1_ref[...], 0.0)

    # --- conv_2 (kernel (1, 10), stride 1) + ReLU, same tap-wise scheme.
    acc = None
    for j in range(kw_c2):
        t = jnp.dot(sel_c2_ref[j], a1, preferred_element_type=f32)     # (M3, 10)
        t = jnp.dot(t, wc2_ref[j], preferred_element_type=f32)         # (M3, 5)
        acc = t if acc is None else acc + t
    a2 = jnp.maximum(acc + bc2_ref[...], 0.0)

    # --- fc1.  The per-sample NCHW flatten (channel-major, then width) is
    # folded into per-width-tap weights, again via selection matmuls.
    acc = None
    for w in range(w3):
        t = jnp.dot(sel_fc_ref[w], a2, preferred_element_type=f32)     # (N, 5)
        t = jnp.dot(t, wfc1_ref[w], preferred_element_type=f32)        # (N, 10)
        acc = t if acc is None else acc + t
    hid = acc + bfc1_ref[...]                                          # (N, 10)

    # --- fc2 (10 -> 1) on the VPU/XLU (multiply + lane reduce), stable sigmoid.
    logits = jnp.sum(hid * wfc2_ref[...], axis=-1, keepdims=True) + bfc2_ref[...]
    out_ref[...] = 0.5 * (jnp.tanh(0.5 * logits) + 1.0)


# ----------------------------------------------------------------------------
# Host-side helpers (static slices / constant builders only; no gathers).
# ----------------------------------------------------------------------------
def _front_end_im2col(x, kw, stride, out_w):
    """x:(N,1,H,W) -> (N*out_w, H*kw) patches via static strided slices."""
    n, _, h, _ = x.shape
    xs = x[:, 0]                                                  # (N, H, W)
    taps = [xs[:, :, j: j + (out_w - 1) * stride + 1: stride] for j in range(kw)]
    p = jnp.stack(taps, axis=-1)                                  # (N, H, out_w, kw)
    p = jnp.transpose(p, (0, 2, 1, 3))                            # (N, out_w, H, kw)
    return p.reshape(n * out_w, h * kw)


def _build_selection(n, taps, out_per_n, in_per_n, stride, rows_in):
    """sel[j, b*out_per_n + p, b*in_per_n + p*stride + j] = 1  (f32 constants)."""
    sel = np.zeros((taps, n * out_per_n, rows_in), np.float32)
    for j in range(taps):
        for b in range(n):
            for p in range(out_per_n):
                sel[j, b * out_per_n + p, b * in_per_n + p * stride + j] = 1.0
    return jnp.asarray(sel)


# ----------------------------------------------------------------------------
# Forward pass (one fused pallas_call).
# ----------------------------------------------------------------------------
def net_forward(params, mfcc, delta, delta_delta):
    n, _, h_in, w_in = mfcc.shape
    kw_fe, st_fe = 10, 5            # front-end convs: kernel (H, 10), stride 5
    kw_c1, st_c1 = 10, 3            # conv_1: kernel (3, 10), stride 3
    kw_c2, st_c2 = 10, 1            # conv_2: kernel (1, 10), stride 1
    c_fe, c_c1, c_c2 = 3, 10, 5

    w1 = (w_in - kw_fe) // st_fe + 1
    w2 = (w1 - kw_c1) // st_c1 + 1
    w3 = (w2 - kw_c2) // st_c2 + 1
    assert c_c2 * w3 == params["fc1_w"].shape[1], (
        "input width must make conv_2 output flatten to fc1's 45 features")

    m1 = n * w1
    m1p = ((m1 + 7) // 8) * 8       # pad front-end rows to a sublane multiple
    m2 = n * w2
    m3 = n * w3
    k_fe = h_in * kw_fe

    # Front-end im2col (static strided slices only); streams stacked along K.
    patches = jnp.concatenate(
        [_front_end_im2col(x, kw_fe, st_fe, w1) for x in (mfcc, delta, delta_delta)],
        axis=1)                                                   # (m1, 3*k_fe)
    patches = jnp.pad(patches, ((0, m1p - m1), (0, 0)))

    # Block-diagonal front-end weight: wfe[s*k_fe + k, c*3 + s] = w_s[c, k].
    w_all = jnp.stack([params["conv_mfcc_w"].reshape(c_fe, k_fe),
                       params["conv_delta_w"].reshape(c_fe, k_fe),
                       params["conv_dd_w"].reshape(c_fe, k_fe)], axis=0)
    wfe = jnp.einsum("sck,st->skct", w_all, jnp.eye(3, dtype=w_all.dtype))
    wfe = wfe.reshape(3 * k_fe, 3 * c_fe)
    bfe = jnp.stack([params["conv_mfcc_b"], params["conv_delta_b"],
                     params["conv_dd_b"]], axis=0).T.reshape(1, 3 * c_fe)

    # conv_1 weight per tap j: wc1[j, c*3 + h, o] = conv1_w[o, c, h, j].
    wc1 = jnp.transpose(params["conv1_w"], (3, 1, 2, 0)).reshape(kw_c1, 3 * c_fe, c_c1)
    bc1 = params["conv1_b"].reshape(1, c_c1)
    # conv_2 weight per tap j: wc2[j, c, o] = conv2_w[o, c, 0, j].
    wc2 = jnp.transpose(params["conv2_w"][:, :, 0, :], (2, 1, 0))
    bc2 = params["conv2_b"].reshape(1, c_c2)
    # fc1 weight per width tap w: wfc1[w, c, k] = fc1_w[k, c*w3 + w].
    wfc1 = jnp.transpose(params["fc1_w"].reshape(-1, c_c2, w3), (2, 1, 0))
    bfc1 = params["fc1_b"].reshape(1, -1)
    wfc2 = params["fc2_w"].reshape(1, -1)
    bfc2 = params["fc2_b"].reshape(1, 1)

    # Constant 0/1 selection matrices (trace-time numpy; become XLA constants).
    sel_c1 = _build_selection(n, kw_c1, w2, w1, st_c1, m1p)
    sel_c2 = _build_selection(n, kw_c2, w3, w2, st_c2, m2)
    sel_fc = _build_selection(n, w3, 1, w3, 1, m3)

    args = [patches, wfe, bfe, sel_c1, wc1, bc1, sel_c2, wc2, bc2,
            sel_fc, wfc1, bfc1, wfc2, bfc2]
    args = [a.astype(jnp.float32) for a in args]

    def full_spec(shape):
        return pl.BlockSpec(tuple(shape), lambda *_: (0,) * len(shape))

    kernel = functools.partial(_fused_net_kernel, kw_c1=kw_c1, kw_c2=kw_c2, w3=w3)
    # Everything fits in one VMEM-resident invocation.  For large batches, add a
    # leading batch grid axis with dimension_semantics=("parallel", ...) so the
    # work shards across both v7x TensorCores.
    return pl.pallas_call(
        kernel,
        out_shape=jax.ShapeDtypeStruct((n, 1), jnp.float32),
        grid=(1,),
        in_specs=[full_spec(a.shape) for a in args],
        out_specs=full_spec((n, 1)),
        compiler_params=pltpu.CompilerParams(dimension_semantics=("arbitrary",)),
    )(*args)


# ----------------------------------------------------------------------------
# Pure-JAX reference (lax.conv mirrors the PyTorch module) for a sanity check.
# ----------------------------------------------------------------------------
def net_forward_ref(params, mfcc, delta, delta_delta):
    def conv(x, w, b, stride):
        y = lax.conv_general_dilated(
            x, w, window_strides=(stride, stride), padding="VALID",
            dimension_numbers=("NCHW", "OIHW", "NCHW"))
        return y + b.reshape(1, -1, 1, 1)

    f_m = conv(mfcc, params["conv_mfcc_w"], params["conv_mfcc_b"], 5)
    f_d = conv(delta, params["conv_delta_w"], params["conv_delta_b"], 5)
    f_dd = conv(delta_delta, params["conv_dd_w"], params["conv_dd_b"], 5)
    f = jnp.concatenate((f_m, f_d, f_dd), axis=2)             # torch.cat(..., 2)
    f = jax.nn.relu(conv(f, params["conv1_w"], params["conv1_b"], 3))
    f = jax.nn.relu(conv(f, params["conv2_w"], params["conv2_b"], 1))
    flat = f.reshape(f.shape[0], -1)                          # (N, 45)  (see TODO)
    hid = flat @ params["fc1_w"].T + params["fc1_b"]
    return jax.nn.sigmoid(hid @ params["fc2_w"].T + params["fc2_b"])


# ----------------------------------------------------------------------------
# Parameters (deterministic init; shapes from Net.__init__; conv_3 / conv_4 are
# unused in forward and therefore not materialized).
# ----------------------------------------------------------------------------
def init_params(key, mfcc_total):
    def uinit(k, shape, fan_in):
        bound = 1.0 / jnp.sqrt(jnp.float32(fan_in))
        return jax.random.uniform(k, shape, jnp.float32, -bound, bound)

    ks = jax.random.split(key, 14)
    p = {}
    fan0 = 1 * mfcc_total * 10
    p["conv_mfcc_w"] = uinit(ks[0], (3, 1, mfcc_total, 10), fan0)
    p["conv_mfcc_b"] = uinit(ks[1], (3,), fan0)
    p["conv_delta_w"] = uinit(ks[2], (3, 1, mfcc_total, 10), fan0)
    p["conv_delta_b"] = uinit(ks[3], (3,), fan0)
    p["conv_dd_w"] = uinit(ks[4], (3, 1, mfcc_total, 10), fan0)
    p["conv_dd_b"] = uinit(ks[5], (3,), fan0)
    p["conv1_w"] = uinit(ks[6], (10, 3, 3, 10), 3 * 3 * 10)
    p["conv1_b"] = uinit(ks[7], (10,), 3 * 3 * 10)
    p["conv2_w"] = uinit(ks[8], (5, 10, 1, 10), 10 * 1 * 10)
    p["conv2_b"] = uinit(ks[9], (5,), 10 * 1 * 10)
    p["fc1_w"] = uinit(ks[10], (10, 45), 45)
    p["fc1_b"] = uinit(ks[11], (10,), 45)
    p["fc2_w"] = uinit(ks[12], (1, 10), 10)
    p["fc2_b"] = uinit(ks[13], (1,), 10)
    return p


if __name__ == "__main__":
    # Shapes: mfcc_total = 8 feature rows, input width 310 so that the conv
    # stack yields W1=61 -> W2=18 -> W3=9 and 5*9 = 45 fc1 input features.
    batch, mfcc_total, width = 2, 8, 310

    key = jax.random.PRNGKey(0)
    k_m, k_d, k_dd = jax.random.split(key, 3)
    mfcc = jax.random.normal(k_m, (batch, 1, mfcc_total, width), jnp.float32)
    delta = jax.random.normal(k_d, (batch, 1, mfcc_total, width), jnp.float32)
    delta_delta = jax.random.normal(k_dd, (batch, 1, mfcc_total, width), jnp.float32)

    params = init_params(jax.random.PRNGKey(1), mfcc_total)

    fwd = jax.jit(net_forward)
    out = jax.block_until_ready(fwd(params, mfcc, delta, delta_delta))
    assert out.shape == (batch, 1), out.shape

    ref = jax.block_until_ready(net_forward_ref(params, mfcc, delta, delta_delta))
    assert jnp.allclose(out, ref, atol=1e-4, rtol=1e-4), (out, ref)

    print("KERNEL_OK")
</pallas_src>

<mosaic_0001>
module attributes {stable_mosaic.version = 11 : i64} {
  func.func @_fused_net_kernel(%arg0: i32, %arg1: memref<128x240xf32, #tpu.memory_space<vmem>>, %arg2: memref<240x9xf32, #tpu.memory_space<vmem>>, %arg3: memref<1x9xf32, #tpu.memory_space<vmem>>, %arg4: memref<10x36x128xf32, #tpu.memory_space<vmem>>, %arg5: memref<10x9x10xf32, #tpu.memory_space<vmem>>, %arg6: memref<1x10xf32, #tpu.memory_space<vmem>>, %arg7: memref<10x18x36xf32, #tpu.memory_space<vmem>>, %arg8: memref<10x10x5xf32, #tpu.memory_space<vmem>>, %arg9: memref<1x5xf32, #tpu.memory_space<vmem>>, %arg10: memref<9x2x18xf32, #tpu.memory_space<vmem>>, %arg11: memref<9x5x10xf32, #tpu.memory_space<vmem>>, %arg12: memref<1x10xf32, #tpu.memory_space<vmem>>, %arg13: memref<1x10xf32, #tpu.memory_space<vmem>>, %arg14: memref<1x1xf32, #tpu.memory_space<vmem>>, %arg15: memref<2x1xf32, #tpu.memory_space<vmem>>) attributes {dimension_semantics = [#tpu.dimension_semantics<arbitrary>], iteration_bounds = array<i64: 1>, scalar_prefetch = 0 : i64, scratch_operands = 0 : i64, tpu.core_type = #tpu.core_type<tc>, window_params = [{pipeline_mode = #tpu.pipeline_mode<synchronous>, transform_indices = @transform_0, window_bounds = array<i64: 128, 240>}, {pipeline_mode = #tpu.pipeline_mode<synchronous>, transform_indices = @transform_1, window_bounds = array<i64: 240, 9>}, {pipeline_mode = #tpu.pipeline_mode<synchronous>, transform_indices = @transform_2, window_bounds = array<i64: 1, 9>}, {pipeline_mode = #tpu.pipeline_mode<synchronous>, transform_indices = @transform_3, window_bounds = array<i64: 10, 36, 128>}, {pipeline_mode = #tpu.pipeline_mode<synchronous>, transform_indices = @transform_4, window_bounds = array<i64: 10, 9, 10>}, {pipeline_mode = #tpu.pipeline_mode<synchronous>, transform_indices = @transform_5, window_bounds = array<i64: 1, 10>}, {pipeline_mode = #tpu.pipeline_mode<synchronous>, transform_indices = @transform_6, window_bounds = array<i64: 10, 18, 36>}, {pipeline_mode = #tpu.pipeline_mode<synchronous>, transform_indices = @transform_7, window_bounds = array<i64: 10, 10, 5>}, {pipeline_mode = #tpu.pipeline_mode<synchronous>, transform_indices = @transform_8, window_bounds = array<i64: 1, 5>}, {pipeline_mode = #tpu.pipeline_mode<synchronous>, transform_indices = @transform_9, window_bounds = array<i64: 9, 2, 18>}, {pipeline_mode = #tpu.pipeline_mode<synchronous>, transform_indices = @transform_10, window_bounds = array<i64: 9, 5, 10>}, {pipeline_mode = #tpu.pipeline_mode<synchronous>, transform_indices = @transform_11, window_bounds = array<i64: 1, 10>}, {pipeline_mode = #tpu.pipeline_mode<synchronous>, transform_indices = @transform_12, window_bounds = array<i64: 1, 10>}, {pipeline_mode = #tpu.pipeline_mode<synchronous>, transform_indices = @transform_13, window_bounds = array<i64: 1, 1>}, {pipeline_mode = #tpu.pipeline_mode<synchronous>, transform_indices = @transform_14, window_bounds = array<i64: 2, 1>}]} {
    %c0 = arith.constant 0 : index
    %c0_0 = arith.constant 0 : index
    %0 = vector.load %arg1[%c0, %c0_0] : memref<128x240xf32, #tpu.memory_space<vmem>>, vector<128x240xf32>
    %c0_1 = arith.constant 0 : index
    %c0_2 = arith.constant 0 : index
    %1 = vector.load %arg2[%c0_1, %c0_2] : memref<240x9xf32, #tpu.memory_space<vmem>>, vector<240x9xf32>
    %cst = arith.constant dense<0.000000e+00> : vector<128x9xf32>
    %2 = tpu.matmul %0, %1, %cst {dimension_numbers = #tpu.dot_dimension_numbers<[1], [0], [0], [1], [0, 0, 1, 1], [], []>} : vector<128x240xf32>, vector<240x9xf32>, vector<128x9xf32> -> vector<128x9xf32>
    %c0_3 = arith.constant 0 : index
    %c0_4 = arith.constant 0 : index
    %3 = vector.load %arg3[%c0_3, %c0_4] : memref<1x9xf32, #tpu.memory_space<vmem>>, vector<1x9xf32>
    %4 = vector.broadcast %3 : vector<1x9xf32> to vector<128x9xf32>
    %5 = arith.addf %2, %4 : vector<128x9xf32>
    %c0_5 = arith.constant 0 : index
    %c0_6 = arith.constant 0 : index
    %c0_7 = arith.constant 0 : index
    %6 = vector.load %arg4[%c0_5, %c0_6, %c0_7] : memref<10x36x128xf32, #tpu.memory_space<vmem>>, vector<1x36x128xf32>
    %7 = vector.shape_cast %6 : vector<1x36x128xf32> to vector<36x128xf32>
    %cst_8 = arith.constant dense<0.000000e+00> : vector<36x9xf32>
    %8 = tpu.matmul %7, %5, %cst_8 {dimension_numbers = #tpu.dot_dimension_numbers<[1], [0], [0], [1], [0, 0, 1, 1], [], []>} : vector<36x128xf32>, vector<128x9xf32>, vector<36x9xf32> -> vector<36x9xf32>
    %c0_9 = arith.constant 0 : index
    %c0_10 = arith.constant 0 : index
    %c0_11 = arith.constant 0 : index
    %9 = vector.load %arg5[%c0_9, %c0_10, %c0_11] : memref<10x9x10xf32, #tpu.memory_space<vmem>>, vector<1x9x10xf32>
    %10 = vector.shape_cast %9 : vector<1x9x10xf32> to vector<9x10xf32>
    %cst_12 = arith.constant dense<0.000000e+00> : vector<36x10xf32>
    %11 = tpu.matmul %8, %10, %cst_12 {dimension_numbers = #tpu.dot_dimension_numbers<[1], [0], [0], [1], [0, 0, 1, 1], [], []>} : vector<36x9xf32>, vector<9x10xf32>, vector<36x10xf32> -> vector<36x10xf32>
    %c1 = arith.constant 1 : index
    %c0_13 = arith.constant 0 : index
    %c0_14 = arith.constant 0 : index
    %12 = vector.load %arg4[%c1, %c0_13, %c0_14] : memref<10x36x128xf32, #tpu.memory_space<vmem>>, vector<1x36x128xf32>
    %13 = vector.shape_cast %12 : vector<1x36x128xf32> to vector<36x128xf32>
    %cst_15 = arith.constant dense<0.000000e+00> : vector<36x9xf32>
    %14 = tpu.matmul %13, %5, %cst_15 {dimension_numbers = #tpu.dot_dimension_numbers<[1], [0], [0], [1], [0, 0, 1, 1], [], []>} : vector<36x128xf32>, vector<128x9xf32>, vector<36x9xf32> -> vector<36x9xf32>
    %c1_16 = arith.constant 1 : index
    %c0_17 = arith.constant 0 : index
    %c0_18 = arith.constant 0 : index
    %15 = vector.load %arg5[%c1_16, %c0_17, %c0_18] : memref<10x9x10xf32, #tpu.memory_space<vmem>>, vector<1x9x10xf32>
    %16 = vector.shape_cast %15 : vector<1x9x10xf32> to vector<9x10xf32>
    %cst_19 = arith.constant dense<0.000000e+00> : vector<36x10xf32>
    %17 = tpu.matmul %14, %16, %cst_19 {dimension_numbers = #tpu.dot_dimension_numbers<[1], [0], [0], [1], [0, 0, 1, 1], [], []>} : vector<36x9xf32>, vector<9x10xf32>, vector<36x10xf32> -> vector<36x10xf32>
    %18 = arith.addf %11, %17 : vector<36x10xf32>
    %c2 = arith.constant 2 : index
    %c0_20 = arith.constant 0 : index
    %c0_21 = arith.constant 0 : index
    %19 = vector.load %arg4[%c2, %c0_20, %c0_21] : memref<10x36x128xf32, #tpu.memory_space<vmem>>, vector<1x36x128xf32>
    %20 = vector.shape_cast %19 : vector<1x36x128xf32> to vector<36x128xf32>
    %cst_22 = arith.constant dense<0.000000e+00> : vector<36x9xf32>
    %21 = tpu.matmul %20, %5, %cst_22 {dimension_numbers = #tpu.dot_dimension_numbers<[1], [0], [0], [1], [0, 0, 1, 1], [], []>} : vector<36x128xf32>, vector<128x9xf32>, vector<36x9xf32> -> vector<36x9xf32>
    %c2_23 = arith.constant 2 : index
    %c0_24 = arith.constant 0 : index
    %c0_25 = arith.constant 0 : index
    %22 = vector.load %arg5[%c2_23, %c0_24, %c0_25] : memref<10x9x10xf32, #tpu.memory_space<vmem>>, vector<1x9x10xf32>
    %23 = vector.shape_cast %22 : vector<1x9x10xf32> to vector<9x10xf32>
    %cst_26 = arith.constant dense<0.000000e+00> : vector<36x10xf32>
    %24 = tpu.matmul %21, %23, %cst_26 {dimension_numbers = #tpu.dot_dimension_numbers<[1], [0], [0], [1], [0, 0, 1, 1], [], []>} : vector<36x9xf32>, vector<9x10xf32>, vector<36x10xf32> -> vector<36x10xf32>
    %25 = arith.addf %18, %24 : vector<36x10xf32>
    %c3 = arith.constant 3 : index
    %c0_27 = arith.constant 0 : index
    %c0_28 = arith.constant 0 : index
    %26 = vector.load %arg4[%c3, %c0_27, %c0_28] : memref<10x36x128xf32, #tpu.memory_space<vmem>>, vector<1x36x128xf32>
    %27 = vector.shape_cast %26 : vector<1x36x128xf32> to vector<36x128xf32>
    %cst_29 = arith.constant dense<0.000000e+00> : vector<36x9xf32>
    %28 = tpu.matmul %27, %5, %cst_29 {dimension_numbers = #tpu.dot_dimension_numbers<[1], [0], [0], [1], [0, 0, 1, 1], [], []>} : vector<36x128xf32>, vector<128x9xf32>, vector<36x9xf32> -> vector<36x9xf32>
    %c3_30 = arith.constant 3 : index
    %c0_31 = arith.constant 0 : index
    %c0_32 = arith.constant 0 : index
    %29 = vector.load %arg5[%c3_30, %c0_31, %c0_32] : memref<10x9x10xf32, #tpu.memory_space<vmem>>, vector<1x9x10xf32>
    %30 = vector.shape_cast %29 : vector<1x9x10xf32> to vector<9x10xf32>
    %cst_33 = arith.constant dense<0.000000e+00> : vector<36x10xf32>
    %31 = tpu.matmul %28, %30, %cst_33 {dimension_numbers = #tpu.dot_dimension_numbers<[1], [0], [0], [1], [0, 0, 1, 1], [], []>} : vector<36x9xf32>, vector<9x10xf32>, vector<36x10xf32> -> vector<36x10xf32>
    %32 = arith.addf %25, %31 : vector<36x10xf32>
    %c4 = arith.constant 4 : index
    %c0_34 = arith.constant 0 : index
    %c0_35 = arith.constant 0 : index
    %33 = vector.load %arg4[%c4, %c0_34, %c0_35] : memref<10x36x128xf32, #tpu.memory_space<vmem>>, vector<1x36x128xf32>
    %34 = vector.shape_cast %33 : vector<1x36x128xf32> to vector<36x128xf32>
    %cst_36 = arith.constant dense<0.000000e+00> : vector<36x9xf32>
    %35 = tpu.matmul %34, %5, %cst_36 {dimension_numbers = #tpu.dot_dimension_numbers<[1], [0], [0], [1], [0, 0, 1, 1], [], []>} : vector<36x128xf32>, vector<128x9xf32>, vector<36x9xf32> -> vector<36x9xf32>
    %c4_37 = arith.constant 4 : index
    %c0_38 = arith.constant 0 : index
    %c0_39 = arith.constant 0 : index
    %36 = vector.load %arg5[%c4_37, %c0_38, %c0_39] : memref<10x9x10xf32, #tpu.memory_space<vmem>>, vector<1x9x10xf32>
    %37 = vector.shape_cast %36 : vector<1x9x10xf32> to vector<9x10xf32>
    %cst_40 = arith.constant dense<0.000000e+00> : vector<36x10xf32>
    %38 = tpu.matmul %35, %37, %cst_40 {dimension_numbers = #tpu.dot_dimension_numbers<[1], [0], [0], [1], [0, 0, 1, 1], [], []>} : vector<36x9xf32>, vector<9x10xf32>, vector<36x10xf32> -> vector<36x10xf32>
    %39 = arith.addf %32, %38 : vector<36x10xf32>
    %c5 = arith.constant 5 : index
    %c0_41 = arith.constant 0 : index
    %c0_42 = arith.constant 0 : index
    %40 = vector.load %arg4[%c5, %c0_41, %c0_42] : memref<10x36x128xf32, #tpu.memory_space<vmem>>, vector<1x36x128xf32>
    %41 = vector.shape_cast %40 : vector<1x36x128xf32> to vector<36x128xf32>
    %cst_43 = arith.constant dense<0.000000e+00> : vector<36x9xf32>
    %42 = tpu.matmul %41, %5, %cst_43 {dimension_numbers = #tpu.dot_dimension_numbers<[1], [0], [0], [1], [0, 0, 1, 1], [], []>} : vector<36x128xf32>, vector<128x9xf32>, vector<36x9xf32> -> vector<36x9xf32>
    %c5_44 = arith.constant 5 : index
    %c0_45 = arith.constant 0 : index
    %c0_46 = arith.constant 0 : index
    %43 = vector.load %arg5[%c5_44, %c0_45, %c0_46] : memref<10x9x10xf32, #tpu.memory_space<vmem>>, vector<1x9x10xf32>
    %44 = vector.shape_cast %43 : vector<1x9x10xf32> to vector<9x10xf32>
    %cst_47 = arith.constant dense<0.000000e+00> : vector<36x10xf32>
    %45 = tpu.matmul %42, %44, %cst_47 {dimension_numbers = #tpu.dot_dimension_numbers<[1], [0], [0], [1], [0, 0, 1, 1], [], []>} : vector<36x9xf32>, vector<9x10xf32>, vector<36x10xf32> -> vector<36x10xf32>
    %46 = arith.addf %39, %45 : vector<36x10xf32>
    %c6 = arith.constant 6 : index
    %c0_48 = arith.constant 0 : index
    %c0_49 = arith.constant 0 : index
    %47 = vector.load %arg4[%c6, %c0_48, %c0_49] : memref<10x36x128xf32, #tpu.memory_space<vmem>>, vector<1x36x128xf32>
    %48 = vector.shape_cast %47 : vector<1x36x128xf32> to vector<36x128xf32>
    %cst_50 = arith.constant dense<0.000000e+00> : vector<36x9xf32>
    %49 = tpu.matmul %48, %5, %cst_50 {dimension_numbers = #tpu.dot_dimension_numbers<[1], [0], [0], [1], [0, 0, 1, 1], [], []>} : vector<36x128xf32>, vector<128x9xf32>, vector<36x9xf32> -> vector<36x9xf32>
    %c6_51 = arith.constant 6 : index
    %c0_52 = arith.constant 0 : index
    %c0_53 = arith.constant 0 : index
    %50 = vector.load %arg5[%c6_51, %c0_52, %c0_53] : memref<10x9x10xf32, #tpu.memory_space<vmem>>, vector<1x9x10xf32>
    %51 = vector.shape_cast %50 : vector<1x9x10xf32> to vector<9x10xf32>
    %cst_54 = arith.constant dense<0.000000e+00> : vector<36x10xf32>
    %52 = tpu.matmul %49, %51, %cst_54 {dimension_numbers = #tpu.dot_dimension_numbers<[1], [0], [0], [1], [0, 0, 1, 1], [], []>} : vector<36x9xf32>, vector<9x10xf32>, vector<36x10xf32> -> vector<36x10xf32>
    %53 = arith.addf %46, %52 : vector<36x10xf32>
    %c7 = arith.constant 7 : index
    %c0_55 = arith.constant 0 : index
    %c0_56 = arith.constant 0 : index
    %54 = vector.load %arg4[%c7, %c0_55, %c0_56] : memref<10x36x128xf32, #tpu.memory_space<vmem>>, vector<1x36x128xf32>
    %55 = vector.shape_cast %54 : vector<1x36x128xf32> to vector<36x128xf32>
    %cst_57 = arith.constant dense<0.000000e+00> : vector<36x9xf32>
    %56 = tpu.matmul %55, %5, %cst_57 {dimension_numbers = #tpu.dot_dimension_numbers<[1], [0], [0], [1], [0, 0, 1, 1], [], []>} : vector<36x128xf32>, vector<128x9xf32>, vector<36x9xf32> -> vector<36x9xf32>
    %c7_58 = arith.constant 7 : index
    %c0_59 = arith.constant 0 : index
    %c0_60 = arith.constant 0 : index
    %57 = vector.load %arg5[%c7_58, %c0_59, %c0_60] : memref<10x9x10xf32, #tpu.memory_space<vmem>>, vector<1x9x10xf32>
    %58 = vector.shape_cast %57 : vector<1x9x10xf32> to vector<9x10xf32>
    %cst_61 = arith.constant dense<0.000000e+00> : vector<36x10xf32>
    %59 = tpu.matmul %56, %58, %cst_61 {dimension_numbers = #tpu.dot_dimension_numbers<[1], [0], [0], [1], [0, 0, 1, 1], [], []>} : vector<36x9xf32>, vector<9x10xf32>, vector<36x10xf32> -> vector<36x10xf32>
    %60 = arith.addf %53, %59 : vector<36x10xf32>
    %c8 = arith.constant 8 : index
    %c0_62 = arith.constant 0 : index
    %c0_63 = arith.constant 0 : index
    %61 = vector.load %arg4[%c8, %c0_62, %c0_63] : memref<10x36x128xf32, #tpu.memory_space<vmem>>, vector<1x36x128xf32>
    %62 = vector.shape_cast %61 : vector<1x36x128xf32> to vector<36x128xf32>
    %cst_64 = arith.constant dense<0.000000e+00> : vector<36x9xf32>
    %63 = tpu.matmul %62, %5, %cst_64 {dimension_numbers = #tpu.dot_dimension_numbers<[1], [0], [0], [1], [0, 0, 1, 1], [], []>} : vector<36x128xf32>, vector<128x9xf32>, vector<36x9xf32> -> vector<36x9xf32>
    %c8_65 = arith.constant 8 : index
    %c0_66 = arith.constant 0 : index
    %c0_67 = arith.constant 0 : index
    %64 = vector.load %arg5[%c8_65, %c0_66, %c0_67] : memref<10x9x10xf32, #tpu.memory_space<vmem>>, vector<1x9x10xf32>
    %65 = vector.shape_cast %64 : vector<1x9x10xf32> to vector<9x10xf32>
    %cst_68 = arith.constant dense<0.000000e+00> : vector<36x10xf32>
    %66 = tpu.matmul %63, %65, %cst_68 {dimension_numbers = #tpu.dot_dimension_numbers<[1], [0], [0], [1], [0, 0, 1, 1], [], []>} : vector<36x9xf32>, vector<9x10xf32>, vector<36x10xf32> -> vector<36x10xf32>
    %67 = arith.addf %60, %66 : vector<36x10xf32>
    %c9 = arith.constant 9 : index
    %c0_69 = arith.constant 0 : index
    %c0_70 = arith.constant 0 : index
    %68 = vector.load %arg4[%c9, %c0_69, %c0_70] : memref<10x36x128xf32, #tpu.memory_space<vmem>>, vector<1x36x128xf32>
    %69 = vector.shape_cast %68 : vector<1x36x128xf32> to vector<36x128xf32>
    %cst_71 = arith.constant dense<0.000000e+00> : vector<36x9xf32>
    %70 = tpu.matmul %69, %5, %cst_71 {dimension_numbers = #tpu.dot_dimension_numbers<[1], [0], [0], [1], [0, 0, 1, 1], [], []>} : vector<36x128xf32>, vector<128x9xf32>, vector<36x9xf32> -> vector<36x9xf32>
    %c9_72 = arith.constant 9 : index
    %c0_73 = arith.constant 0 : index
    %c0_74 = arith.constant 0 : index
    %71 = vector.load %arg5[%c9_72, %c0_73, %c0_74] : memref<10x9x10xf32, #tpu.memory_space<vmem>>, vector<1x9x10xf32>
    %72 = vector.shape_cast %71 : vector<1x9x10xf32> to vector<9x10xf32>
    %cst_75 = arith.constant dense<0.000000e+00> : vector<36x10xf32>
    %73 = tpu.matmul %70, %72, %cst_75 {dimension_numbers = #tpu.dot_dimension_numbers<[1], [0], [0], [1], [0, 0, 1, 1], [], []>} : vector<36x9xf32>, vector<9x10xf32>, vector<36x10xf32> -> vector<36x10xf32>
    %74 = arith.addf %67, %73 : vector<36x10xf32>
    %c0_76 = arith.constant 0 : index
    %c0_77 = arith.constant 0 : index
    %75 = vector.load %arg6[%c0_76, %c0_77] : memref<1x10xf32, #tpu.memory_space<vmem>>, vector<1x10xf32>
    %76 = vector.broadcast %75 : vector<1x10xf32> to vector<36x10xf32>
    %77 = arith.addf %74, %76 : vector<36x10xf32>
    %cst_78 = arith.constant 0.000000e+00 : f32
    %78 = vector.broadcast %cst_78 : f32 to vector<36x10xf32>
    %79 = arith.maximumf %77, %78 : vector<36x10xf32>
    %c0_79 = arith.constant 0 : index
    %c0_80 = arith.constant 0 : index
    %c0_81 = arith.constant 0 : index
    %80 = vector.load %arg7[%c0_79, %c0_80, %c0_81] : memref<10x18x36xf32, #tpu.memory_space<vmem>>, vector<1x18x36xf32>
    %81 = vector.shape_cast %80 : vector<1x18x36xf32> to vector<18x36xf32>
    %cst_82 = arith.constant dense<0.000000e+00> : vector<18x10xf32>
    %82 = tpu.matmul %81, %79, %cst_82 {dimension_numbers = #tpu.dot_dimension_numbers<[1], [0], [0], [1], [0, 0, 1, 1], [], []>} : vector<18x36xf32>, vector<36x10xf32>, vector<18x10xf32> -> vector<18x10xf32>
    %c0_83 = arith.constant 0 : index
    %c0_84 = arith.constant 0 : index
    %c0_85 = arith.constant 0 : index
    %83 = vector.load %arg8[%c0_83, %c0_84, %c0_85] : memref<10x10x5xf32, #tpu.memory_space<vmem>>, vector<1x10x5xf32>
    %84 = vector.shape_cast %83 : vector<1x10x5xf32> to vector<10x5xf32>
    %cst_86 = arith.constant dense<0.000000e+00> : vector<18x5xf32>
    %85 = tpu.matmul %82, %84, %cst_86 {dimension_numbers = #tpu.dot_dimension_numbers<[1], [0], [0], [1], [0, 0, 1, 1], [], []>} : vector<18x10xf32>, vector<10x5xf32>, vector<18x5xf32> -> vector<18x5xf32>
    %c1_87 = arith.constant 1 : index
    %c0_88 = arith.constant 0 : index
    %c0_89 = arith.constant 0 : index
    %86 = vector.load %arg7[%c1_87, %c0_88, %c0_89] : memref<10x18x36xf32, #tpu.memory_space<vmem>>, vector<1x18x36xf32>
    %87 = vector.shape_cast %86 : vector<1x18x36xf32> to vector<18x36xf32>
    %cst_90 = arith.constant dense<0.000000e+00> : vector<18x10xf32>
    %88 = tpu.matmul %87, %79, %cst_90 {dimension_numbers = #tpu.dot_dimension_numbers<[1], [0], [0], [1], [0, 0, 1, 1], [], []>} : vector<18x36xf32>, vector<36x10xf32>, vector<18x10xf32> -> vector<18x10xf32>
    %c1_91 = arith.constant 1 : index
    %c0_92 = arith.constant 0 : index
    %c0_93 = arith.constant 0 : index
    %89 = vector.load %arg8[%c1_91, %c0_92, %c0_93] : memref<10x10x5xf32, #tpu.memory_space<vmem>>, vector<1x10x5xf32>
    %90 = vector.shape_cast %89 : vector<1x10x5xf32> to vector<10x5xf32>
    %cst_94 = arith.constant dense<0.000000e+00> : vector<18x5xf32>
    %91 = tpu.matmul %88, %90, %cst_94 {dimension_numbers = #tpu.dot_dimension_numbers<[1], [0], [0], [1], [0, 0, 1, 1], [], []>} : vector<18x10xf32>, vector<10x5xf32>, vector<18x5xf32> -> vector<18x5xf32>
    %92 = arith.addf %85, %91 : vector<18x5xf32>
    %c2_95 = arith.constant 2 : index
    %c0_96 = arith.constant 0 : index
    %c0_97 = arith.constant 0 : index
    %93 = vector.load %arg7[%c2_95, %c0_96, %c0_97] : memref<10x18x36xf32, #tpu.memory_space<vmem>>, vector<1x18x36xf32>
    %94 = vector.shape_cast %93 : vector<1x18x36xf32> to vector<18x36xf32>
    %cst_98 = arith.constant dense<0.000000e+00> : vector<18x10xf32>
    %95 = tpu.matmul %94, %79, %cst_98 {dimension_numbers = #tpu.dot_dimension_numbers<[1], [0], [0], [1], [0, 0, 1, 1], [], []>} : vector<18x36xf32>, vector<36x10xf32>, vector<18x10xf32> -> vector<18x10xf32>
    %c2_99 = arith.constant 2 : index
    %c0_100 = arith.constant 0 : index
    %c0_101 = arith.constant 0 : index
    %96 = vector.load %arg8[%c2_99, %c0_100, %c0_101] : memref<10x10x5xf32, #tpu.memory_space<vmem>>, vector<1x10x5xf32>
    %97 = vector.shape_cast %96 : vector<1x10x5xf32> to vector<10x5xf32>
    %cst_102 = arith.constant dense<0.000000e+00> : vector<18x5xf32>
    %98 = tpu.matmul %95, %97, %cst_102 {dimension_numbers = #tpu.dot_dimension_numbers<[1], [0], [0], [1], [0, 0, 1, 1], [], []>} : vector<18x10xf32>, vector<10x5xf32>, vector<18x5xf32> -> vector<18x5xf32>
    %99 = arith.addf %92, %98 : vector<18x5xf32>
    %c3_103 = arith.constant 3 : index
    %c0_104 = arith.constant 0 : index
    %c0_105 = arith.constant 0 : index
    %100 = vector.load %arg7[%c3_103, %c0_104, %c0_105] : memref<10x18x36xf32, #tpu.memory_space<vmem>>, vector<1x18x36xf32>
    %101 = vector.shape_cast %100 : vector<1x18x36xf32> to vector<18x36xf32>
    %cst_106 = arith.constant dense<0.000000e+00> : vector<18x10xf32>
    %102 = tpu.matmul %101, %79, %cst_106 {dimension_numbers = #tpu.dot_dimension_numbers<[1], [0], [0], [1], [0, 0, 1, 1], [], []>} : vector<18x36xf32>, vector<36x10xf32>, vector<18x10xf32> -> vector<18x10xf32>
    %c3_107 = arith.constant 3 : index
    %c0_108 = arith.constant 0 : index
    %c0_109 = arith.constant 0 : index
    %103 = vector.load %arg8[%c3_107, %c0_108, %c0_109] : memref<10x10x5xf32, #tpu.memory_space<vmem>>, vector<1x10x5xf32>
    %104 = vector.shape_cast %103 : vector<1x10x5xf32> to vector<10x5xf32>
    %cst_110 = arith.constant dense<0.000000e+00> : vector<18x5xf32>
    %105 = tpu.matmul %102, %104, %cst_110 {dimension_numbers = #tpu.dot_dimension_numbers<[1], [0], [0], [1], [0, 0, 1, 1], [], []>} : vector<18x10xf32>, vector<10x5xf32>, vector<18x5xf32> -> vector<18x5xf32>
    %106 = arith.addf %99, %105 : vector<18x5xf32>
    %c4_111 = arith.constant 4 : index
    %c0_112 = arith.constant 0 : index
    %c0_113 = arith.constant 0 : index
    %107 = vector.load %arg7[%c4_111, %c0_112, %c0_113] : memref<10x18x36xf32, #tpu.memory_space<vmem>>, vector<1x18x36xf32>
    %108 = vector.shape_cast %107 : vector<1x18x36xf32> to vector<18x36xf32>
    %cst_114 = arith.constant dense<0.000000e+00> : vector<18x10xf32>
    %109 = tpu.matmul %108, %79, %cst_114 {dimension_numbers = #tpu.dot_dimension_numbers<[1], [0], [0], [1], [0, 0, 1, 1], [], []>} : vector<18x36xf32>, vector<36x10xf32>, vector<18x10xf32> -> vector<18x10xf32>
    %c4_115 = arith.constant 4 : index
    %c0_116 = arith.constant 0 : index
    %c0_117 = arith.constant 0 : index
    %110 = vector.load %arg8[%c4_115, %c0_116, %c0_117] : memref<10x10x5xf32, #tpu.memory_space<vmem>>, vector<1x10x5xf32>
    %111 = vector.shape_cast %110 : vector<1x10x5xf32> to vector<10x5xf32>
    %cst_118 = arith.constant dense<0.000000e+00> : vector<18x5xf32>
    %112 = tpu.matmul %109, %111, %cst_118 {dimension_numbers = #tpu.dot_dimension_numbers<[1], [0], [0], [1], [0, 0, 1, 1], [], []>} : vector<18x10xf32>, vector<10x5xf32>, vector<18x5xf32> -> vector<18x5xf32>
    %113 = arith.addf %106, %112 : vector<18x5xf32>
    %c5_119 = arith.constant 5 : index
    %c0_120 = arith.constant 0 : index
    %c0_121 = arith.constant 0 : index
    %114 = vector.load %arg7[%c5_119, %c0_120, %c0_121] : memref<10x18x36xf32, #tpu.memory_space<vmem>>, vector<1x18x36xf32>
    %115 = vector.shape_cast %114 : vector<1x18x36xf32> to vector<18x36xf32>
    %cst_122 = arith.constant dense<0.000000e+00> : vector<18x10xf32>
    %116 = tpu.matmul %115, %79, %cst_122 {dimension_numbers = #tpu.dot_dimension_numbers<[1], [0], [0], [1], [0, 0, 1, 1], [], []>} : vector<18x36xf32>, vector<36x10xf32>, vector<18x10xf32> -> vector<18x10xf32>
    %c5_123 = arith.constant 5 : index
    %c0_124 = arith.constant 0 : index
    %c0_125 = arith.constant 0 : index
    %117 = vector.load %arg8[%c5_123, %c0_124, %c0_125] : memref<10x10x5xf32, #tpu.memory_space<vmem>>, vector<1x10x5xf32>
    %118 = vector.shape_cast %117 : vector<1x10x5xf32> to vector<10x5xf32>
    %cst_126 = arith.constant dense<0.000000e+00> : vector<18x5xf32>
    %119 = tpu.matmul %116, %118, %cst_126 {dimension_numbers = #tpu.dot_dimension_numbers<[1], [0], [0], [1], [0, 0, 1, 1], [], []>} : vector<18x10xf32>, vector<10x5xf32>, vector<18x5xf32> -> vector<18x5xf32>
    %120 = arith.addf %113, %119 : vector<18x5xf32>
    %c6_127 = arith.constant 6 : index
    %c0_128 = arith.constant 0 : index
    %c0_129 = arith.constant 0 : index
    %121 = vector.load %arg7[%c6_127, %c0_128, %c0_129] : memref<10x18x36xf32, #tpu.memory_space<vmem>>, vector<1x18x36xf32>
    %122 = vector.shape_cast %121 : vector<1x18x36xf32> to vector<18x36xf32>
    %cst_130 = arith.constant dense<0.000000e+00> : vector<18x10xf32>
    %123 = tpu.matmul %122, %79, %cst_130 {dimension_numbers = #tpu.dot_dimension_numbers<[1], [0], [0], [1], [0, 0, 1, 1], [], []>} : vector<18x36xf32>, vector<36x10xf32>, vector<18x10xf32> -> vector<18x10xf32>
    %c6_131 = arith.constant 6 : index
    %c0_132 = arith.constant 0 : index
    %c0_133 = arith.constant 0 : index
    %124 = vector.load %arg8[%c6_131, %c0_132, %c0_133] : memref<10x10x5xf32, #tpu.memory_space<vmem>>, vector<1x10x5xf32>
    %125 = vector.shape_cast %124 : vector<1x10x5xf32> to vector<10x5xf32>
    %cst_134 = arith.constant dense<0.000000e+00> : vector<18x5xf32>
    %126 = tpu.matmul %123, %125, %cst_134 {dimension_numbers = #tpu.dot_dimension_numbers<[1], [0], [0], [1], [0, 0, 1, 1], [], []>} : vector<18x10xf32>, vector<10x5xf32>, vector<18x5xf32> -> vector<18x5xf32>
    %127 = arith.addf %120, %126 : vector<18x5xf32>
    %c7_135 = arith.constant 7 : index
    %c0_136 = arith.constant 0 : index
    %c0_137 = arith.constant 0 : index
    %128 = vector.load %arg7[%c7_135, %c0_136, %c0_137] : memref<10x18x36xf32, #tpu.memory_space<vmem>>, vector<1x18x36xf32>
    %129 = vector.shape_cast %128 : vector<1x18x36xf32> to vector<18x36xf32>
    %cst_138 = arith.constant dense<0.000000e+00> : vector<18x10xf32>
    %130 = tpu.matmul %129, %79, %cst_138 {dimension_numbers = #tpu.dot_dimension_numbers<[1], [0], [0], [1], [0, 0, 1, 1], [], []>} : vector<18x36xf32>, vector<36x10xf32>, vector<18x10xf32> -> vector<18x10xf32>
    %c7_139 = arith.constant 7 : index
    %c0_140 = arith.constant 0 : index
    %c0_141 = arith.constant 0 : index
    %131 = vector.load %arg8[%c7_139, %c0_140, %c0_141] : memref<10x10x5xf32, #tpu.memory_space<vmem>>, vector<1x10x5xf32>
    %132 = vector.shape_cast %131 : vector<1x10x5xf32> to vector<10x5xf32>
    %cst_142 = arith.constant dense<0.000000e+00> : vector<18x5xf32>
    %133 = tpu.matmul %130, %132, %cst_142 {dimension_numbers = #tpu.dot_dimension_numbers<[1], [0], [0], [1], [0, 0, 1, 1], [], []>} : vector<18x10xf32>, vector<10x5xf32>, vector<18x5xf32> -> vector<18x5xf32>
    %134 = arith.addf %127, %133 : vector<18x5xf32>
    %c8_143 = arith.constant 8 : index
    %c0_144 = arith.constant 0 : index
    %c0_145 = arith.constant 0 : index
    %135 = vector.load %arg7[%c8_143, %c0_144, %c0_145] : memref<10x18x36xf32, #tpu.memory_space<vmem>>, vector<1x18x36xf32>
    %136 = vector.shape_cast %135 : vector<1x18x36xf32> to vector<18x36xf32>
    %cst_146 = arith.constant dense<0.000000e+00> : vector<18x10xf32>
    %137 = tpu.matmul %136, %79, %cst_146 {dimension_numbers = #tpu.dot_dimension_numbers<[1], [0], [0], [1], [0, 0, 1, 1], [], []>} : vector<18x36xf32>, vector<36x10xf32>, vector<18x10xf32> -> vector<18x10xf32>
    %c8_147 = arith.constant 8 : index
    %c0_148 = arith.constant 0 : index
    %c0_149 = arith.constant 0 : index
    %138 = vector.load %arg8[%c8_147, %c0_148, %c0_149] : memref<10x10x5xf32, #tpu.memory_space<vmem>>, vector<1x10x5xf32>
    %139 = vector.shape_cast %138 : vector<1x10x5xf32> to vector<10x5xf32>
    %cst_150 = arith.constant dense<0.000000e+00> : vector<18x5xf32>
    %140 = tpu.matmul %137, %139, %cst_150 {dimension_numbers = #tpu.dot_dimension_numbers<[1], [0], [0], [1], [0, 0, 1, 1], [], []>} : vector<18x10xf32>, vector<10x5xf32>, vector<18x5xf32> -> vector<18x5xf32>
    %141 = arith.addf %134, %140 : vector<18x5xf32>
    %c9_151 = arith.constant 9 : index
    %c0_152 = arith.constant 0 : index
    %c0_153 = arith.constant 0 : index
    %142 = vector.load %arg7[%c9_151, %c0_152, %c0_153] : memref<10x18x36xf32, #tpu.memory_space<vmem>>, vector<1x18x36xf32>
    %143 = vector.shape_cast %142 : vector<1x18x36xf32> to vector<18x36xf32>
    %cst_154 = arith.constant dense<0.000000e+00> : vector<18x10xf32>
    %144 = tpu.matmul %143, %79, %cst_154 {dimension_numbers = #tpu.dot_dimension_numbers<[1], [0], [0], [1], [0, 0, 1, 1], [], []>} : vector<18x36xf32>, vector<36x10xf32>, vector<18x10xf32> -> vector<18x10xf32>
    %c9_155 = arith.constant 9 : index
    %c0_156 = arith.constant 0 : index
    %c0_157 = arith.constant 0 : index
    %145 = vector.load %arg8[%c9_155, %c0_156, %c0_157] : memref<10x10x5xf32, #tpu.memory_space<vmem>>, vector<1x10x5xf32>
    %146 = vector.shape_cast %145 : vector<1x10x5xf32> to vector<10x5xf32>
    %cst_158 = arith.constant dense<0.000000e+00> : vector<18x5xf32>
    %147 = tpu.matmul %144, %146, %cst_158 {dimension_numbers = #tpu.dot_dimension_numbers<[1], [0], [0], [1], [0, 0, 1, 1], [], []>} : vector<18x10xf32>, vector<10x5xf32>, vector<18x5xf32> -> vector<18x5xf32>
    %148 = arith.addf %141, %147 : vector<18x5xf32>
    %c0_159 = arith.constant 0 : index
    %c0_160 = arith.constant 0 : index
    %149 = vector.load %arg9[%c0_159, %c0_160] : memref<1x5xf32, #tpu.memory_space<vmem>>, vector<1x5xf32>
    %150 = vector.broadcast %149 : vector<1x5xf32> to vector<18x5xf32>
    %151 = arith.addf %148, %150 : vector<18x5xf32>
    %cst_161 = arith.constant 0.000000e+00 : f32
    %152 = vector.broadcast %cst_161 : f32 to vector<18x5xf32>
    %153 = arith.maximumf %151, %152 : vector<18x5xf32>
    %c0_162 = arith.constant 0 : index
    %c0_163 = arith.constant 0 : index
    %c0_164 = arith.constant 0 : index
    %154 = vector.load %arg10[%c0_162, %c0_163, %c0_164] : memref<9x2x18xf32, #tpu.memory_space<vmem>>, vector<1x2x18xf32>
    %155 = vector.shape_cast %154 : vector<1x2x18xf32> to vector<2x18xf32>
    %cst_165 = arith.constant dense<0.000000e+00> : vector<2x5xf32>
    %156 = tpu.matmul %155, %153, %cst_165 {dimension_numbers = #tpu.dot_dimension_numbers<[1], [0], [0], [1], [0, 0, 1, 1], [], []>} : vector<2x18xf32>, vector<18x5xf32>, vector<2x5xf32> -> vector<2x5xf32>
    %c0_166 = arith.constant 0 : index
    %c0_167 = arith.constant 0 : index
    %c0_168 = arith.constant 0 : index
    %157 = vector.load %arg11[%c0_166, %c0_167, %c0_168] : memref<9x5x10xf32, #tpu.memory_space<vmem>>, vector<1x5x10xf32>
    %158 = vector.shape_cast %157 : vector<1x5x10xf32> to vector<5x10xf32>
    %cst_169 = arith.constant dense<0.000000e+00> : vector<2x10xf32>
    %159 = tpu.matmul %156, %158, %cst_169 {dimension_numbers = #tpu.dot_dimension_numbers<[1], [0], [0], [1], [0, 0, 1, 1], [], []>} : vector<2x5xf32>, vector<5x10xf32>, vector<2x10xf32> -> vector<2x10xf32>
    %c1_170 = arith.constant 1 : index
    %c0_171 = arith.constant 0 : index
    %c0_172 = arith.constant 0 : index
    %160 = vector.load %arg10[%c1_170, %c0_171, %c0_172] : memref<9x2x18xf32, #tpu.memory_space<vmem>>, vector<1x2x18xf32>
    %161 = vector.shape_cast %160 : vector<1x2x18xf32> to vector<2x18xf32>
    %cst_173 = arith.constant dense<0.000000e+00> : vector<2x5xf32>
    %162 = tpu.matmul %161, %153, %cst_173 {dimension_numbers = #tpu.dot_dimension_numbers<[1], [0], [0], [1], [0, 0, 1, 1], [], []>} : vector<2x18xf32>, vector<18x5xf32>, vector<2x5xf32> -> vector<2x5xf32>
    %c1_174 = arith.constant 1 : index
    %c0_175 = arith.constant 0 : index
    %c0_176 = arith.constant 0 : index
    %163 = vector.load %arg11[%c1_174, %c0_175, %c0_176] : memref<9x5x10xf32, #tpu.memory_space<vmem>>, vector<1x5x10xf32>
    %164 = vector.shape_cast %163 : vector<1x5x10xf32> to vector<5x10xf32>
    %cst_177 = arith.constant dense<0.000000e+00> : vector<2x10xf32>
    %165 = tpu.matmul %162, %164, %cst_177 {dimension_numbers = #tpu.dot_dimension_numbers<[1], [0], [0], [1], [0, 0, 1, 1], [], []>} : vector<2x5xf32>, vector<5x10xf32>, vector<2x10xf32> -> vector<2x10xf32>
    %166 = arith.addf %159, %165 : vector<2x10xf32>
    %c2_178 = arith.constant 2 : index
    %c0_179 = arith.constant 0 : index
    %c0_180 = arith.constant 0 : index
    %167 = vector.load %arg10[%c2_178, %c0_179, %c0_180] : memref<9x2x18xf32, #tpu.memory_space<vmem>>, vector<1x2x18xf32>
    %168 = vector.shape_cast %167 : vector<1x2x18xf32> to vector<2x18xf32>
    %cst_181 = arith.constant dense<0.000000e+00> : vector<2x5xf32>
    %169 = tpu.matmul %168, %153, %cst_181 {dimension_numbers = #tpu.dot_dimension_numbers<[1], [0], [0], [1], [0, 0, 1, 1], [], []>} : vector<2x18xf32>, vector<18x5xf32>, vector<2x5xf32> -> vector<2x5xf32>
    %c2_182 = arith.constant 2 : index
    %c0_183 = arith.constant 0 : index
    %c0_184 = arith.constant 0 : index
    %170 = vector.load %arg11[%c2_182, %c0_183, %c0_184] : memref<9x5x10xf32, #tpu.memory_space<vmem>>, vector<1x5x10xf32>
    %171 = vector.shape_cast %170 : vector<1x5x10xf32> to vector<5x10xf32>
    %cst_185 = arith.constant dense<0.000000e+00> : vector<2x10xf32>
    %172 = tpu.matmul %169, %171, %cst_185 {dimension_numbers = #tpu.dot_dimension_numbers<[1], [0], [0], [1], [0, 0, 1, 1], [], []>} : vector<2x5xf32>, vector<5x10xf32>, vector<2x10xf32> -> vector<2x10xf32>
    %173 = arith.addf %166, %172 : vector<2x10xf32>
    %c3_186 = arith.constant 3 : index
    %c0_187 = arith.constant 0 : index
    %c0_188 = arith.constant 0 : index
    %174 = vector.load %arg10[%c3_186, %c0_187, %c0_188] : memref<9x2x18xf32, #tpu.memory_space<vmem>>, vector<1x2x18xf32>
    %175 = vector.shape_cast %174 : vector<1x2x18xf32> to vector<2x18xf32>
    %cst_189 = arith.constant dense<0.000000e+00> : vector<2x5xf32>
    %176 = tpu.matmul %175, %153, %cst_189 {dimension_numbers = #tpu.dot_dimension_numbers<[1], [0], [0], [1], [0, 0, 1, 1], [], []>} : vector<2x18xf32>, vector<18x5xf32>, vector<2x5xf32> -> vector<2x5xf32>
    %c3_190 = arith.constant 3 : index
    %c0_191 = arith.constant 0 : index
    %c0_192 = arith.constant 0 : index
    %177 = vector.load %arg11[%c3_190, %c0_191, %c0_192] : memref<9x5x10xf32, #tpu.memory_space<vmem>>, vector<1x5x10xf32>
    %178 = vector.shape_cast %177 : vector<1x5x10xf32> to vector<5x10xf32>
    %cst_193 = arith.constant dense<0.000000e+00> : vector<2x10xf32>
    %179 = tpu.matmul %176, %178, %cst_193 {dimension_numbers = #tpu.dot_dimension_numbers<[1], [0], [0], [1], [0, 0, 1, 1], [], []>} : vector<2x5xf32>, vector<5x10xf32>, vector<2x10xf32> -> vector<2x10xf32>
    %180 = arith.addf %173, %179 : vector<2x10xf32>
    %c4_194 = arith.constant 4 : index
    %c0_195 = arith.constant 0 : index
    %c0_196 = arith.constant 0 : index
    %181 = vector.load %arg10[%c4_194, %c0_195, %c0_196] : memref<9x2x18xf32, #tpu.memory_space<vmem>>, vector<1x2x18xf32>
    %182 = vector.shape_cast %181 : vector<1x2x18xf32> to vector<2x18xf32>
    %cst_197 = arith.constant dense<0.000000e+00> : vector<2x5xf32>
    %183 = tpu.matmul %182, %153, %cst_197 {dimension_numbers = #tpu.dot_dimension_numbers<[1], [0], [0], [1], [0, 0, 1, 1], [], []>} : vector<2x18xf32>, vector<18x5xf32>, vector<2x5xf32> -> vector<2x5xf32>
    %c4_198 = arith.constant 4 : index
    %c0_199 = arith.constant 0 : index
    %c0_200 = arith.constant 0 : index
    %184 = vector.load %arg11[%c4_198, %c0_199, %c0_200] : memref<9x5x10xf32, #tpu.memory_space<vmem>>, vector<1x5x10xf32>
    %185 = vector.shape_cast %184 : vector<1x5x10xf32> to vector<5x10xf32>
    %cst_201 = arith.constant dense<0.000000e+00> : vector<2x10xf32>
    %186 = tpu.matmul %183, %185, %cst_201 {dimension_numbers = #tpu.dot_dimension_numbers<[1], [0], [0], [1], [0, 0, 1, 1], [], []>} : vector<2x5xf32>, vector<5x10xf32>, vector<2x10xf32> -> vector<2x10xf32>
    %187 = arith.addf %180, %186 : vector<2x10xf32>
    %c5_202 = arith.constant 5 : index
    %c0_203 = arith.constant 0 : index
    %c0_204 = arith.constant 0 : index
    %188 = vector.load %arg10[%c5_202, %c0_203, %c0_204] : memref<9x2x18xf32, #tpu.memory_space<vmem>>, vector<1x2x18xf32>
    %189 = vector.shape_cast %188 : vector<1x2x18xf32> to vector<2x18xf32>
    %cst_205 = arith.constant dense<0.000000e+00> : vector<2x5xf32>
    %190 = tpu.matmul %189, %153, %cst_205 {dimension_numbers = #tpu.dot_dimension_numbers<[1], [0], [0], [1], [0, 0, 1, 1], [], []>} : vector<2x18xf32>, vector<18x5xf32>, vector<2x5xf32> -> vector<2x5xf32>
    %c5_206 = arith.constant 5 : index
    %c0_207 = arith.constant 0 : index
    %c0_208 = arith.constant 0 : index
    %191 = vector.load %arg11[%c5_206, %c0_207, %c0_208] : memref<9x5x10xf32, #tpu.memory_space<vmem>>, vector<1x5x10xf32>
    %192 = vector.shape_cast %191 : vector<1x5x10xf32> to vector<5x10xf32>
    %cst_209 = arith.constant dense<0.000000e+00> : vector<2x10xf32>
    %193 = tpu.matmul %190, %192, %cst_209 {dimension_numbers = #tpu.dot_dimension_numbers<[1], [0], [0], [1], [0, 0, 1, 1], [], []>} : vector<2x5xf32>, vector<5x10xf32>, vector<2x10xf32> -> vector<2x10xf32>
    %194 = arith.addf %187, %193 : vector<2x10xf32>
    %c6_210 = arith.constant 6 : index
    %c0_211 = arith.constant 0 : index
    %c0_212 = arith.constant 0 : index
    %195 = vector.load %arg10[%c6_210, %c0_211, %c0_212] : memref<9x2x18xf32, #tpu.memory_space<vmem>>, vector<1x2x18xf32>
    %196 = vector.shape_cast %195 : vector<1x2x18xf32> to vector<2x18xf32>
    %cst_213 = arith.constant dense<0.000000e+00> : vector<2x5xf32>
    %197 = tpu.matmul %196, %153, %cst_213 {dimension_numbers = #tpu.dot_dimension_numbers<[1], [0], [0], [1], [0, 0, 1, 1], [], []>} : vector<2x18xf32>, vector<18x5xf32>, vector<2x5xf32> -> vector<2x5xf32>
    %c6_214 = arith.constant 6 : index
    %c0_215 = arith.constant 0 : index
    %c0_216 = arith.constant 0 : index
    %198 = vector.load %arg11[%c6_214, %c0_215, %c0_216] : memref<9x5x10xf32, #tpu.memory_space<vmem>>, vector<1x5x10xf32>
    %199 = vector.shape_cast %198 : vector<1x5x10xf32> to vector<5x10xf32>
    %cst_217 = arith.constant dense<0.000000e+00> : vector<2x10xf32>
    %200 = tpu.matmul %197, %199, %cst_217 {dimension_numbers = #tpu.dot_dimension_numbers<[1], [0], [0], [1], [0, 0, 1, 1], [], []>} : vector<2x5xf32>, vector<5x10xf32>, vector<2x10xf32> -> vector<2x10xf32>
    %201 = arith.addf %194, %200 : vector<2x10xf32>
    %c7_218 = arith.constant 7 : index
    %c0_219 = arith.constant 0 : index
    %c0_220 = arith.constant 0 : index
    %202 = vector.load %arg10[%c7_218, %c0_219, %c0_220] : memref<9x2x18xf32, #tpu.memory_space<vmem>>, vector<1x2x18xf32>
    %203 = vector.shape_cast %202 : vector<1x2x18xf32> to vector<2x18xf32>
    %cst_221 = arith.constant dense<0.000000e+00> : vector<2x5xf32>
    %204 = tpu.matmul %203, %153, %cst_221 {dimension_numbers = #tpu.dot_dimension_numbers<[1], [0], [0], [1], [0, 0, 1, 1], [], []>} : vector<2x18xf32>, vector<18x5xf32>, vector<2x5xf32> -> vector<2x5xf32>
    %c7_222 = arith.constant 7 : index
    %c0_223 = arith.constant 0 : index
    %c0_224 = arith.constant 0 : index
    %205 = vector.load %arg11[%c7_222, %c0_223, %c0_224] : memref<9x5x10xf32, #tpu.memory_space<vmem>>, vector<1x5x10xf32>
    %206 = vector.shape_cast %205 : vector<1x5x10xf32> to vector<5x10xf32>
    %cst_225 = arith.constant dense<0.000000e+00> : vector<2x10xf32>
    %207 = tpu.matmul %204, %206, %cst_225 {dimension_numbers = #tpu.dot_dimension_numbers<[1], [0], [0], [1], [0, 0, 1, 1], [], []>} : vector<2x5xf32>, vector<5x10xf32>, vector<2x10xf32> -> vector<2x10xf32>
    %208 = arith.addf %201, %207 : vector<2x10xf32>
    %c8_226 = arith.constant 8 : index
    %c0_227 = arith.constant 0 : index
    %c0_228 = arith.constant 0 : index
    %209 = vector.load %arg10[%c8_226, %c0_227, %c0_228] : memref<9x2x18xf32, #tpu.memory_space<vmem>>, vector<1x2x18xf32>
    %210 = vector.shape_cast %209 : vector<1x2x18xf32> to vector<2x18xf32>
    %cst_229 = arith.constant dense<0.000000e+00> : vector<2x5xf32>
    %211 = tpu.matmul %210, %153, %cst_229 {dimension_numbers = #tpu.dot_dimension_numbers<[1], [0], [0], [1], [0, 0, 1, 1], [], []>} : vector<2x18xf32>, vector<18x5xf32>, vector<2x5xf32> -> vector<2x5xf32>
    %c8_230 = arith.constant 8 : index
    %c0_231 = arith.constant 0 : index
    %c0_232 = arith.constant 0 : index
    %212 = vector.load %arg11[%c8_230, %c0_231, %c0_232] : memref<9x5x10xf32, #tpu.memory_space<vmem>>, vector<1x5x10xf32>
    %213 = vector.shape_cast %212 : vector<1x5x10xf32> to vector<5x10xf32>
    %cst_233 = arith.constant dense<0.000000e+00> : vector<2x10xf32>
    %214 = tpu.matmul %211, %213, %cst_233 {dimension_numbers = #tpu.dot_dimension_numbers<[1], [0], [0], [1], [0, 0, 1, 1], [], []>} : vector<2x5xf32>, vector<5x10xf32>, vector<2x10xf32> -> vector<2x10xf32>
    %215 = arith.addf %208, %214 : vector<2x10xf32>
    %c0_234 = arith.constant 0 : index
    %c0_235 = arith.constant 0 : index
    %216 = vector.load %arg12[%c0_234, %c0_235] : memref<1x10xf32, #tpu.memory_space<vmem>>, vector<1x10xf32>
    %217 = vector.broadcast %216 : vector<1x10xf32> to vector<2x10xf32>
    %218 = arith.addf %215, %217 : vector<2x10xf32>
    %c0_236 = arith.constant 0 : index
    %c0_237 = arith.constant 0 : index
    %219 = vector.load %arg13[%c0_236, %c0_237] : memref<1x10xf32, #tpu.memory_space<vmem>>, vector<1x10xf32>
    %220 = vector.broadcast %219 : vector<1x10xf32> to vector<2x10xf32>
    %221 = arith.mulf %218, %220 : vector<2x10xf32>
    %cst_238 = arith.constant dense<0.000000e+00> : vector<2xf32>
    %222 = vector.multi_reduction <add>, %221, %cst_238 [1] : vector<2x10xf32> to vector<2xf32>
    %223 = vector.shape_cast %222 : vector<2xf32> to vector<2x1xf32>
    %c0_239 = arith.constant 0 : index
    %c0_240 = arith.constant 0 : index
    %224 = vector.load %arg14[%c0_239, %c0_240] : memref<1x1xf32, #tpu.memory_space<vmem>>, vector<1x1xf32>
    %225 = vector.broadcast %224 : vector<1x1xf32> to vector<2x1xf32>
    %226 = arith.addf %223, %225 : vector<2x1xf32>
    %cst_241 = arith.constant 5.000000e-01 : f32
    %227 = vector.broadcast %cst_241 : f32 to vector<2x1xf32>
    %228 = arith.mulf %227, %226 : vector<2x1xf32>
    %229 = math.tanh %228 : vector<2x1xf32>
    %cst_242 = arith.constant 1.000000e+00 : f32
    %230 = vector.broadcast %cst_242 : f32 to vector<2x1xf32>
    %231 = arith.addf %229, %230 : vector<2x1xf32>
    %cst_243 = arith.constant 5.000000e-01 : f32
    %232 = vector.broadcast %cst_243 : f32 to vector<2x1xf32>
    %233 = arith.mulf %232, %231 : vector<2x1xf32>
    %c0_244 = arith.constant 0 : index
    %c0_245 = arith.constant 0 : index
    %234 = vector.load %arg15[%c0_244, %c0_245] : memref<2x1xf32, #tpu.memory_space<vmem>>, vector<2x1xf32>
    tpu.vector_store %arg15[%c0_244, %c0_245], %233 {strides = array<i32>} : memref<2x1xf32, #tpu.memory_space<vmem>>, vector<2x1xf32>,
    return
  }
  func.func @transform_0(%arg0: i32) -> (i32, i32) {
    %c0_i32 = arith.constant 0 : i32
    %c0_i32_0 = arith.constant 0 : i32
    %c0_i32_1 = arith.constant 0 : i32
    return %c0_i32, %c0_i32_0 : i32, i32
  }
  func.func @transform_1(%arg0: i32) -> (i32, i32) {
    %c0_i32 = arith.constant 0 : i32
    %c0_i32_0 = arith.constant 0 : i32
    %c0_i32_1 = arith.constant 0 : i32
    return %c0_i32, %c0_i32_0 : i32, i32
  }
  func.func @transform_2(%arg0: i32) -> (i32, i32) {
    %c0_i32 = arith.constant 0 : i32
    %c0_i32_0 = arith.constant 0 : i32
    %c0_i32_1 = arith.constant 0 : i32
    return %c0_i32, %c0_i32_0 : i32, i32
  }
  func.func @transform_3(%arg0: i32) -> (i32, i32, i32) {
    %c0_i32 = arith.constant 0 : i32
    %c0_i32_0 = arith.constant 0 : i32
    %c0_i32_1 = arith.constant 0 : i32
    %c0_i32_2 = arith.constant 0 : i32
    return %c0_i32, %c0_i32_0, %c0_i32_1 : i32, i32, i32
  }
  func.func @transform_4(%arg0: i32) -> (i32, i32, i32) {
    %c0_i32 = arith.constant 0 : i32
    %c0_i32_0 = arith.constant 0 : i32
    %c0_i32_1 = arith.constant 0 : i32
    %c0_i32_2 = arith.constant 0 : i32
    return %c0_i32, %c0_i32_0, %c0_i32_1 : i32, i32, i32
  }
  func.func @transform_5(%arg0: i32) -> (i32, i32) {
    %c0_i32 = arith.constant 0 : i32
    %c0_i32_0 = arith.constant 0 : i32
    %c0_i32_1 = arith.constant 0 : i32
    return %c0_i32, %c0_i32_0 : i32, i32
  }
  func.func @transform_6(%arg0: i32) -> (i32, i32, i32) {
    %c0_i32 = arith.constant 0 : i32
    %c0_i32_0 = arith.constant 0 : i32
    %c0_i32_1 = arith.constant 0 : i32
    %c0_i32_2 = arith.constant 0 : i32
    return %c0_i32, %c0_i32_0, %c0_i32_1 : i32, i32, i32
  }
  func.func @transform_7(%arg0: i32) -> (i32, i32, i32) {
    %c0_i32 = arith.constant 0 : i32
    %c0_i32_0 = arith.constant 0 : i32
    %c0_i32_1 = arith.constant 0 : i32
    %c0_i32_2 = arith.constant 0 : i32
    return %c0_i32, %c0_i32_0, %c0_i32_1 : i32, i32, i32
  }
  func.func @transform_8(%arg0: i32) -> (i32, i32) {
    %c0_i32 = arith.constant 0 : i32
    %c0_i32_0 = arith.constant 0 : i32
    %c0_i32_1 = arith.constant 0 : i32
    return %c0_i32, %c0_i32_0 : i32, i32
  }
  func.func @transform_9(%arg0: i32) -> (i32, i32, i32) {
    %c0_i32 = arith.constant 0 : i32
    %c0_i32_0 = arith.constant 0 : i32
    %c0_i32_1 = arith.constant 0 : i32
    %c0_i32_2 = arith.constant 0 : i32
    return %c0_i32, %c0_i32_0, %c0_i32_1 : i32, i32, i32
  }
  func.func @transform_10(%arg0: i32) -> (i32, i32, i32) {
    %c0_i32 = arith.constant 0 : i32
    %c0_i32_0 = arith.constant 0 : i32
    %c0_i32_1 = arith.constant 0 : i32
    %c0_i32_2 = arith.constant 0 : i32
    return %c0_i32, %c0_i32_0, %c0_i32_1 : i32, i32, i32
  }
  func.func @transform_11(%arg0: i32) -> (i32, i32) {
    %c0_i32 = arith.constant 0 : i32
    %c0_i32_0 = arith.constant 0 : i32
    %c0_i32_1 = arith.constant 0 : i32
    return %c0_i32, %c0_i32_0 : i32, i32
  }
  func.func @transform_12(%arg0: i32) -> (i32, i32) {
    %c0_i32 = arith.constant 0 : i32
    %c0_i32_0 = arith.constant 0 : i32
    %c0_i32_1 = arith.constant 0 : i32
    return %c0_i32, %c0_i32_0 : i32, i32
  }
  func.func @transform_13(%arg0: i32) -> (i32, i32) {
    %c0_i32 = arith.constant 0 : i32
    %c0_i32_0 = arith.constant 0 : i32
    %c0_i32_1 = arith.constant 0 : i32
    return %c0_i32, %c0_i32_0 : i32, i32
  }
  func.func @transform_14(%arg0: i32) -> (i32, i32) {
    %c0_i32 = arith.constant 0 : i32
    %c0_i32_0 = arith.constant 0 : i32
    %c0_i32_1 = arith.constant 0 : i32
    return %c0_i32, %c0_i32_0 : i32, i32
  }
}

</mosaic_0001>

<bundles_post_ra>
// kernel: net_forward.1
= control target key start
LH: loop header
LB: loop body
LE: loop exit
PB: predicated region body
PF: predicated region fallthrough
CT: control target
= control target key end

     0   :  { %v8137_v0 = vmov 0.0|0.0   ;;  %vm118_vm0 = vcmask 916480   ;;  %vm8138_vm1 = vmmov 0   ;;  %vm524_vm2 = vcmask 1040384   ;;  %s9859_s1 = inlined_call_operand.vmem [shape: f32[240,9], index: 1, kind: input, shape index: {}]   ;;  %s9860_s0 = inlined_call_operand.vmem [shape: f32[128,240], index: 0, kind: input, shape index: {}]   ;;  %s9861_s2 = inlined_call_operand.vmem [shape: f32[1,9], index: 2, kind: input, shape index: {}]   ;;  %s9862_s3 = inlined_call_operand.vmem [shape: f32[10,36,128], index: 3, kind: input, shape index: {}]   ;;  %s9863_s4 = inlined_call_operand.vmem [shape: f32[10,9,10], index: 4, kind: input, shape index: {}]   ;;  %s9864_s5 = inlined_call_operand.vmem [shape: f32[1,10], index: 5, kind: input, shape index: {}]   ;;  %s9865_s7 = inlined_call_operand.vmem [shape: f32[10,10,5], index: 7, kind: input, shape index: {}]   ;;  %s9866_s6 = inlined_call_operand.vmem [shape: f32[10,18,36], index: 6, kind: input, shape index: {}]   ;;  %s9867_s8 = inlined_call_operand.vmem [shape: f32[1,5], index: 8, kind: input, shape index: {}]   ;;  %s9868_s9 = inlined_call_operand.vmem [shape: f32[9,2,18], index: 9, kind: input, shape index: {}]   ;;  %s9869_s10 = inlined_call_operand.vmem [shape: f32[9,5,10], index: 10, kind: input, shape index: {}]   ;;  %s9870_s13 = inlined_call_operand.<no memory space> [shape: f32[1,1], index: 13, kind: input, shape index: {}]   ;;  %s9871_s11 = inlined_call_operand.vmem [shape: f32[1,10], index: 11, kind: input, shape index: {}]   ;;  %s9872_s12 = inlined_call_operand.vmem [shape: f32[1,10], index: 12, kind: input, shape index: {}]   ;;  %s9873_s14 = inlined_call_operand.vmem [shape: f32[2,1], index: 14, kind: output, shape index: {}]  }
   0x1   :  { %7679 = vmatprep.subr.bf16.mxu0 %v8137_v0  ;;  %v81_v1 = vld [vmem:[%s9859_s1] sm:$0xff]  ;;  %v82_v2 = vld [vmem:[%s9859_s1 + $0x8] sm:$0xff]  ;;  %v83_v3 = vld [vmem:[%s9859_s1 + $0x10] sm:$0xff]  ;;  %7724 = vmatprep.subr.bf16.mxu1 %v8137_v0  ;;  %vm8140_vm3 = vmmov 1   ;;  %vm508_vm5 = vcmask 72704   ;;  %vm2452_vm6 = vcmask 1043456  }
   0x2   :  { %v7680_v4 = vpack.c.bf16 %v82_v2, %v81_v1  ;;  %v84_v5 = vld [vmem:[%s9859_s1 + $0x18] sm:$0xff]  ;;  %v85_v7 = vld [vmem:[%s9859_s1 + $0x20] sm:$0xff]  ;;  %v86_v8 = vld [vmem:[%s9859_s1 + $0x28] sm:$0xff]  ;;  %vm2442_vm7 = vcmask 293888   ;;  %vm2644_vm8 = vcmask 1041408   ;;  %vm2634_vm10 = vcmask 80896  }
   0x3   :  { %v7683_v6 = vpack.c.bf16 %v84_v5, %v83_v3  ;;  %v7686_v9 = vpack.c.bf16 %v86_v8, %v85_v7  ;;  %v87_v10 = vld [vmem:[%s9859_s1 + $0x30] sm:$0xff]  ;;  %v88_v11 = vld [vmem:[%s9859_s1 + $0x38] sm:$0xff]  ;;  %v50_v12 = vld [vmem:[%s9860_s0 + $0x8] sm:$0xff]  ;;  %vm4362_vm11 = vcmask 146432   ;;  %vm4521_vm12 = vcmask 1044480  }
   0x4   :  { %7681 = vmatpush1.bf16.msra.mxu0 %v7680_v4  ;;  %v7689_v13 = vpack.c.bf16 %v88_v11, %v87_v10  ;;  %5788 = vmatprep.mubr.msk.f32.mxu0 %vm118_vm0, %v50_v12  ;;  %v89_v14 = vld [vmem:[%s9859_s1 + $0x40] sm:$0xff]  ;;  %v90_v15 = vld [vmem:[%s9859_s1 + $0x48] sm:$0xff]  ;;  %v91_v17 = vld [vmem:[%s9859_s1 + $0x50] sm:$0xff]  ;;  %vm4517_vm13 = vcmask 39936   ;;  %vm5765_vm14 = vcmask 74752   ;;  %vm5781_vm15 = vcmask 1024  }
   0x5   :  { %7682 = vmatprep.subr.bf16.mxu0 %v8137_v0  ;;  %v7692_v16 = vpack.c.bf16 %v90_v15, %v89_v14  ;;  %v92_v18 = vld [vmem:[%s9859_s1 + $0x58] sm:$0xff]  ;;  %v93_v20 = vld [vmem:[%s9859_s1 + $0x60] sm:$0xff]  ;;  %v94_v21 = vld [vmem:[%s9859_s1 + $0x68] sm:$0xff]  ;;  %v8139_v15 = vmov 0.0  }
   0x6   :  { %v7695_v19 = vpack.c.bf16 %v92_v18, %v91_v17  ;;  %v7698_v22 = vpack.c.bf16 %v94_v21, %v93_v20  ;;  %v95_v23 = vld [vmem:[%s9859_s1 + $0x70] sm:$0xff]  ;;  %v96_v24 = vld [vmem:[%s9859_s1 + $0x78] sm:$0xff]  ;;  %v97_v26 = vld [vmem:[%s9859_s1 + $0x80] sm:$0xff]  ;;  %6605 = vmatprep.mubr.msk.f32.mxu1 %vm8138_vm1, %v8139_v15 }
   0x7   :  { %v7701_v25 = vpack.c.bf16 %v96_v24, %v95_v23  ;;  %v98_v27 = vld [vmem:[%s9859_s1 + $0x88] sm:$0xff]  ;;  %v99_v29 = vld [vmem:[%s9859_s1 + $0x90] sm:$0xff]  ;;  %v100_v30 = vld [vmem:[%s9859_s1 + $0x98] sm:$0xff] }
   0x8   :  { %7684 = vmatpush1.bf16.msra.mxu0 %v7683_v6  ;;  %v7704_v28 = vpack.c.bf16 %v98_v27, %v97_v26  ;;  %v7707_v31 = vpack.c.bf16 %v100_v30, %v99_v29  ;;  %v101_v32 = vld [vmem:[%s9859_s1 + $0xa0] sm:$0xff]  ;;  %v102_v33 = vld [vmem:[%s9859_s1 + $0xa8] sm:$0xff]  ;;  %v103_v35 = vld [vmem:[%s9859_s1 + $0xb0] sm:$0xff] }
   0x9   :  { %7685 = vmatprep.subr.bf16.mxu0 %v8137_v0  ;;  %v7710_v34 = vpack.c.bf16 %v102_v33, %v101_v32  ;;  %v104_v36 = vld [vmem:[%s9859_s1 + $0xb8] sm:$0xff]  ;;  %v105_v38 = vld [vmem:[%s9859_s1 + $0xc0] sm:$0xff]  ;;  %v106_v39 = vld [vmem:[%s9859_s1 + $0xc8] sm:$0xff] }
   0xa   :  { %v7713_v37 = vpack.c.bf16 %v104_v36, %v103_v35  ;;  %v7716_v40 = vpack.c.bf16 %v106_v39, %v105_v38  ;;  %v107_v41 = vld [vmem:[%s9859_s1 + $0xd0] sm:$0xff]  ;;  %v108_v42 = vld [vmem:[%s9859_s1 + $0xd8] sm:$0xff]  ;;  %v109_v44 = vld [vmem:[%s9859_s1 + $0xe0] sm:$0xff] }
   0xb   :  { %v7719_v43 = vpack.c.bf16 %v108_v42, %v107_v41  ;;  %v110_v45 = vld [vmem:[%s9859_s1 + $0xe8] sm:$0xff]  ;;  %v49_v47 = vld [vmem:[%s9860_s0] sm:$0xff]  ;;  %v52_v48 = vld [vmem:[%s9860_s0 + $0x18] sm:$0xff] }
   0xc   :  { %7687 = vmatpush1.bf16.msra.mxu0 %v7686_v9  ;;  %v7722_v46 = vpack.c.bf16 %v110_v45, %v109_v44  ;;  %v51_v49 = vld [vmem:[%s9860_s0 + $0x10] sm:$0xff]  ;;  %v54_v50 = vld [vmem:[%s9860_s0 + $0x28] sm:$0xff]  ;;  %v53_v51 = vld [vmem:[%s9860_s0 + $0x20] sm:$0xff] }
   0xd   :  { %7688 = vmatprep.subr.bf16.mxu0 %v8137_v0  ;;  %v56_v52 = vld [vmem:[%s9860_s0 + $0x38] sm:$0xff]  ;;  %v55_v53 = vld [vmem:[%s9860_s0 + $0x30] sm:$0xff]  ;;  %v58_v54 = vld [vmem:[%s9860_s0 + $0x48] sm:$0xff] }
   0xe   :  { %v57_v55 = vld [vmem:[%s9860_s0 + $0x40] sm:$0xff]  ;;  %v60_v56 = vld [vmem:[%s9860_s0 + $0x58] sm:$0xff]  ;;  %v59_v57 = vld [vmem:[%s9860_s0 + $0x50] sm:$0xff] }
   0xf   :  { %v62_v58 = vld [vmem:[%s9860_s0 + $0x68] sm:$0xff]  ;;  %v61_v59 = vld [vmem:[%s9860_s0 + $0x60] sm:$0xff]  ;;  %v64_v60 = vld [vmem:[%s9860_s0 + $0x78] sm:$0xff] }
  0x10   :  { %7690 = vmatpush1.bf16.msra.mxu0 %v7689_v13  ;;  %v63_v61 = vld [vmem:[%s9860_s0 + $0x70] sm:$0xff]  ;;  %v66_v62 = vld [vmem:[%s9860_s0 + $0x88] sm:$0xff]  ;;  %v65_v63 = vld [vmem:[%s9860_s0 + $0x80] sm:$0xff] }
  0x11   :  { %7691 = vmatprep.subr.bf16.mxu0 %v8137_v0  ;;  %v68_v1 = vld [vmem:[%s9860_s0 + $0x98] sm:$0xff]  ;;  %v67_v2 = vld [vmem:[%s9860_s0 + $0x90] sm:$0xff]  ;;  %v70_v3 = vld [vmem:[%s9860_s0 + $0xa8] sm:$0xff] }
  0x12   :  { %v69_v4 = vld [vmem:[%s9860_s0 + $0xa0] sm:$0xff]  ;;  %v72_v5 = vld [vmem:[%s9860_s0 + $0xb8] sm:$0xff]  ;;  %v71_v6 = vld [vmem:[%s9860_s0 + $0xb0] sm:$0xff] }
  0x13   :  { %v74_v7 = vld [vmem:[%s9860_s0 + $0xc8] sm:$0xff]  ;;  %v73_v8 = vld [vmem:[%s9860_s0 + $0xc0] sm:$0xff]  ;;  %v76_v9 = vld [vmem:[%s9860_s0 + $0xd8] sm:$0xff] }
  0x14   :  { %7693 = vmatpush1.bf16.msra.mxu0 %v7692_v16  ;;  %v75_v10 = vld [vmem:[%s9860_s0 + $0xd0] sm:$0xff]  ;;  %v78_v11 = vld [vmem:[%s9860_s0 + $0xe8] sm:$0xff]  ;;  %v77_v12 = vld [vmem:[%s9860_s0 + $0xe0] sm:$0xff] }
  0x15   :  { %7694 = vmatprep.subr.bf16.mxu0 %v8137_v0  ;;  %v80_v13 = vld [vmem:[%s9860_s0 + $0xf8] sm:$0xff]  ;;  %v79_v14 = vld [vmem:[%s9860_s0 + $0xf0] sm:$0xff]  ;;  %v8442_v18 = vld [vmem:[%s9861_s2] ss:$0 sm:$0xff] }
  0x16   :  { %vm8647_vm4 = vmpackc.low %vm524_vm2, %vm8140_vm3 }
  0x17   :  { %vm9258_vm9 = vmpackc.low %vm2644_vm8, %vm8140_vm3 }
  0x18   :  { %7696 = vmatpush1.bf16.msra.mxu0 %v7695_v19 }
  0x19   :  { %7697 = vmatprep.subr.bf16.mxu0 %v8137_v0 }
  0x1c   :  { %7699 = vmatpush1.bf16.msra.mxu0 %v7698_v22 }
  0x1d   :  { %7700 = vmatprep.subr.bf16.mxu0 %v8137_v0 }
  0x20   :  { %7702 = vmatpush1.bf16.msra.mxu0 %v7701_v25 }
  0x21   :  { %7703 = vmatprep.subr.bf16.mxu0 %v8137_v0 }
  0x24   :  { %7705 = vmatpush1.bf16.msra.mxu0 %v7704_v28 }
  0x25   :  { %7706 = vmatprep.subr.bf16.mxu0 %v8137_v0 }
  0x28   :  { %7708 = vmatpush1.bf16.msra.mxu0 %v7707_v31 }
  0x29   :  { %7709 = vmatprep.subr.bf16.mxu0 %v8137_v0 }
  0x2c   :  { %7711 = vmatpush1.bf16.msra.mxu0 %v7710_v34 }
  0x2d   :  { %7712 = vmatprep.subr.bf16.mxu0 %v8137_v0 }
  0x30   :  { %7714 = vmatpush1.bf16.msra.mxu0 %v7713_v37 }
  0x31   :  { %7715 = vmatprep.subr.bf16.mxu0 %v8137_v0 }
  0x34   :  { %7717 = vmatpush1.bf16.msra.mxu0 %v7716_v40 }
  0x35   :  { %7718 = vmatprep.subr.bf16.mxu0 %v8137_v0 }
  0x38   :  { %7720 = vmatpush1.bf16.msra.mxu0 %v7719_v43 }
  0x39   :  { %7721 = vmatprep.subr.bf16.mxu0 %v8137_v0 }
  0x3c   :  { %7723 = vmatpush1.bf16.msra.mxu0 %v7722_v46 }
  0x3d   :  { %7780 = vmatprep.subr.bf16.mxu0 %v8137_v0 }
  0x3f   :  { %232 = vmatmul.mubr.f32.vlgmr.msra.gmra.mrb[0].mxu0 %v49_v47 }
  0x40   :  { %5789 = vmatprep.mubr.msk.f32.mxu0 %vm118_vm0, %v52_v48 }
  0x43   :  { %237 = vmatmul.mubr.f32.gmra.mrb[2].mxu0 %v51_v49 }
  0x44   :  { %5790 = vmatprep.mubr.msk.f32.mxu0 %vm118_vm0, %v54_v50 }
  0x47   :  { %242 = vmatmul.mubr.f32.gmra.mrb[4].mxu0 %v53_v51 }
  0x48   :  { %5791 = vmatprep.mubr.msk.f32.mxu0 %vm118_vm0, %v56_v52 }
  0x4b   :  { %247 = vmatmul.mubr.f32.gmra.mrb[6].mxu0 %v55_v53 }
  0x4c   :  { %5792 = vmatprep.mubr.msk.f32.mxu0 %vm118_vm0, %v58_v54 }
  0x4f   :  { %252 = vmatmul.mubr.f32.gmra.mrb[8].mxu0 %v57_v55 }
  0x50   :  { %5793 = vmatprep.mubr.msk.f32.mxu0 %vm118_vm0, %v60_v56 }
  0x53   :  { %257 = vmatmul.mubr.f32.gmra.mrb[10].mxu0 %v59_v57 }
  0x54   :  { %5794 = vmatprep.mubr.msk.f32.mxu0 %vm118_vm0, %v62_v58 }
  0x57   :  { %262 = vmatmul.mubr.f32.gmra.mrb[12].mxu0 %v61_v59 }
  0x58   :  { %5795 = vmatprep.mubr.msk.f32.mxu0 %vm118_vm0, %v64_v60 }
  0x5b   :  { %267 = vmatmul.mubr.f32.gmra.mrb[14].mxu0 %v63_v61 }
  0x5c   :  { %5796 = vmatprep.mubr.msk.f32.mxu0 %vm118_vm0, %v66_v62 }
  0x5f   :  { %272 = vmatmul.mubr.f32.gmra.mrb[16].mxu0 %v65_v63 }
  0x60   :  { %5797 = vmatprep.mubr.msk.f32.mxu0 %vm118_vm0, %v68_v1 }
  0x63   :  { %277 = vmatmul.mubr.f32.gmra.mrb[18].mxu0 %v67_v2 }
  0x64   :  { %5798 = vmatprep.mubr.msk.f32.mxu0 %vm118_vm0, %v70_v3 }
  0x67   :  { %282 = vmatmul.mubr.f32.gmra.mrb[20].mxu0 %v69_v4 }
  0x68   :  { %5799 = vmatprep.mubr.msk.f32.mxu0 %vm118_vm0, %v72_v5 }
  0x6b   :  { %287 = vmatmul.mubr.f32.gmra.mrb[22].mxu0 %v71_v6 }
  0x6c   :  { %5800 = vmatprep.mubr.msk.f32.mxu0 %vm118_vm0, %v74_v7 }
  0x6f   :  { %292 = vmatmul.mubr.f32.gmra.mrb[24].mxu0 %v73_v8 }
  0x70   :  { %5801 = vmatprep.mubr.msk.f32.mxu0 %vm118_vm0, %v76_v9 }
  0x73   :  { %297 = vmatmul.mubr.f32.gmra.mrb[26].mxu0 %v75_v10  ;;  %v312_v10 = vld [vmem:[%s9862_s3] sm:$0xff] }
  0x74   :  { %5802 = vmatprep.mubr.msk.f32.mxu0 %vm118_vm0, %v78_v11  ;;  %v5823_v11 = vld [vmem:[%s9862_s3 + $0x50] sm:$0xff] }
  0x77   :  { %302 = vmatmul.mubr.f32.gmra.mrb[28].mxu0 %v77_v12  ;;  %v313_v12 = vld [vmem:[%s9862_s3 + $0x8] sm:$0xff] }
  0x78   :  { %5803 = vmatprep.mubr.msk.f32.mxu0 %vm118_vm0, %v80_v13  ;;  %v5824_v13 = vld [vmem:[%s9862_s3 + $0x58] sm:$0xff] }
  0x7b   :  { %307 = vmatmul.mubr.f32.gmra.mrb[30].mxu0 %v79_v14  ;;  %v314_v14 = vld [vmem:[%s9862_s3 + $0x10] sm:$0xff] }
  0x7c   :  { %6737 = vmatprep.mubr.msk.f32.mxu0 %vm8138_vm1, %v8139_v15 }
 0x112   :  { %v233_v16 = vpop.f32.mrb[0].mxu0 }
 0x113   :  { %v235_v17 = vpop.f32.mrb[1].mxu0  ;;  %v234_v20 = vadd.f32 %v8442_v18, %v233_v16  ;;  %v5825_v16 = vld [vmem:[%s9862_s3 + $0x60] sm:$0xff] }
 0x114   :  { %v315_v17 = vld [vmem:[%s9862_s3 + $0x18] sm:$0xff] }
 0x116   :  { %v238_v19 = vpop.f32.mrb[2].mxu0 }
 0x117   :  { %v239_v21 = vadd.f32 %v8442_v18, %v238_v19  ;;  %v240_v22 = vpop.f32.mrb[3].mxu0  ;;  %v316_v19 = vld [vmem:[%s9862_s3 + $0x20] sm:$0xf] }
 0x118   :  { %v5836_v22 = vld [vmem:[%s9862_s3 + $0x78] sm:$0xff] }
 0x119   :  { %v8446_v23 = vpack.c.bf16 %v239_v21, %v234_v20  ;;  %v5827_v20 = vld [vmem:[%s9862_s3 + $0x70] sm:$0xf]  ;;  %v5804_v21 = vld [vmem:[%s9862_s3 + $0x28] sm:$0xff] }
 0x11a   :  { %v243_v24 = vpop.f32.mrb[4].mxu0 }
 0x11b   :  { %v245_v25 = vpop.f32.mrb[5].mxu0  ;;  %7726 = vmatpush3.bf16.msra.mxu1 %v8446_v23  ;;  %7782 = vmatpush3.bf16.msra.mxu0 %v8446_v23  ;;  %v244_v27 = vadd.f32 %v8442_v18, %v243_v24  ;;  %v5805_v24 = vld [vmem:[%s9862_s3 + $0x30] sm:$0xff] }
 0x11c   :  { %7727 = vmatprep.subr.bf16.mxu1 %v8137_v0  ;;  %7783 = vmatprep.subr.bf16.mxu0 %v8137_v0  ;;  %v5837_v25 = vld [vmem:[%s9862_s3 + $0x80] sm:$0xff] }
 0x11e   :  { %v248_v26 = vpop.f32.mrb[6].mxu0 }
 0x11f   :  { %v249_v28 = vadd.f32 %v8442_v18, %v248_v26  ;;  %v250_v29 = vpop.f32.mrb[7].mxu0  ;;  %v5806_v26 = vld [vmem:[%s9862_s3 + $0x38] sm:$0xff] }
 0x120   :  { %v5839_v29 = vld [vmem:[%s9862_s3 + $0x90] sm:$0xff] }
 0x121   :  { %v8454_v30 = vpack.c.bf16 %v249_v28, %v244_v27  ;;  %v5838_v27 = vld [vmem:[%s9862_s3 + $0x88] sm:$0xff]  ;;  %v5807_v28 = vld [vmem:[%s9862_s3 + $0x40] sm:$0xff] }
 0x122   :  { %v253_v31 = vpop.f32.mrb[8].mxu0 }
 0x123   :  { %v255_v32 = vpop.f32.mrb[9].mxu0  ;;  %7729 = vmatpush3.bf16.msra.mxu1 %v8454_v30  ;;  %7785 = vmatpush3.bf16.msra.mxu0 %v8454_v30  ;;  %v254_v34 = vadd.f32 %v8442_v18, %v253_v31  ;;  %v5808_v31 = vld [vmem:[%s9862_s3 + $0x48] sm:$0xf] }
 0x124   :  { %7730 = vmatprep.subr.bf16.mxu1 %v8137_v0  ;;  %7786 = vmatprep.subr.bf16.mxu0 %v8137_v0  ;;  %v5840_v32 = vld [vmem:[%s9862_s3 + $0x98] sm:$0xf] }
 0x126   :  { %v258_v33 = vpop.f32.mrb[10].mxu0 }
 0x127   :  { %v259_v35 = vadd.f32 %v8442_v18, %v258_v33  ;;  %v260_v36 = vpop.f32.mrb[11].mxu0  ;;  %v5809_v33 = vld [vmem:[%s9863_s4 + $0x10] sm:$0xff] }
 0x129   :  { %v8462_v37 = vpack.c.bf16 %v259_v35, %v254_v34  ;;  %v5810_v34 = vld [vmem:[%s9863_s4 + $0x18] sm:$0x1] }
 0x12a   :  { %v263_v38 = vpop.f32.mrb[12].mxu0  ;;  %v7773_v36 = vpack.c.bf16 %v5810_v34, %v5809_v33  ;;  %v5850_v33 = vld [vmem:[%s9862_s3 + $0xa8] sm:$0xff]  ;;  %v5851_v34 = vld [vmem:[%s9862_s3 + $0xb0] sm:$0xff] }
 0x12b   :  { %v265_v39 = vpop.f32.mrb[13].mxu0  ;;  %7732 = vmatpush3.bf16.msra.mxu1 %v8462_v37  ;;  %7788 = vmatpush3.bf16.msra.mxu0 %v8462_v37  ;;  %v264_v41 = vadd.f32 %v8442_v18, %v263_v38 }
 0x12c   :  { %7733 = vmatprep.subr.bf16.mxu1 %v8137_v0  ;;  %7789 = vmatprep.subr.bf16.mxu0 %v8137_v0 }
 0x12e   :  { %v268_v40 = vpop.f32.mrb[14].mxu0 }
 0x12f   :  { %v269_v42 = vadd.f32 %v8442_v18, %v268_v40  ;;  %v270_v43 = vpop.f32.mrb[15].mxu0 }
 0x131   :  { %v8470_v44 = vpack.c.bf16 %v269_v42, %v264_v41 }
 0x132   :  { %v273_v45 = vpop.f32.mrb[16].mxu0 }
 0x133   :  { %v275_v46 = vpop.f32.mrb[17].mxu0  ;;  %7735 = vmatpush3.bf16.msra.mxu1 %v8470_v44  ;;  %7791 = vmatpush3.bf16.msra.mxu0 %v8470_v44  ;;  %v274_v48 = vadd.f32 %v8442_v18, %v273_v45 }
 0x134   :  { %7736 = vmatprep.subr.bf16.mxu1 %v8137_v0  ;;  %7792 = vmatprep.subr.bf16.mxu0 %v8137_v0 }
 0x136   :  { %v278_v47 = vpop.f32.mrb[18].mxu0 }
 0x137   :  { %v279_v49 = vadd.f32 %v8442_v18, %v278_v47  ;;  %v280_v50 = vpop.f32.mrb[19].mxu0 }
 0x139   :  { %v8478_v51 = vpack.c.bf16 %v279_v49, %v274_v48 }
 0x13a   :  { %v283_v52 = vpop.f32.mrb[20].mxu0 }
 0x13b   :  { %v285_v53 = vpop.f32.mrb[21].mxu0  ;;  %7738 = vmatpush3.bf16.msra.mxu1 %v8478_v51  ;;  %7794 = vmatpush3.bf16.msra.mxu0 %v8478_v51  ;;  %v284_v55 = vadd.f32 %v8442_v18, %v283_v52 }
 0x13c   :  { %7739 = vmatprep.subr.bf16.mxu1 %v8137_v0  ;;  %7795 = vmatprep.subr.bf16.mxu0 %v8137_v0 }
 0x13e   :  { %v288_v54 = vpop.f32.mrb[22].mxu0 }
 0x13f   :  { %v289_v56 = vadd.f32 %v8442_v18, %v288_v54  ;;  %v290_v57 = vpop.f32.mrb[23].mxu0 }
 0x141   :  { %v8486_v58 = vpack.c.bf16 %v289_v56, %v284_v55 }
 0x142   :  { %v293_v59 = vpop.f32.mrb[24].mxu0 }
 0x143   :  { %v295_v60 = vpop.f32.mrb[25].mxu0  ;;  %7741 = vmatpush3.bf16.msra.mxu1 %v8486_v58  ;;  %7797 = vmatpush3.bf16.msra.mxu0 %v8486_v58  ;;  %v294_v62 = vadd.f32 %v8442_v18, %v293_v59 }
 0x144   :  { %7742 = vmatprep.subr.bf16.mxu1 %v8137_v0  ;;  %7798 = vmatprep.subr.bf16.mxu0 %v8137_v0 }
 0x146   :  { %v298_v61 = vpop.f32.mrb[26].mxu0 }
 0x147   :  { %v299_v63 = vadd.f32 %v8442_v18, %v298_v61  ;;  %v300_v1 = vpop.f32.mrb[27].mxu0  ;;  %v407_v61 = vld [vmem:[%s9863_s4] sm:$0xff] }
 0x149   :  { %v8494_v2 = vpack.c.bf16 %v299_v63, %v294_v62  ;;  %v408_v62 = vld [vmem:[%s9863_s4 + $0x8] sm:$0x1] }
 0x14a   :  { %v303_v3 = vpop.f32.mrb[28].mxu0  ;;  %v7777_v63 = vpack.c.bf16 %v408_v62, %v407_v61 }
 0x14b   :  { %v305_v4 = vpop.f32.mrb[29].mxu0  ;;  %7744 = vmatpush3.bf16.msra.mxu1 %v8494_v2  ;;  %7800 = vmatpush3.bf16.msra.mxu0 %v8494_v2  ;;  %v304_v6 = vadd.f32 %v8442_v18, %v303_v3 }
 0x14c   :  { %7745 = vmatprep.subr.bf16.mxu1 %v8137_v0  ;;  %7801 = vmatprep.subr.bf16.mxu0 %v8137_v0 }
 0x14e   :  { %v308_v5 = vpop.f32.mrb[30].mxu0 }
 0x14f   :  { %v309_v7 = vadd.f32 %v8442_v18, %v308_v5  ;;  %v310_v8 = vpop.f32.mrb[31].mxu0  ;;  %v5826_v18 = vld [vmem:[%s9862_s3 + $0x68] sm:$0xff] }
 0x151   :  { %v8502_v9 = vpack.c.bf16 %v309_v7, %v304_v6 }
 0x153   :  { %7747 = vmatpush3.bf16.msra.mxu1 %v8502_v9  ;;  %7803 = vmatpush3.bf16.msra.mxu0 %v8502_v9 }
 0x154   :  { %7748 = vmatprep.subr.bf16.mxu1 %v8137_v0  ;;  %7808 = vmatprep.subr.bf16.mxu0 %v8137_v0 }
 0x156   :  { %6606 = vmatmul.mubr.f32.vlgmr.msra.gmra.mrb[0].mxu1 %v312_v10  ;;  %6738 = vmatmul.mubr.f32.vlgmr.msra.gmra.mrb[32].mxu0 %v5823_v11 }
 0x157   :  { %7750 = vmatpush3.bf16.msra.mxu1 %v8446_v23  ;;  %7810 = vmatpush3.bf16.msra.mxu0 %v8446_v23 }
 0x158   :  { %7751 = vmatprep.subr.bf16.mxu1 %v8137_v0  ;;  %7811 = vmatprep.subr.bf16.mxu0 %v8137_v0 }
 0x159   :  { %6608 = vmatprep.mubr.msk.f32.mxu1 %vm8138_vm1, %v8139_v15  ;;  %6740 = vmatprep.mubr.msk.f32.mxu0 %vm8138_vm1, %v8139_v15 }
 0x15a   :  { %6609 = vmatmul.mubr.f32.gmra.mrb[2].mxu1 %v313_v12  ;;  %6741 = vmatmul.mubr.f32.gmra.mrb[34].mxu0 %v5824_v13 }
 0x15b   :  { %7753 = vmatpush3.bf16.msra.mxu1 %v8454_v30  ;;  %7813 = vmatpush3.bf16.msra.mxu0 %v8454_v30 }
 0x15c   :  { %7754 = vmatprep.subr.bf16.mxu1 %v8137_v0  ;;  %7814 = vmatprep.subr.bf16.mxu0 %v8137_v0 }
 0x15d   :  { %6611 = vmatprep.mubr.msk.f32.mxu1 %vm8138_vm1, %v8139_v15  ;;  %6743 = vmatprep.mubr.msk.f32.mxu0 %vm8138_vm1, %v8139_v15 }
 0x15e   :  { %6612 = vmatmul.mubr.f32.gmra.mrb[4].mxu1 %v314_v14  ;;  %6744 = vmatmul.mubr.f32.gmra.mrb[36].mxu0 %v5825_v16 }
 0x15f   :  { %7756 = vmatpush3.bf16.msra.mxu1 %v8462_v37  ;;  %7816 = vmatpush3.bf16.msra.mxu0 %v8462_v37 }
 0x160   :  { %7757 = vmatprep.subr.bf16.mxu1 %v8137_v0  ;;  %7817 = vmatprep.subr.bf16.mxu0 %v8137_v0 }
 0x161   :  { %6614 = vmatprep.mubr.msk.f32.mxu1 %vm8138_vm1, %v8139_v15  ;;  %6746 = vmatprep.mubr.msk.f32.mxu0 %vm8138_vm1, %v8139_v15 }
 0x162   :  { %6615 = vmatmul.mubr.f32.gmra.mrb[6].mxu1 %v315_v17  ;;  %6747 = vmatmul.mubr.f32.gmra.mrb[38].mxu0 %v5826_v18 }
 0x163   :  { %7759 = vmatpush3.bf16.msra.mxu1 %v8470_v44  ;;  %7819 = vmatpush3.bf16.msra.mxu0 %v8470_v44 }
 0x164   :  { %7760 = vmatprep.subr.bf16.mxu1 %v8137_v0  ;;  %7820 = vmatprep.subr.bf16.mxu0 %v8137_v0 }
 0x165   :  { %6617 = vmatprep.mubr.msk.f32.mxu1 %vm8138_vm1, %v8139_v15  ;;  %6749 = vmatprep.mubr.msk.f32.mxu0 %vm8138_vm1, %v8139_v15 }
 0x166   :  { %6618 = vmatmul.mubr.f32.gmra.mrb[8].mxu1 %v316_v19  ;;  %6750 = vmatmul.mubr.f32.gmra.mrb[40].mxu0 %v5827_v20  ;;  %v5828_v20 = vld [vmem:[%s9863_s4 + $0x20] sm:$0xff] }
 0x167   :  { %7762 = vmatpush3.bf16.msra.mxu1 %v8478_v51  ;;  %7822 = vmatpush3.bf16.msra.mxu0 %v8478_v51 }
 0x168   :  { %7763 = vmatprep.subr.bf16.mxu1 %v8137_v0  ;;  %7823 = vmatprep.subr.bf16.mxu0 %v8137_v0 }
 0x169   :  { %6652 = vmatprep.mubr.msk.f32.mxu1 %vm8138_vm1, %v8139_v15  ;;  %6803 = vmatprep.mubr.msk.f32.mxu0 %vm8138_vm1, %v8139_v15 }
 0x16b   :  { %7765 = vmatpush3.bf16.msra.mxu1 %v8486_v58  ;;  %7825 = vmatpush3.bf16.msra.mxu0 %v8486_v58 }
 0x16c   :  { %7766 = vmatprep.subr.bf16.mxu1 %v8137_v0  ;;  %7826 = vmatprep.subr.bf16.mxu0 %v8137_v0 }
 0x16f   :  { %7768 = vmatpush3.bf16.msra.mxu1 %v8494_v2  ;;  %7828 = vmatpush3.bf16.msra.mxu0 %v8494_v2 }
 0x170   :  { %7769 = vmatprep.subr.bf16.mxu1 %v8137_v0  ;;  %7829 = vmatprep.subr.bf16.mxu0 %v8137_v0 }
 0x173   :  { %7771 = vmatpush3.bf16.msra.mxu1 %v8502_v9  ;;  %7831 = vmatpush3.bf16.msra.mxu0 %v8502_v9 }
 0x174   :  { %7772 = vmatprep.subr.bf16.mxu1 %v8137_v0  ;;  %7860 = vmatprep.subr.bf16.mxu0 %v8137_v0 }
 0x176   :  { %6653 = vmatmul.mubr.f32.vlgmr.msra.gmra.mrb[10].mxu1 %v5804_v21  ;;  %6804 = vmatmul.mubr.f32.vlgmr.msra.gmra.mrb[42].mxu0 %v5836_v22  ;;  %v5829_v21 = vld [vmem:[%s9863_s4 + $0x28] sm:$0x1] }
 0x177   :  { %6655 = vmatprep.mubr.msk.f32.mxu1 %vm8138_vm1, %v8139_v15  ;;  %6806 = vmatprep.mubr.msk.f32.mxu0 %vm8138_vm1, %v8139_v15 }
 0x178   :  { %7775 = vmatpush3.bf16.msk.msra.mxu1 %vm8647_vm4, %v7773_v36  ;;  %v5852_v36 = vld [vmem:[%s9862_s3 + $0xb8] sm:$0xff] }
 0x179   :  { %7776 = vmatprep.subr.bf16.mxu1 %v8137_v0 }
 0x17a   :  { %6656 = vmatmul.mubr.f32.gmra.mrb[12].mxu1 %v5805_v24  ;;  %6807 = vmatmul.mubr.f32.gmra.mrb[44].mxu0 %v5837_v25 }
 0x17b   :  { %6658 = vmatprep.mubr.msk.f32.mxu1 %vm8138_vm1, %v8139_v15  ;;  %6809 = vmatprep.mubr.msk.f32.mxu0 %vm8138_vm1, %v8139_v15 }
 0x17e   :  { %6659 = vmatmul.mubr.f32.gmra.mrb[14].mxu1 %v5806_v26  ;;  %6810 = vmatmul.mubr.f32.gmra.mrb[46].mxu0 %v5838_v27  ;;  %v7805_v27 = vpack.c.bf16 %v5829_v21, %v5828_v20 }
 0x17f   :  { %6661 = vmatprep.mubr.msk.f32.mxu1 %vm8138_vm1, %v8139_v15  ;;  %6812 = vmatprep.mubr.msk.f32.mxu0 %vm8138_vm1, %v8139_v15 }
 0x182   :  { %6662 = vmatmul.mubr.f32.gmra.mrb[16].mxu1 %v5807_v28  ;;  %6813 = vmatmul.mubr.f32.gmra.mrb[48].mxu0 %v5839_v29  ;;  %v5841_v28 = vld [vmem:[%s9863_s4 + $0x30] sm:$0xff]  ;;  %v5842_v29 = vld [vmem:[%s9863_s4 + $0x38] sm:$0x1] }
 0x183   :  { %6664 = vmatprep.mubr.msk.f32.mxu1 %vm8138_vm1, %v8139_v15  ;;  %6815 = vmatprep.mubr.msk.f32.mxu0 %vm8138_vm1, %v8139_v15 }
 0x186   :  { %6665 = vmatmul.mubr.f32.gmra.mrb[18].mxu1 %v5808_v31  ;;  %6816 = vmatmul.mubr.f32.gmra.mrb[50].mxu0 %v5840_v32  ;;  %v7833_v31 = vpack.c.bf16 %v5842_v29, %v5841_v28  ;;  %v5849_v32 = vld [vmem:[%s9862_s3 + $0xa0] sm:$0xff] }
 0x187   :  { %6671 = vmatprep.mubr.msk.f32.mxu1 %vm8138_vm1, %v8139_v15  ;;  %6888 = vmatprep.mubr.msk.f32.mxu0 %vm8138_vm1, %v8139_v15 }
 0x229   :  { %v383_v38 = vpop.f32.mrb[0].mxu1  ;;  %v8654_v39 = vpop.f32.mrb[32].mxu0 }
 0x22a   :  { %v6607_v40 = vpop.f32.mrb[1].mxu1  ;;  %v6739_v41 = vpop.f32.mrb[33].mxu0 }
 0x22b   :  { %v5855_v40 = vld [vmem:[%s9863_s4 + $0x48] sm:$0x1] }
 0x22d   :  { %v388_v42 = vpop.f32.mrb[2].mxu1  ;;  %v8656_v43 = vpop.f32.mrb[34].mxu0 }
 0x22e   :  { %v6610_v45 = vpop.f32.mrb[3].mxu1  ;;  %v6742_v46 = vpop.f32.mrb[35].mxu0 }
 0x231   :  { %v393_v47 = vpop.f32.mrb[4].mxu1  ;;  %v8658_v48 = vpop.f32.mrb[36].mxu0 }
 0x232   :  { %v6613_v49 = vpop.f32.mrb[5].mxu1  ;;  %v6745_v50 = vpop.f32.mrb[37].mxu0 }
 0x235   :  { %v398_v52 = vpop.f32.mrb[6].mxu1  ;;  %v8660_v53 = vpop.f32.mrb[38].mxu0 }
 0x236   :  { %v6616_v54 = vpop.f32.mrb[7].mxu1  ;;  %v6748_v55 = vpop.f32.mrb[39].mxu0 }
 0x239   :  { %v403_v56 = vpop.f32.mrb[8].mxu1  ;;  %v8662_v57 = vpop.f32.mrb[40].mxu0 }
 0x23a   :  { %v6619_v59 = vpop.f32.mrb[9].mxu1  ;;  %v6751_v60 = vpop.f32.mrb[41].mxu0 }
 0x249   :  { %v481_v1 = vpop.f32.mrb[10].mxu1  ;;  %v1010_v3 = vpop.f32.mrb[42].mxu0 }
 0x24a   :  { %v6654_v4 = vpop.f32.mrb[11].mxu1  ;;  %6672 = vmatmul.mubr.msk.f32.vlgmr.msra.gmra.mrb[20].mxu1 %vm508_vm5, %v481_v1  ;;  %v6805_v5 = vpop.f32.mrb[43].mxu0 }
 0x24b   :  { %6674 = vmatprep.mubr.msk.f32.mxu1 %vm8138_vm1, %v8139_v15  ;;  %7779 = vmatpush3.bf16.msk.msra.mxu1 %vm8647_vm4, %v7777_v63 }
 0x24c   :  { %7804 = vmatprep.subr.bf16.mxu1 %v8137_v0 }
 0x24d   :  { %v486_v6 = vpop.f32.mrb[12].mxu1  ;;  %v1015_v7 = vpop.f32.mrb[44].mxu0 }
 0x24e   :  { %v6657_v8 = vpop.f32.mrb[13].mxu1  ;;  %6675 = vmatmul.mubr.msk.f32.gmra.mrb[22].mxu1 %vm508_vm5, %v486_v6  ;;  %v6808_v10 = vpop.f32.mrb[45].mxu0 }
 0x24f   :  { %6677 = vmatprep.mubr.msk.f32.mxu1 %vm8138_vm1, %v8139_v15 }
 0x251   :  { %v491_v11 = vpop.f32.mrb[14].mxu1  ;;  %v1020_v12 = vpop.f32.mrb[46].mxu0 }
 0x252   :  { %v6660_v13 = vpop.f32.mrb[15].mxu1  ;;  %6678 = vmatmul.mubr.msk.f32.gmra.mrb[24].mxu1 %vm508_vm5, %v491_v11  ;;  %v6811_v14 = vpop.f32.mrb[47].mxu0 }
 0x253   :  { %6680 = vmatprep.mubr.msk.f32.mxu1 %vm8138_vm1, %v8139_v15 }
 0x255   :  { %v496_v16 = vpop.f32.mrb[16].mxu1  ;;  %v1025_v17 = vpop.f32.mrb[48].mxu0 }
 0x256   :  { %v6663_v18 = vpop.f32.mrb[17].mxu1  ;;  %6681 = vmatmul.mubr.msk.f32.gmra.mrb[26].mxu1 %vm508_vm5, %v496_v16  ;;  %v6814_v19 = vpop.f32.mrb[49].mxu0 }
 0x257   :  { %6683 = vmatprep.mubr.msk.f32.mxu1 %vm8138_vm1, %v8139_v15 }
 0x259   :  { %v501_v22 = vpop.f32.mrb[18].mxu1  ;;  %v1030_v24 = vpop.f32.mrb[50].mxu0 }
 0x25a   :  { %v6666_v25 = vpop.f32.mrb[19].mxu1  ;;  %6684 = vmatmul.mubr.msk.f32.gmra.mrb[28].mxu1 %vm508_vm5, %v501_v22  ;;  %v6817_v26 = vpop.f32.mrb[51].mxu0 }
 0x25b   :  { %6690 = vmatprep.mubr.msk.f32.mxu1 %vm8138_vm1, %v8139_v15 }
 0x25e   :  { %6691 = vmatmul.mubr.msk.f32.vlgmr.msra.gmra.mrb[30].mxu1 %vm508_vm5, %v383_v38  ;;  %v5853_v38 = vld [vmem:[%s9862_s3 + $0xc0] sm:$0xf] }
 0x25f   :  { %6693 = vmatprep.mubr.msk.f32.mxu1 %vm8138_vm1, %v8139_v15  ;;  %7807 = vmatpush3.bf16.msk.msra.mxu1 %vm8647_vm4, %v7805_v27 }
 0x260   :  { %7832 = vmatprep.subr.bf16.mxu1 %v8137_v0 }
 0x262   :  { %6694 = vmatmul.mubr.msk.f32.gmra.mrb[32].mxu1 %vm508_vm5, %v388_v42 }
 0x263   :  { %6696 = vmatprep.mubr.msk.f32.mxu1 %vm8138_vm1, %v8139_v15 }
 0x266   :  { %6697 = vmatmul.mubr.msk.f32.gmra.mrb[34].mxu1 %vm508_vm5, %v393_v47 }
 0x267   :  { %6699 = vmatprep.mubr.msk.f32.mxu1 %vm8138_vm1, %v8139_v15 }
 0x26a   :  { %6700 = vmatmul.mubr.msk.f32.gmra.mrb[36].mxu1 %vm508_vm5, %v398_v52 }
 0x26b   :  { %6702 = vmatprep.mubr.msk.f32.mxu1 %vm8138_vm1, %v8139_v15 }
 0x26e   :  { %6703 = vmatmul.mubr.msk.f32.gmra.mrb[38].mxu1 %vm508_vm5, %v403_v56 }
 0x26f   :  { %6756 = vmatprep.mubr.msk.f32.mxu1 %vm8138_vm1, %v8139_v15 }
 0x272   :  { %6757 = vmatmul.mubr.msk.f32.vlgmr.msra.gmra.mrb[40].mxu1 %vm508_vm5, %v8654_v39  ;;  %v5854_v39 = vld [vmem:[%s9863_s4 + $0x40] sm:$0xff] }
 0x273   :  { %6759 = vmatprep.mubr.msk.f32.mxu1 %vm8138_vm1, %v8139_v15  ;;  %7835 = vmatpush3.bf16.msk.msra.mxu1 %vm8647_vm4, %v7833_v31  ;;  %v7861_v41 = vpack.c.bf16 %v5855_v40, %v5854_v39 }
 0x274   :  { %7836 = vmatprep.subr.bf16.mxu1 %v8137_v0 }
 0x275   :  { %7863 = vmatpush3.bf16.msk.msra.mxu0 %vm8647_vm4, %v7861_v41 }
 0x276   :  { %6760 = vmatmul.mubr.msk.f32.gmra.mrb[42].mxu1 %vm508_vm5, %v8656_v43  ;;  %7864 = vmatprep.subr.bf16.mxu0 %v8137_v0 }
 0x277   :  { %6762 = vmatprep.mubr.msk.f32.mxu1 %vm8138_vm1, %v8139_v15 }
 0x27a   :  { %6763 = vmatmul.mubr.msk.f32.gmra.mrb[44].mxu1 %vm508_vm5, %v8658_v48 }
 0x27b   :  { %6765 = vmatprep.mubr.msk.f32.mxu1 %vm8138_vm1, %v8139_v15 }
 0x27e   :  { %6766 = vmatmul.mubr.msk.f32.gmra.mrb[46].mxu1 %vm508_vm5, %v8660_v53 }
 0x27f   :  { %6768 = vmatprep.mubr.msk.f32.mxu1 %vm8138_vm1, %v8139_v15 }
 0x282   :  { %6769 = vmatmul.mubr.msk.f32.gmra.mrb[48].mxu1 %vm508_vm5, %v8662_v57 }
 0x283   :  { %6822 = vmatprep.mubr.msk.f32.mxu1 %vm8138_vm1, %v8139_v15 }
 0x286   :  { %6823 = vmatmul.mubr.msk.f32.vlgmr.msra.gmra.mrb[50].mxu1 %vm508_vm5, %v1010_v3 }
 0x287   :  { %7838 = vmatpush3.bf16.msra.mxu1 %v8446_v23  ;;  %6825 = vmatprep.mubr.msk.f32.mxu1 %vm8138_vm1, %v8139_v15 }
 0x288   :  { %7839 = vmatprep.subr.bf16.mxu1 %v8137_v0 }
 0x28a   :  { %6826 = vmatmul.mubr.msk.f32.gmra.mrb[52].mxu1 %vm508_vm5, %v1015_v7 }
 0x28b   :  { %7841 = vmatpush3.bf16.msra.mxu1 %v8454_v30  ;;  %6828 = vmatprep.mubr.msk.f32.mxu1 %vm8138_vm1, %v8139_v15 }
 0x28c   :  { %7842 = vmatprep.subr.bf16.mxu1 %v8137_v0 }
 0x28e   :  { %6829 = vmatmul.mubr.msk.f32.gmra.mrb[54].mxu1 %vm508_vm5, %v1020_v12 }
 0x28f   :  { %7844 = vmatpush3.bf16.msra.mxu1 %v8462_v37  ;;  %6831 = vmatprep.mubr.msk.f32.mxu1 %vm8138_vm1, %v8139_v15 }
 0x290   :  { %7845 = vmatprep.subr.bf16.mxu1 %v8137_v0 }
 0x292   :  { %6832 = vmatmul.mubr.msk.f32.gmra.mrb[56].mxu1 %vm508_vm5, %v1025_v17 }
 0x293   :  { %7847 = vmatpush3.bf16.msra.mxu1 %v8470_v44  ;;  %6834 = vmatprep.mubr.msk.f32.mxu1 %vm8138_vm1, %v8139_v15 }
 0x294   :  { %7848 = vmatprep.subr.bf16.mxu1 %v8137_v0 }
 0x296   :  { %6835 = vmatmul.mubr.msk.f32.gmra.mrb[58].mxu1 %vm508_vm5, %v1030_v24 }
 0x297   :  { %7850 = vmatpush3.bf16.msra.mxu1 %v8478_v51  ;;  %6869 = vmatprep.mubr.msk.f32.mxu1 %vm8138_vm1, %v8139_v15 }
 0x298   :  { %7851 = vmatprep.subr.bf16.mxu1 %v8137_v0 }
 0x29b   :  { %7853 = vmatpush3.bf16.msra.mxu1 %v8486_v58 }
 0x29c   :  { %7854 = vmatprep.subr.bf16.mxu1 %v8137_v0 }
 0x29f   :  { %7856 = vmatpush3.bf16.msra.mxu1 %v8494_v2 }
 0x2a0   :  { %7857 = vmatprep.subr.bf16.mxu1 %v8137_v0 }
 0x2a3   :  { %7859 = vmatpush3.bf16.msra.mxu1 %v8502_v9 }
 0x2a4   :  { %7888 = vmatprep.subr.bf16.mxu1 %v8137_v0 }
 0x2a6   :  { %6870 = vmatmul.mubr.f32.vlgmr.msra.gmra.mrb[60].mxu1 %v5849_v32 }
 0x2a7   :  { %6872 = vmatprep.mubr.msk.f32.mxu1 %vm8138_vm1, %v8139_v15 }
 0x2aa   :  { %6873 = vmatmul.mubr.f32.gmra.mrb[62].mxu1 %v5850_v33 }
 0x2ab   :  { %6875 = vmatprep.mubr.msk.f32.mxu1 %vm8138_vm1, %v8139_v15 }
 0x2ae   :  { %6876 = vmatmul.mubr.f32.gmra.mrb[64].mxu1 %v5851_v34 }
 0x2af   :  { %6878 = vmatprep.mubr.msk.f32.mxu1 %vm8138_vm1, %v8139_v15 }
 0x2b2   :  { %6879 = vmatmul.mubr.f32.gmra.mrb[66].mxu1 %v5852_v36 }
 0x2b3   :  { %6881 = vmatprep.mubr.msk.f32.mxu1 %vm8138_vm1, %v8139_v15 }
 0x2b6   :  { %6882 = vmatmul.mubr.f32.gmra.mrb[68].mxu1 %v5853_v38 }
 0x2b7   :  { %6954 = vmatprep.mubr.msk.f32.mxu1 %vm8138_vm1, %v8139_v15 }
 0x31d   :  { %v594_v42 = vpop.f32.mrb[20].mxu1 }
 0x31e   :  { %v6673_v43 = vpop.f32.mrb[21].mxu1 }
 0x321   :  { %v599_v45 = vpop.f32.mrb[22].mxu1 }
 0x322   :  { %v6676_v46 = vpop.f32.mrb[23].mxu1 }
 0x325   :  { %v604_v47 = vpop.f32.mrb[24].mxu1 }
 0x326   :  { %v6679_v48 = vpop.f32.mrb[25].mxu1 }
 0x329   :  { %v609_v49 = vpop.f32.mrb[26].mxu1 }
 0x32a   :  { %v6682_v50 = vpop.f32.mrb[27].mxu1 }
 0x32d   :  { %v614_v52 = vpop.f32.mrb[28].mxu1 }
 0x32e   :  { %v6685_v53 = vpop.f32.mrb[29].mxu1 }
 0x331   :  { %v702_v54 = vpop.f32.mrb[30].mxu1 }
 0x332   :  { %v703_v55 = vadd.f32 %v702_v54, %v594_v42  ;;  %v6692_v56 = vpop.f32.mrb[31].mxu1 }
 0x333   :  { %v5862_v56 = vld [vmem:[%s9862_s3 + $0xc8] sm:$0xff] }
 0x335   :  { %v707_v57 = vpop.f32.mrb[32].mxu1 }
 0x336   :  { %v708_v59 = vadd.f32 %v707_v57, %v599_v45  ;;  %v6695_v60 = vpop.f32.mrb[33].mxu1  ;;  %v5863_v57 = vld [vmem:[%s9862_s3 + $0xd0] sm:$0xff] }
 0x337   :  { %v5865_v60 = vld [vmem:[%s9862_s3 + $0xe0] sm:$0xff] }
 0x339   :  { %v712_v61 = vpop.f32.mrb[34].mxu1 }
 0x33a   :  { %v713_v62 = vadd.f32 %v712_v61, %v604_v47  ;;  %v6698_v63 = vpop.f32.mrb[35].mxu1  ;;  %v5866_v61 = vld [vmem:[%s9862_s3 + $0xe8] sm:$0xf] }
 0x33b   :  { %v5868_v63 = vld [vmem:[%s9863_s4 + $0x58] sm:$0x1] }
 0x33d   :  { %v717_v1 = vpop.f32.mrb[36].mxu1 }
 0x33e   :  { %v718_v3 = vadd.f32 %v717_v1, %v609_v49  ;;  %v6701_v4 = vpop.f32.mrb[37].mxu1 }
 0x341   :  { %v722_v5 = vpop.f32.mrb[38].mxu1 }
 0x342   :  { %v723_v6 = vadd.f32 %v722_v5, %v614_v52  ;;  %v6704_v7 = vpop.f32.mrb[39].mxu1 }
 0x345   :  { %v909_v8 = vpop.f32.mrb[40].mxu1 }
 0x346   :  { %v933_v10 = vadd.f32 %v909_v8, %v703_v55  ;;  %v6758_v11 = vpop.f32.mrb[41].mxu1 }
 0x349   :  { %v914_v12 = vpop.f32.mrb[42].mxu1 }
 0x34a   :  { %v934_v13 = vadd.f32 %v914_v12, %v708_v59  ;;  %v6761_v14 = vpop.f32.mrb[43].mxu1  ;;  %v5864_v59 = vld [vmem:[%s9862_s3 + $0xd8] sm:$0xff] }
 0x34d   :  { %v919_v16 = vpop.f32.mrb[44].mxu1 }
 0x34e   :  { %v935_v17 = vadd.f32 %v919_v16, %v713_v62  ;;  %v6764_v18 = vpop.f32.mrb[45].mxu1  ;;  %v5867_v62 = vld [vmem:[%s9863_s4 + $0x50] sm:$0xff] }
 0x34f   :  { %v7889_v1 = vpack.c.bf16 %v5868_v63, %v5867_v62 }
 0x351   :  { %v924_v19 = vpop.f32.mrb[46].mxu1  ;;  %7891 = vmatpush3.bf16.msk.msra.mxu1 %vm8647_vm4, %v7889_v1 }
 0x352   :  { %v936_v20 = vadd.f32 %v924_v19, %v718_v3  ;;  %v6767_v21 = vpop.f32.mrb[47].mxu1  ;;  %7892 = vmatprep.subr.bf16.mxu1 %v8137_v0 }
 0x355   :  { %v929_v22 = vpop.f32.mrb[48].mxu1 }
 0x356   :  { %v937_v24 = vadd.f32 %v929_v22, %v723_v6  ;;  %v6770_v25 = vpop.f32.mrb[49].mxu1 }
 0x359   :  { %v1121_v26 = vpop.f32.mrb[50].mxu1 }
 0x35a   :  { %v8806_v27 = vadd.f32 %v1121_v26, %v933_v10  ;;  %v6824_v28 = vpop.f32.mrb[51].mxu1 }
 0x35d   :  { %v1126_v29 = vpop.f32.mrb[52].mxu1 }
 0x35e   :  { %v8808_v31 = vadd.f32 %v1126_v29, %v934_v13  ;;  %v6827_v32 = vpop.f32.mrb[53].mxu1 }
 0x35f   :  { %v5875_v32 = vld [vmem:[%s9862_s3 + $0xf0] sm:$0xff] }
 0x361   :  { %v1131_v33 = vpop.f32.mrb[54].mxu1 }
 0x362   :  { %v8810_v34 = vadd.f32 %v1131_v33, %v935_v17  ;;  %v6830_v36 = vpop.f32.mrb[55].mxu1  ;;  %v5876_v33 = vld [vmem:[%s9862_s3 + $0xf8] sm:$0xff] }
 0x363   :  { %v5878_v36 = vld [vmem:[%s9862_s3 + $0x108] sm:$0xff] }
 0x365   :  { %v1136_v38 = vpop.f32.mrb[56].mxu1 }
 0x366   :  { %v8812_v39 = vadd.f32 %v1136_v38, %v936_v20  ;;  %v6833_v40 = vpop.f32.mrb[57].mxu1  ;;  %v5879_v38 = vld [vmem:[%s9862_s3 + $0x110] sm:$0xf] }
 0x367   :  { %v5881_v40 = vld [vmem:[%s9863_s4 + $0x68] sm:$0x1] }
 0x369   :  { %v1141_v41 = vpop.f32.mrb[58].mxu1 }
 0x36a   :  { %v8814_v42 = vadd.f32 %v1141_v41, %v937_v24  ;;  %v6836_v43 = vpop.f32.mrb[59].mxu1 }
 0x379   :  { %v1222_v45 = vpop.f32.mrb[60].mxu1 }
 0x37a   :  { %v6871_v46 = vpop.f32.mrb[61].mxu1  ;;  %6889 = vmatmul.mubr.msk.f32.vlgmr.msra.gmra.mrb[52].mxu0 %vm508_vm5, %v1222_v45 }
 0x37b   :  { %7866 = vmatpush3.bf16.msra.mxu0 %v8446_v23  ;;  %6891 = vmatprep.mubr.msk.f32.mxu0 %vm8138_vm1, %v8139_v15 }
 0x37c   :  { %7867 = vmatprep.subr.bf16.mxu0 %v8137_v0 }
 0x37d   :  { %v1227_v47 = vpop.f32.mrb[62].mxu1 }
 0x37e   :  { %6892 = vmatmul.mubr.msk.f32.gmra.mrb[54].mxu0 %vm508_vm5, %v1227_v47  ;;  %v6874_v48 = vpop.f32.mrb[63].mxu1 }
 0x37f   :  { %7869 = vmatpush3.bf16.msra.mxu0 %v8454_v30  ;;  %6894 = vmatprep.mubr.msk.f32.mxu0 %vm8138_vm1, %v8139_v15 }
 0x380   :  { %7870 = vmatprep.subr.bf16.mxu0 %v8137_v0 }
 0x381   :  { %v1232_v49 = vpop.f32.mrb[64].mxu1 }
 0x382   :  { %6895 = vmatmul.mubr.msk.f32.gmra.mrb[56].mxu0 %vm508_vm5, %v1232_v49  ;;  %v6877_v50 = vpop.f32.mrb[65].mxu1 }
 0x383   :  { %7872 = vmatpush3.bf16.msra.mxu0 %v8462_v37  ;;  %6897 = vmatprep.mubr.msk.f32.mxu0 %vm8138_vm1, %v8139_v15 }
 0x384   :  { %7873 = vmatprep.subr.bf16.mxu0 %v8137_v0 }
 0x385   :  { %v1237_v52 = vpop.f32.mrb[66].mxu1 }
 0x386   :  { %6898 = vmatmul.mubr.msk.f32.gmra.mrb[58].mxu0 %vm508_vm5, %v1237_v52  ;;  %v6880_v53 = vpop.f32.mrb[67].mxu1 }
 0x387   :  { %7875 = vmatpush3.bf16.msra.mxu0 %v8470_v44  ;;  %6900 = vmatprep.mubr.msk.f32.mxu0 %vm8138_vm1, %v8139_v15 }
 0x388   :  { %7876 = vmatprep.subr.bf16.mxu0 %v8137_v0 }
 0x389   :  { %v1242_v54 = vpop.f32.mrb[68].mxu1 }
 0x38a   :  { %6901 = vmatmul.mubr.msk.f32.gmra.mrb[60].mxu0 %vm508_vm5, %v1242_v54  ;;  %v6883_v55 = vpop.f32.mrb[69].mxu1 }
 0x38b   :  { %7878 = vmatpush3.bf16.msra.mxu0 %v8478_v51  ;;  %6935 = vmatprep.mubr.msk.f32.mxu0 %vm8138_vm1, %v8139_v15 }
 0x38c   :  { %7879 = vmatprep.subr.bf16.mxu0 %v8137_v0 }
 0x38f   :  { %7881 = vmatpush3.bf16.msra.mxu0 %v8486_v58 }
 0x390   :  { %7882 = vmatprep.subr.bf16.mxu0 %v8137_v0 }
 0x393   :  { %7884 = vmatpush3.bf16.msra.mxu0 %v8494_v2 }
 0x394   :  { %7885 = vmatprep.subr.bf16.mxu0 %v8137_v0 }
 0x397   :  { %7887 = vmatpush3.bf16.msra.mxu0 %v8502_v9 }
 0x398   :  { %7916 = vmatprep.subr.bf16.mxu0 %v8137_v0 }
 0x39a   :  { %6936 = vmatmul.mubr.f32.vlgmr.msra.gmra.mrb[62].mxu0 %v5862_v56 }
 0x39b   :  { %6938 = vmatprep.mubr.msk.f32.mxu0 %vm8138_vm1, %v8139_v15 }
 0x39e   :  { %6939 = vmatmul.mubr.f32.gmra.mrb[64].mxu0 %v5863_v57 }
 0x39f   :  { %6941 = vmatprep.mubr.msk.f32.mxu0 %vm8138_vm1, %v8139_v15 }
 0x3a2   :  { %6942 = vmatmul.mubr.f32.gmra.mrb[66].mxu0 %v5864_v59 }
 0x3a3   :  { %6944 = vmatprep.mubr.msk.f32.mxu0 %vm8138_vm1, %v8139_v15 }
 0x3a6   :  { %6945 = vmatmul.mubr.f32.gmra.mrb[68].mxu0 %v5865_v60 }
 0x3a7   :  { %6947 = vmatprep.mubr.msk.f32.mxu0 %vm8138_vm1, %v8139_v15 }
 0x3aa   :  { %6948 = vmatmul.mubr.f32.gmra.mrb[70].mxu0 %v5866_v61 }
 0x3ab   :  { %7020 = vmatprep.mubr.msk.f32.mxu0 %vm8138_vm1, %v8139_v15 }
 0x44d   :  { %v1333_v3 = vpop.f32.mrb[52].mxu0 }
 0x44e   :  { %v8882_v4 = vadd.f32 %v1333_v3, %v8806_v27  ;;  %v6890_v5 = vpop.f32.mrb[53].mxu0 }
 0x451   :  { %v1338_v6 = vpop.f32.mrb[54].mxu0 }
 0x452   :  { %v8885_v7 = vadd.f32 %v1338_v6, %v8808_v31  ;;  %v6893_v8 = vpop.f32.mrb[55].mxu0 }
 0x453   :  { %v5888_v8 = vld [vmem:[%s9862_s3 + $0x118] sm:$0xff] }
 0x455   :  { %v1343_v10 = vpop.f32.mrb[56].mxu0 }
 0x456   :  { %v8888_v11 = vadd.f32 %v1343_v10, %v8810_v34  ;;  %v6896_v12 = vpop.f32.mrb[57].mxu0  ;;  %v5877_v34 = vld [vmem:[%s9862_s3 + $0x100] sm:$0xff] }
 0x457   :  { %v5889_v10 = vld [vmem:[%s9862_s3 + $0x120] sm:$0xff]  ;;  %v5891_v12 = vld [vmem:[%s9862_s3 + $0x130] sm:$0xff] }
 0x459   :  { %v1348_v13 = vpop.f32.mrb[58].mxu0 }
 0x45a   :  { %v8891_v14 = vadd.f32 %v1348_v13, %v8812_v39  ;;  %v6899_v16 = vpop.f32.mrb[59].mxu0  ;;  %v5880_v39 = vld [vmem:[%s9863_s4 + $0x60] sm:$0xff]  ;;  %v5892_v13 = vld [vmem:[%s9862_s3 + $0x138] sm:$0xf] }
 0x45b   :  { %v7917_v41 = vpack.c.bf16 %v5881_v40, %v5880_v39  ;;  %v5894_v16 = vld [vmem:[%s9863_s4 + $0x78] sm:$0x1] }
 0x45d   :  { %v1353_v17 = vpop.f32.mrb[60].mxu0  ;;  %7919 = vmatpush3.bf16.msk.msra.mxu0 %vm8647_vm4, %v7917_v41 }
 0x45e   :  { %v8894_v18 = vadd.f32 %v1353_v17, %v8814_v42  ;;  %v6902_v19 = vpop.f32.mrb[61].mxu0  ;;  %7920 = vmatprep.subr.bf16.mxu0 %v8137_v0 }
 0x46d   :  { %v1434_v20 = vpop.f32.mrb[62].mxu0 }
 0x46e   :  { %v6937_v21 = vpop.f32.mrb[63].mxu0  ;;  %6955 = vmatmul.mubr.msk.f32.vlgmr.msra.gmra.mrb[70].mxu1 %vm508_vm5, %v1434_v20 }
 0x46f   :  { %7894 = vmatpush3.bf16.msra.mxu1 %v8446_v23  ;;  %6957 = vmatprep.mubr.msk.f32.mxu1 %vm8138_vm1, %v8139_v15 }
 0x470   :  { %7895 = vmatprep.subr.bf16.mxu1 %v8137_v0 }
 0x471   :  { %v1439_v22 = vpop.f32.mrb[64].mxu0 }
 0x472   :  { %6958 = vmatmul.mubr.msk.f32.gmra.mrb[72].mxu1 %vm508_vm5, %v1439_v22  ;;  %v6940_v24 = vpop.f32.mrb[65].mxu0 }
 0x473   :  { %7897 = vmatpush3.bf16.msra.mxu1 %v8454_v30  ;;  %6960 = vmatprep.mubr.msk.f32.mxu1 %vm8138_vm1, %v8139_v15 }
 0x474   :  { %7898 = vmatprep.subr.bf16.mxu1 %v8137_v0 }
 0x475   :  { %v1444_v25 = vpop.f32.mrb[66].mxu0 }
 0x476   :  { %6961 = vmatmul.mubr.msk.f32.gmra.mrb[74].mxu1 %vm508_vm5, %v1444_v25  ;;  %v6943_v26 = vpop.f32.mrb[67].mxu0 }
 0x477   :  { %7900 = vmatpush3.bf16.msra.mxu1 %v8462_v37  ;;  %6963 = vmatprep.mubr.msk.f32.mxu1 %vm8138_vm1, %v8139_v15 }
 0x478   :  { %7901 = vmatprep.subr.bf16.mxu1 %v8137_v0 }
 0x479   :  { %v1449_v27 = vpop.f32.mrb[68].mxu0 }
 0x47a   :  { %6964 = vmatmul.mubr.msk.f32.gmra.mrb[76].mxu1 %vm508_vm5, %v1449_v27  ;;  %v6946_v28 = vpop.f32.mrb[69].mxu0 }
 0x47b   :  { %7903 = vmatpush3.bf16.msra.mxu1 %v8470_v44  ;;  %6966 = vmatprep.mubr.msk.f32.mxu1 %vm8138_vm1, %v8139_v15 }
 0x47c   :  { %7904 = vmatprep.subr.bf16.mxu1 %v8137_v0 }
 0x47d   :  { %v1454_v29 = vpop.f32.mrb[70].mxu0 }
 0x47e   :  { %6967 = vmatmul.mubr.msk.f32.gmra.mrb[78].mxu1 %vm508_vm5, %v1454_v29  ;;  %v6949_v31 = vpop.f32.mrb[71].mxu0 }
 0x47f   :  { %7906 = vmatpush3.bf16.msra.mxu1 %v8478_v51  ;;  %7001 = vmatprep.mubr.msk.f32.mxu1 %vm8138_vm1, %v8139_v15 }
 0x480   :  { %7907 = vmatprep.subr.bf16.mxu1 %v8137_v0 }
 0x483   :  { %7909 = vmatpush3.bf16.msra.mxu1 %v8486_v58 }
 0x484   :  { %7910 = vmatprep.subr.bf16.mxu1 %v8137_v0 }
 0x487   :  { %7912 = vmatpush3.bf16.msra.mxu1 %v8494_v2 }
 0x488   :  { %7913 = vmatprep.subr.bf16.mxu1 %v8137_v0 }
 0x48b   :  { %7915 = vmatpush3.bf16.msra.mxu1 %v8502_v9 }
 0x48c   :  { %7944 = vmatprep.subr.bf16.mxu1 %v8137_v0 }
 0x48e   :  { %7002 = vmatmul.mubr.f32.vlgmr.msra.gmra.mrb[80].mxu1 %v5875_v32 }
 0x48f   :  { %7004 = vmatprep.mubr.msk.f32.mxu1 %vm8138_vm1, %v8139_v15 }
 0x492   :  { %7005 = vmatmul.mubr.f32.gmra.mrb[82].mxu1 %v5876_v33 }
 0x493   :  { %7007 = vmatprep.mubr.msk.f32.mxu1 %vm8138_vm1, %v8139_v15 }
 0x496   :  { %7008 = vmatmul.mubr.f32.gmra.mrb[84].mxu1 %v5877_v34 }
 0x497   :  { %7010 = vmatprep.mubr.msk.f32.mxu1 %vm8138_vm1, %v8139_v15 }
 0x49a   :  { %7011 = vmatmul.mubr.f32.gmra.mrb[86].mxu1 %v5878_v36 }
 0x49b   :  { %7013 = vmatprep.mubr.msk.f32.mxu1 %vm8138_vm1, %v8139_v15 }
 0x49e   :  { %7014 = vmatmul.mubr.f32.gmra.mrb[88].mxu1 %v5879_v38 }
 0x49f   :  { %7086 = vmatprep.mubr.msk.f32.mxu1 %vm8138_vm1, %v8139_v15 }
 0x541   :  { %v1545_v42 = vpop.f32.mrb[70].mxu1 }
 0x542   :  { %v8962_v43 = vadd.f32 %v1545_v42, %v8882_v4  ;;  %v6956_v45 = vpop.f32.mrb[71].mxu1 }
 0x545   :  { %v1550_v46 = vpop.f32.mrb[72].mxu1 }
 0x546   :  { %v8965_v47 = vadd.f32 %v1550_v46, %v8885_v7  ;;  %v6959_v48 = vpop.f32.mrb[73].mxu1 }
 0x547   :  { %v5901_v48 = vld [vmem:[%s9862_s3 + $0x140] sm:$0xff] }
 0x549   :  { %v1555_v49 = vpop.f32.mrb[74].mxu1 }
 0x54a   :  { %v8968_v50 = vadd.f32 %v1555_v49, %v8888_v11  ;;  %v6962_v52 = vpop.f32.mrb[75].mxu1  ;;  %v5890_v11 = vld [vmem:[%s9862_s3 + $0x128] sm:$0xff] }
 0x54b   :  { %v5902_v49 = vld [vmem:[%s9862_s3 + $0x148] sm:$0xff]  ;;  %v5904_v52 = vld [vmem:[%s9862_s3 + $0x158] sm:$0xff] }
 0x54d   :  { %v1560_v53 = vpop.f32.mrb[76].mxu1 }
 0x54e   :  { %v8971_v54 = vadd.f32 %v1560_v53, %v8891_v14  ;;  %v6965_v55 = vpop.f32.mrb[77].mxu1  ;;  %v5893_v14 = vld [vmem:[%s9863_s4 + $0x70] sm:$0xff]  ;;  %v5905_v53 = vld [vmem:[%s9862_s3 + $0x160] sm:$0xf] }
 0x54f   :  { %v7945_v17 = vpack.c.bf16 %v5894_v16, %v5893_v14  ;;  %v5907_v55 = vld [vmem:[%s9863_s4 + $0x88] sm:$0x1] }
 0x551   :  { %v1565_v56 = vpop.f32.mrb[78].mxu1  ;;  %7947 = vmatpush3.bf16.msk.msra.mxu1 %vm8647_vm4, %v7945_v17 }
 0x552   :  { %v8974_v57 = vadd.f32 %v1565_v56, %v8894_v18  ;;  %v6968_v59 = vpop.f32.mrb[79].mxu1  ;;  %7948 = vmatprep.subr.bf16.mxu1 %v8137_v0 }
 0x561   :  { %v1646_v60 = vpop.f32.mrb[80].mxu1 }
 0x562   :  { %v7003_v61 = vpop.f32.mrb[81].mxu1  ;;  %7021 = vmatmul.mubr.msk.f32.vlgmr.msra.gmra.mrb[72].mxu0 %vm508_vm5, %v1646_v60 }
 0x563   :  { %7922 = vmatpush3.bf16.msra.mxu0 %v8446_v23  ;;  %7023 = vmatprep.mubr.msk.f32.mxu0 %vm8138_vm1, %v8139_v15 }
 0x564   :  { %7923 = vmatprep.subr.bf16.mxu0 %v8137_v0 }
 0x565   :  { %v1651_v62 = vpop.f32.mrb[82].mxu1 }
 0x566   :  { %7024 = vmatmul.mubr.msk.f32.gmra.mrb[74].mxu0 %vm508_vm5, %v1651_v62  ;;  %v7006_v63 = vpop.f32.mrb[83].mxu1 }
 0x567   :  { %7925 = vmatpush3.bf16.msra.mxu0 %v8454_v30  ;;  %7026 = vmatprep.mubr.msk.f32.mxu0 %vm8138_vm1, %v8139_v15 }
 0x568   :  { %7926 = vmatprep.subr.bf16.mxu0 %v8137_v0 }
 0x569   :  { %v1656_v1 = vpop.f32.mrb[84].mxu1 }
 0x56a   :  { %7027 = vmatmul.mubr.msk.f32.gmra.mrb[76].mxu0 %vm508_vm5, %v1656_v1  ;;  %v7009_v3 = vpop.f32.mrb[85].mxu1 }
 0x56b   :  { %7928 = vmatpush3.bf16.msra.mxu0 %v8462_v37  ;;  %7029 = vmatprep.mubr.msk.f32.mxu0 %vm8138_vm1, %v8139_v15 }
 0x56c   :  { %7929 = vmatprep.subr.bf16.mxu0 %v8137_v0 }
 0x56d   :  { %v1661_v4 = vpop.f32.mrb[86].mxu1 }
 0x56e   :  { %7030 = vmatmul.mubr.msk.f32.gmra.mrb[78].mxu0 %vm508_vm5, %v1661_v4  ;;  %v7012_v5 = vpop.f32.mrb[87].mxu1 }
 0x56f   :  { %7931 = vmatpush3.bf16.msra.mxu0 %v8470_v44  ;;  %7032 = vmatprep.mubr.msk.f32.mxu0 %vm8138_vm1, %v8139_v15 }
 0x570   :  { %7932 = vmatprep.subr.bf16.mxu0 %v8137_v0 }
 0x571   :  { %v1666_v6 = vpop.f32.mrb[88].mxu1 }
 0x572   :  { %7033 = vmatmul.mubr.msk.f32.gmra.mrb[80].mxu0 %vm508_vm5, %v1666_v6  ;;  %v7015_v7 = vpop.f32.mrb[89].mxu1 }
 0x573   :  { %7934 = vmatpush3.bf16.msra.mxu0 %v8478_v51  ;;  %7067 = vmatprep.mubr.msk.f32.mxu0 %vm8138_vm1, %v8139_v15 }
 0x574   :  { %7935 = vmatprep.subr.bf16.mxu0 %v8137_v0 }
 0x577   :  { %7937 = vmatpush3.bf16.msra.mxu0 %v8486_v58 }
 0x578   :  { %7938 = vmatprep.subr.bf16.mxu0 %v8137_v0 }
 0x57b   :  { %7940 = vmatpush3.bf16.msra.mxu0 %v8494_v2 }
 0x57c   :  { %7941 = vmatprep.subr.bf16.mxu0 %v8137_v0 }
 0x57f   :  { %7943 = vmatpush3.bf16.msra.mxu0 %v8502_v9 }
 0x580   :  { %7972 = vmatprep.subr.bf16.mxu0 %v8137_v0 }
 0x582   :  { %7068 = vmatmul.mubr.f32.vlgmr.msra.gmra.mrb[82].mxu0 %v5888_v8 }
 0x583   :  { %7070 = vmatprep.mubr.msk.f32.mxu0 %vm8138_vm1, %v8139_v15 }
 0x586   :  { %7071 = vmatmul.mubr.f32.gmra.mrb[84].mxu0 %v5889_v10 }
 0x587   :  { %7073 = vmatprep.mubr.msk.f32.mxu0 %vm8138_vm1, %v8139_v15 }
 0x58a   :  { %7074 = vmatmul.mubr.f32.gmra.mrb[86].mxu0 %v5890_v11 }
 0x58b   :  { %7076 = vmatprep.mubr.msk.f32.mxu0 %vm8138_vm1, %v8139_v15 }
 0x58e   :  { %7077 = vmatmul.mubr.f32.gmra.mrb[88].mxu0 %v5891_v12 }
 0x58f   :  { %7079 = vmatprep.mubr.msk.f32.mxu0 %vm8138_vm1, %v8139_v15 }
 0x592   :  { %7080 = vmatmul.mubr.f32.gmra.mrb[90].mxu0 %v5892_v13 }
 0x593   :  { %7152 = vmatprep.mubr.msk.f32.mxu0 %vm8138_vm1, %v8139_v15 }
 0x635   :  { %v1757_v18 = vpop.f32.mrb[72].mxu0 }
 0x636   :  { %v9042_v19 = vadd.f32 %v1757_v18, %v8962_v43  ;;  %v7022_v20 = vpop.f32.mrb[73].mxu0 }
 0x637   :  { %v5919_v20 = vld [vmem:[%s9863_s4 + $0x90] sm:$0xff] }
 0x639   :  { %v1762_v21 = vpop.f32.mrb[74].mxu0 }
 0x63a   :  { %v9045_v22 = vadd.f32 %v1762_v21, %v8965_v47  ;;  %v7025_v24 = vpop.f32.mrb[75].mxu0  ;;  %v5920_v21 = vld [vmem:[%s9863_s4 + $0x98] sm:$0x1] }
 0x63d   :  { %v1767_v25 = vpop.f32.mrb[76].mxu0 }
 0x63e   :  { %v9048_v26 = vadd.f32 %v1767_v25, %v8968_v50  ;;  %v7028_v27 = vpop.f32.mrb[77].mxu0  ;;  %v5903_v50 = vld [vmem:[%s9862_s3 + $0x150] sm:$0xff] }
 0x641   :  { %v1772_v28 = vpop.f32.mrb[78].mxu0 }
 0x642   :  { %v9051_v29 = vadd.f32 %v1772_v28, %v8971_v54  ;;  %v7031_v31 = vpop.f32.mrb[79].mxu0  ;;  %v5906_v54 = vld [vmem:[%s9863_s4 + $0x80] sm:$0xff] }
 0x643   :  { %v7973_v56 = vpack.c.bf16 %v5907_v55, %v5906_v54 }
 0x645   :  { %v1777_v32 = vpop.f32.mrb[80].mxu0  ;;  %7975 = vmatpush3.bf16.msk.msra.mxu0 %vm8647_vm4, %v7973_v56  ;;  %v5927_v56 = vld [vmem:[%s9864_s5] ss:$0 sm:$0xff] }
 0x646   :  { %v9054_v33 = vadd.f32 %v1777_v32, %v8974_v57  ;;  %v7034_v34 = vpop.f32.mrb[81].mxu0  ;;  %7976 = vmatprep.subr.bf16.mxu0 %v8137_v0 }
 0x655   :  { %v1858_v36 = vpop.f32.mrb[82].mxu0 }
 0x656   :  { %v7069_v38 = vpop.f32.mrb[83].mxu0  ;;  %7087 = vmatmul.mubr.msk.f32.vlgmr.msra.gmra.mrb[90].mxu1 %vm508_vm5, %v1858_v36 }
 0x657   :  { %7950 = vmatpush3.bf16.msra.mxu1 %v8446_v23  ;;  %7089 = vmatprep.mubr.msk.f32.mxu1 %vm8138_vm1, %v8139_v15 }
 0x658   :  { %7951 = vmatprep.subr.bf16.mxu1 %v8137_v0 }
 0x659   :  { %v1863_v39 = vpop.f32.mrb[84].mxu0 }
 0x65a   :  { %7090 = vmatmul.mubr.msk.f32.gmra.mrb[92].mxu1 %vm508_vm5, %v1863_v39  ;;  %v7072_v40 = vpop.f32.mrb[85].mxu0 }
 0x65b   :  { %7953 = vmatpush3.bf16.msra.mxu1 %v8454_v30  ;;  %7092 = vmatprep.mubr.msk.f32.mxu1 %vm8138_vm1, %v8139_v15 }
 0x65c   :  { %7954 = vmatprep.subr.bf16.mxu1 %v8137_v0 }
 0x65d   :  { %v1868_v41 = vpop.f32.mrb[86].mxu0 }
 0x65e   :  { %7093 = vmatmul.mubr.msk.f32.gmra.mrb[94].mxu1 %vm508_vm5, %v1868_v41  ;;  %v7075_v42 = vpop.f32.mrb[87].mxu0 }
 0x65f   :  { %7956 = vmatpush3.bf16.msra.mxu1 %v8462_v37  ;;  %7095 = vmatprep.mubr.msk.f32.mxu1 %vm8138_vm1, %v8139_v15 }
 0x660   :  { %7957 = vmatprep.subr.bf16.mxu1 %v8137_v0 }
 0x661   :  { %v1873_v43 = vpop.f32.mrb[88].mxu0 }
 0x662   :  { %7096 = vmatmul.mubr.msk.f32.gmra.mrb[96].mxu1 %vm508_vm5, %v1873_v43  ;;  %v7078_v45 = vpop.f32.mrb[89].mxu0 }
 0x663   :  { %7959 = vmatpush3.bf16.msra.mxu1 %v8470_v44  ;;  %7098 = vmatprep.mubr.msk.f32.mxu1 %vm8138_vm1, %v8139_v15 }
 0x664   :  { %7960 = vmatprep.subr.bf16.mxu1 %v8137_v0 }
 0x665   :  { %v1878_v46 = vpop.f32.mrb[90].mxu0 }
 0x666   :  { %7099 = vmatmul.mubr.msk.f32.gmra.mrb[98].mxu1 %vm508_vm5, %v1878_v46  ;;  %v7081_v47 = vpop.f32.mrb[91].mxu0 }
 0x667   :  { %7962 = vmatpush3.bf16.msra.mxu1 %v8478_v51  ;;  %7133 = vmatprep.mubr.msk.f32.mxu1 %vm8138_vm1, %v8139_v15 }
 0x668   :  { %7963 = vmatprep.subr.bf16.mxu1 %v8137_v0 }
 0x66b   :  { %7965 = vmatpush3.bf16.msra.mxu1 %v8486_v58 }
 0x66c   :  { %7966 = vmatprep.subr.bf16.mxu1 %v8137_v0 }
 0x66f   :  { %7968 = vmatpush3.bf16.msra.mxu1 %v8494_v2 }
 0x670   :  { %7969 = vmatprep.subr.bf16.mxu1 %v8137_v0 }
 0x673   :  { %7971 = vmatpush3.bf16.msra.mxu1 %v8502_v9 }
 0x674   :  { %8000 = vmatprep.subr.bf16.mxu1 %v8137_v0 }
 0x676   :  { %7134 = vmatmul.mubr.f32.vlgmr.msra.gmra.mrb[100].mxu1 %v5901_v48 }
 0x677   :  { %7136 = vmatprep.mubr.msk.f32.mxu1 %vm8138_vm1, %v8139_v15 }
 0x67a   :  { %7137 = vmatmul.mubr.f32.gmra.mrb[102].mxu1 %v5902_v49 }
 0x67b   :  { %7139 = vmatprep.mubr.msk.f32.mxu1 %vm8138_vm1, %v8139_v15 }
 0x67e   :  { %7140 = vmatmul.mubr.f32.gmra.mrb[104].mxu1 %v5903_v50 }
 0x67f   :  { %7142 = vmatprep.mubr.msk.f32.mxu1 %vm8138_vm1, %v8139_v15 }
 0x682   :  { %7143 = vmatmul.mubr.f32.gmra.mrb[106].mxu1 %v5904_v52 }
 0x683   :  { %7145 = vmatprep.mubr.msk.f32.mxu1 %vm8138_vm1, %v8139_v15 }
 0x686   :  { %7146 = vmatmul.mubr.f32.gmra.mrb[108].mxu1 %v5905_v53 }
 0x687   :  { %7218 = vmatprep.mubr.msk.f32.mxu1 %vm8138_vm1, %v8139_v15 }
 0x729   :  { %v1969_v57 = vpop.f32.mrb[90].mxu1 }
 0x72a   :  { %v9122_v59 = vadd.f32 %v1969_v57, %v9042_v19  ;;  %v7088_v60 = vpop.f32.mrb[91].mxu1 }
 0x72d   :  { %v1974_v61 = vpop.f32.mrb[92].mxu1 }
 0x72e   :  { %v9125_v62 = vadd.f32 %v1974_v61, %v9045_v22  ;;  %v7091_v63 = vpop.f32.mrb[93].mxu1  ;;  %v8001_v22 = vpack.c.bf16 %v5920_v21, %v5919_v20  ;;  %v5933_v20 = vld [vmem:[%s9866_s6 + $0x20] sm:$0xff]  ;;  %v2440_v21 = vld [vmem:[%s9866_s6 + $0x8] sm:$0xff] }
 0x730   :  { %8003 = vmatpush3.bf16.msk.msra.mxu1 %vm8647_vm4, %v8001_v22  ;;  %v5934_v22 = vld [vmem:[%s9866_s6 + $0x28] sm:$0x3] }
 0x731   :  { %v1979_v1 = vpop.f32.mrb[94].mxu1  ;;  %8004 = vmatprep.subr.bf16.mxu1 %v8137_v0 }
 0x732   :  { %v9128_v3 = vadd.f32 %v1979_v1, %v9048_v26  ;;  %v7094_v4 = vpop.f32.mrb[95].mxu1 }
 0x735   :  { %v1984_v5 = vpop.f32.mrb[96].mxu1 }
 0x736   :  { %v9131_v6 = vadd.f32 %v1984_v5, %v9051_v29  ;;  %v7097_v7 = vpop.f32.mrb[97].mxu1 }
 0x739   :  { %v1989_v8 = vpop.f32.mrb[98].mxu1 }
 0x73a   :  { %v9134_v10 = vadd.f32 %v1989_v8, %v9054_v33  ;;  %v7100_v11 = vpop.f32.mrb[99].mxu1 }
 0x749   :  { %v2070_v12 = vpop.f32.mrb[100].mxu1 }
 0x74a   :  { %v7135_v13 = vpop.f32.mrb[101].mxu1  ;;  %7153 = vmatmul.mubr.msk.f32.vlgmr.msra.gmra.mrb[92].mxu0 %vm508_vm5, %v2070_v12 }
 0x74b   :  { %7978 = vmatpush3.bf16.msra.mxu0 %v8446_v23  ;;  %7155 = vmatprep.mubr.msk.f32.mxu0 %vm8138_vm1, %v8139_v15 }
 0x74c   :  { %7979 = vmatprep.subr.bf16.mxu0 %v8137_v0 }
 0x74d   :  { %v2075_v14 = vpop.f32.mrb[102].mxu1 }
 0x74e   :  { %7156 = vmatmul.mubr.msk.f32.gmra.mrb[94].mxu0 %vm508_vm5, %v2075_v14  ;;  %v7138_v16 = vpop.f32.mrb[103].mxu1 }
 0x74f   :  { %7981 = vmatpush3.bf16.msra.mxu0 %v8454_v30  ;;  %7158 = vmatprep.mubr.msk.f32.mxu0 %vm8138_vm1, %v8139_v15 }
 0x750   :  { %7982 = vmatprep.subr.bf16.mxu0 %v8137_v0 }
 0x751   :  { %v2080_v17 = vpop.f32.mrb[104].mxu1 }
 0x752   :  { %7159 = vmatmul.mubr.msk.f32.gmra.mrb[96].mxu0 %vm508_vm5, %v2080_v17  ;;  %v7141_v23 = vpop.f32.mrb[105].mxu1 }
 0x753   :  { %7984 = vmatpush3.bf16.msra.mxu0 %v8462_v37  ;;  %7161 = vmatprep.mubr.msk.f32.mxu0 %vm8138_vm1, %v8139_v15 }
 0x754   :  { %7985 = vmatprep.subr.bf16.mxu0 %v8137_v0 }
 0x755   :  { %v2085_v18 = vpop.f32.mrb[106].mxu1 }
 0x756   :  { %7162 = vmatmul.mubr.msk.f32.gmra.mrb[98].mxu0 %vm508_vm5, %v2085_v18  ;;  %v7144_v30 = vpop.f32.mrb[107].mxu1 }
 0x757   :  { %7987 = vmatpush3.bf16.msra.mxu0 %v8470_v44  ;;  %7164 = vmatprep.mubr.msk.f32.mxu0 %vm8138_vm1, %v8139_v15  ;;  %v5914_v44 = vld [vmem:[%s9862_s3 + $0x168] sm:$0xff] }
 0x758   :  { %7988 = vmatprep.subr.bf16.mxu0 %v8137_v0 }
 0x759   :  { %v2090_v19 = vpop.f32.mrb[108].mxu1 }
 0x75a   :  { %7165 = vmatmul.mubr.msk.f32.gmra.mrb[100].mxu0 %vm508_vm5, %v2090_v19  ;;  %v7147_v37 = vpop.f32.mrb[109].mxu1  ;;  %v5939_v19 = vld [vmem:[%s9865_s7 + $0x10] sm:$0xff] }
 0x75b   :  { %7990 = vmatpush3.bf16.msra.mxu0 %v8478_v51  ;;  %7199 = vmatprep.mubr.msk.f32.mxu0 %vm8138_vm1, %v8139_v15  ;;  %v5915_v51 = vld [vmem:[%s9862_s3 + $0x170] sm:$0xff]  ;;  %v5940_v37 = vld [vmem:[%s9865_s7 + $0x18] sm:$0x3] }
 0x75c   :  { %7991 = vmatprep.subr.bf16.mxu0 %v8137_v0 }
 0x75f   :  { %7993 = vmatpush3.bf16.msra.mxu0 %v8486_v58  ;;  %v5916_v58 = vld [vmem:[%s9862_s3 + $0x178] sm:$0xff] }
 0x760   :  { %7994 = vmatprep.subr.bf16.mxu0 %v8137_v0 }
 0x763   :  { %7996 = vmatpush3.bf16.msra.mxu0 %v8494_v2  ;;  %v5917_v2 = vld [vmem:[%s9862_s3 + $0x180] sm:$0xff] }
 0x764   :  { %7997 = vmatprep.subr.bf16.mxu0 %v8137_v0 }
 0x767   :  { %7999 = vmatpush3.bf16.msra.mxu0 %v8502_v9  ;;  %v5918_v9 = vld [vmem:[%s9862_s3 + $0x188] sm:$0xf] }
 0x768   :  { %8010 = vmatprep.subr.bf16.mxu0 %v8137_v0 }
 0x76a   :  { %7200 = vmatmul.mubr.f32.vlgmr.msra.gmra.mrb[102].mxu0 %v5914_v44 }
 0x76b   :  { %7202 = vmatprep.mubr.msk.f32.mxu0 %vm8138_vm1, %v8139_v15 }
 0x76e   :  { %7203 = vmatmul.mubr.f32.gmra.mrb[104].mxu0 %v5915_v51  ;;  %v5932_v51 = vld [vmem:[%s9866_s6 + $0x18] sm:$0xff] }
 0x76f   :  { %7205 = vmatprep.mubr.msk.f32.mxu0 %vm8138_vm1, %v8139_v15 }
 0x772   :  { %7206 = vmatmul.mubr.f32.gmra.mrb[106].mxu0 %v5916_v58  ;;  %v2439_v58 = vld [vmem:[%s9866_s6] sm:$0xff] }
 0x773   :  { %7208 = vmatprep.mubr.msk.f32.mxu0 %vm8138_vm1, %v8139_v15 }
 0x776   :  { %7209 = vmatmul.mubr.f32.gmra.mrb[108].mxu0 %v5917_v2  ;;  %v8017_v2 = vpack.c.bf16 %v5940_v37, %v5939_v19  ;;  %v5969_v37 = vld [vmem:[%s9865_s7 + $0x30] sm:$0xff] }
 0x777   :  { %7211 = vmatprep.mubr.msk.f32.mxu0 %vm8138_vm1, %v8139_v15 }
 0x77a   :  { %7212 = vmatmul.mubr.f32.gmra.mrb[110].mxu0 %v5918_v9 }
 0x77b   :  { %7262 = vmatprep.mubr.msk.f32.mxu0 %vm8138_vm1, %v8139_v15 }
 0x81d   :  { %v2181_v24 = vpop.f32.mrb[92].mxu0 }
 0x81e   :  { %v2205_v25 = vadd.f32 %v2181_v24, %v9122_v59  ;;  %v7154_v26 = vpop.f32.mrb[93].mxu0  ;;  %v2441_v24 = vld [vmem:[%s9866_s6 + $0x10] sm:$0x3] }
 0x81f   :  { %v2537_v26 = vld [vmem:[%s9865_s7 + $0x8] sm:$0x3] }
 0x821   :  { %v2186_v27 = vpop.f32.mrb[94].mxu0 }
 0x822   :  { %v2206_v28 = vadd.f32 %v2186_v27, %v9125_v62  ;;  %v7157_v29 = vpop.f32.mrb[95].mxu0 }
 0x825   :  { %v2191_v31 = vpop.f32.mrb[96].mxu0 }
 0x826   :  { %v2207_v32 = vadd.f32 %v2191_v31, %v9128_v3  ;;  %v7160_v33 = vpop.f32.mrb[97].mxu0 }
 0x829   :  { %v2196_v34 = vpop.f32.mrb[98].mxu0 }
 0x82a   :  { %v2208_v36 = vadd.f32 %v2196_v34, %v9131_v6  ;;  %v7163_v38 = vpop.f32.mrb[99].mxu0 }
 0x82d   :  { %v2201_v35 = vpop.f32.mrb[100].mxu0 }
 0x82e   :  { %v2209_v39 = vadd.f32 %v2201_v35, %v9134_v10  ;;  %v7166_v40 = vpop.f32.mrb[101].mxu0 }
 0x83d   :  { %v2282_v41 = vpop.f32.mrb[102].mxu0 }
 0x83e   :  { %v7201_v42 = vpop.f32.mrb[103].mxu0  ;;  %7219 = vmatmul.mubr.msk.f32.vlgmr.msra.gmra.mrb[110].mxu1 %vm508_vm5, %v2282_v41 }
 0x83f   :  { %7221 = vmatprep.mubr.msk.f32.mxu1 %vm8138_vm1, %v8139_v15  ;;  %v5949_v42 = vld [vmem:[%s9866_s6 + $0x30] sm:$0xff] }
 0x841   :  { %v2287_v43 = vpop.f32.mrb[104].mxu0 }
 0x842   :  { %v7204_v45 = vpop.f32.mrb[105].mxu0  ;;  %7222 = vmatmul.mubr.msk.f32.gmra.mrb[112].mxu1 %vm508_vm5, %v2287_v43  ;;  %v5950_v43 = vld [vmem:[%s9866_s6 + $0x38] sm:$0xff] }
 0x843   :  { %7224 = vmatprep.mubr.msk.f32.mxu1 %vm8138_vm1, %v8139_v15  ;;  %v5951_v45 = vld [vmem:[%s9866_s6 + $0x40] sm:$0x3] }
 0x845   :  { %v2292_v46 = vpop.f32.mrb[106].mxu0 }
 0x846   :  { %v7207_v47 = vpop.f32.mrb[107].mxu0  ;;  %7225 = vmatmul.mubr.msk.f32.gmra.mrb[114].mxu1 %vm508_vm5, %v2292_v46  ;;  %v5962_v46 = vld [vmem:[%s9866_s6 + $0x48] sm:$0xff] }
 0x847   :  { %7227 = vmatprep.mubr.msk.f32.mxu1 %vm8138_vm1, %v8139_v15  ;;  %v5963_v47 = vld [vmem:[%s9866_s6 + $0x50] sm:$0xff] }
 0x849   :  { %v2297_v48 = vpop.f32.mrb[108].mxu0 }
 0x84a   :  { %v7210_v49 = vpop.f32.mrb[109].mxu0  ;;  %7228 = vmatmul.mubr.msk.f32.gmra.mrb[116].mxu1 %vm508_vm5, %v2297_v48  ;;  %v5964_v48 = vld [vmem:[%s9866_s6 + $0x58] sm:$0x3] }
 0x84b   :  { %7230 = vmatprep.mubr.msk.f32.mxu1 %vm8138_vm1, %v8139_v15  ;;  %v5975_v49 = vld [vmem:[%s9866_s6 + $0x60] sm:$0xff] }
 0x84d   :  { %v2302_v50 = vpop.f32.mrb[110].mxu0 }
 0x84e   :  { %7231 = vmatmul.mubr.msk.f32.gmra.mrb[118].mxu1 %vm508_vm5, %v2302_v50  ;;  %v7213_v52 = vpop.f32.mrb[111].mxu0  ;;  %v5976_v50 = vld [vmem:[%s9866_s6 + $0x68] sm:$0xff] }
 0x84f   :  { %7243 = vmatprep.mubr.msk.f32.mxu1 %vm8138_vm1, %v8139_v15  ;;  %v5977_v52 = vld [vmem:[%s9866_s6 + $0x70] sm:$0x3] }
 0x911   :  { %v2393_v53 = vpop.f32.mrb[110].mxu1 }
 0x912   :  { %v2417_v54 = vadd.f32 %v2393_v53, %v2205_v25  ;;  %v7220_v55 = vpop.f32.mrb[111].mxu1  ;;  %v2536_v25 = vld [vmem:[%s9865_s7] sm:$0xff]  ;;  %v5988_v53 = vld [vmem:[%s9866_s6 + $0x78] sm:$0xff] }
 0x913   :  { %v8021_v27 = vpack.c.bf16 %v2537_v26, %v2536_v25  ;;  %v5990_v55 = vld [vmem:[%s9866_s6 + $0x88] sm:$0x3] }
 0x914   :  { %v2429_v59 = vadd.f32 %v5927_v56, %v2417_v54  ;;  %v5989_v54 = vld [vmem:[%s9866_s6 + $0x80] sm:$0xff] }
 0x915   :  { %v2398_v57 = vpop.f32.mrb[112].mxu1 }
 0x916   :  { %v2418_v60 = vadd.f32 %v2398_v57, %v2206_v28  ;;  %v7223_v61 = vpop.f32.mrb[113].mxu1  ;;  %v2434_v1 = vmax.f32 %v2429_v59, 0.0  ;;  %v6002_v57 = vld [vmem:[%s9866_s6 + $0x98] sm:$0xff]  ;;  %v6003_v59 = vld [vmem:[%s9866_s6 + $0xa0] sm:$0x3] }
 0x917   :  { %v6015_v61 = vld [vmem:[%s9866_s6 + $0xb0] sm:$0xff] }
 0x918   :  { %v2430_v62 = vadd.f32 %v5927_v56, %v2418_v60  ;;  %v6014_v60 = vld [vmem:[%s9866_s6 + $0xa8] sm:$0xff] }
 0x919   :  { %v2403_v63 = vpop.f32.mrb[114].mxu1 }
 0x91a   :  { %v2435_v3 = vmax.f32 %v2430_v62, 0.0  ;;  %v2419_v4 = vadd.f32 %v2403_v63, %v2207_v32  ;;  %v7226_v5 = vpop.f32.mrb[115].mxu1  ;;  %v6016_v62 = vld [vmem:[%s9866_s6 + $0xb8] sm:$0x3]  ;;  %v6027_v63 = vld [vmem:[%s9866_s6 + $0xc0] sm:$0xff] }
 0x91b   :  { %v5957_v5 = vld [vmem:[%s9865_s7 + $0x28] sm:$0x3] }
 0x91c   :  { %v9224_v6 = vpack.c.bf16 %v2435_v3, %v2434_v1  ;;  %v2431_v8 = vadd.f32 %v5927_v56, %v2419_v4  ;;  %v6028_v1 = vld [vmem:[%s9866_s6 + $0xc8] sm:$0xff]  ;;  %v6029_v3 = vld [vmem:[%s9866_s6 + $0xd0] sm:$0x3]  ;;  %v5956_v4 = vld [vmem:[%s9865_s7 + $0x20] sm:$0xff] }
 0x91d   :  { %v2408_v7 = vpop.f32.mrb[116].mxu1 }
 0x91e   :  { %v2420_v10 = vadd.f32 %v2408_v7, %v2208_v36  ;;  %v7229_v11 = vpop.f32.mrb[117].mxu1  ;;  %8006 = vmatpush3.bf16.msra.mxu1 %v9224_v6  ;;  %8012 = vmatpush3.bf16.msra.mxu0 %v9224_v6  ;;  %v2436_v14 = vmax.f32 %v2431_v8, 0.0  ;;  %v6040_v7 = vld [vmem:[%s9866_s6 + $0xd8] sm:$0xff]  ;;  %v6041_v8 = vld [vmem:[%s9866_s6 + $0xe0] sm:$0xff] }
 0x91f   :  { %8007 = vmatprep.subr.bf16.mxu1 %v8137_v0  ;;  %8013 = vmatprep.subr.bf16.mxu0 %v8137_v0 }
 0x920   :  { %v2432_v12 = vadd.f32 %v5927_v56, %v2420_v10  ;;  %v6042_v10 = vld [vmem:[%s9866_s6 + $0xe8] sm:$0x3] }
 0x921   :  { %v2413_v13 = vpop.f32.mrb[118].mxu1 }
 0x922   :  { %v2437_v16 = vmax.f32 %v2432_v12, 0.0  ;;  %v2421_v17 = vadd.f32 %v2413_v13, %v2209_v39  ;;  %v7232_v23 = vpop.f32.mrb[119].mxu1 }
 0x924   :  { %v9230_v18 = vpack.c.bf16 %v2437_v16, %v2436_v14  ;;  %v2433_v30 = vadd.f32 %v5927_v56, %v2421_v17  ;;  %v6001_v56 = vld [vmem:[%s9866_s6 + $0x90] sm:$0xff] }
 0x926   :  { %8009 = vmatpush3.bf16.msra.mxu1 %v9230_v18  ;;  %8015 = vmatpush3.bf16.msra.mxu0 %v9230_v18  ;;  %v9242_v44 = vmax.f32 %v2433_v30, 0.0 }
 0x927   :  { %7241 = vmatprep.subr.mxu1 %v8139_v15  ;;  %7260 = vmatprep.subr.mxu0 %v8139_v15 }
 0x92a   :  { %7242 = vmatpush3.msk.msra.mxu1 %vm2452_vm6, %v9242_v44  ;;  %7261 = vmatpush3.msk.msra.mxu0 %vm2452_vm6, %v9242_v44 }
 0x92b   :  { %7263 = vmatmul.mubr.msk.f32.vlgmr.msra.gmra.mrb[112].mxu0 %vm2442_vm7, %v5932_v51  ;;  %7244 = vmatmul.mubr.msk.f32.vlgmr.msra.gmra.mrb[120].mxu1 %vm2442_vm7, %v2439_v58 }
 0x92c   :  { %7265 = vmatprep.mubr.msk.f32.mxu0 %vm8138_vm1, %v8139_v15  ;;  %7246 = vmatprep.mubr.msk.f32.mxu1 %vm8138_vm1, %v8139_v15 }
 0x92d   :  { %8016 = vmatprep.subr.bf16.mxu1 %v8137_v0  ;;  %8020 = vmatprep.subr.bf16.mxu0 %v8137_v0 }
 0x92e   :  { %8019 = vmatpush3.bf16.msk.msra.mxu1 %vm9258_vm9, %v8017_v2  ;;  %8023 = vmatpush3.bf16.msk.msra.mxu0 %vm9258_vm9, %v8021_v27 }
 0x92f   :  { %7266 = vmatmul.mubr.msk.f32.gmra.mrb[114].mxu0 %vm2442_vm7, %v5933_v20  ;;  %7247 = vmatmul.mubr.msk.f32.gmra.mrb[122].mxu1 %vm2442_vm7, %v2440_v21 }
 0x930   :  { %7268 = vmatprep.mubr.msk.f32.mxu0 %vm8138_vm1, %v8139_v15  ;;  %7249 = vmatprep.mubr.msk.f32.mxu1 %vm8138_vm1, %v8139_v15 }
 0x931   :  { %8024 = vmatprep.subr.bf16.mxu1 %v8137_v0  ;;  %8030 = vmatprep.subr.bf16.mxu0 %v8137_v0 }
 0x933   :  { %7269 = vmatmul.mubr.msk.f32.gmra.mrb[116].mxu0 %vm2442_vm7, %v5934_v22  ;;  %7250 = vmatmul.mubr.msk.f32.gmra.mrb[124].mxu1 %vm2442_vm7, %v2441_v24 }
 0x934   :  { %7275 = vmatprep.mubr.msk.f32.mxu1 %vm8138_vm1, %v8139_v15  ;;  %7288 = vmatprep.mubr.msk.f32.mxu0 %vm8138_vm1, %v8139_v15 }
 0x9fe   :  { %v2617_v28 = vpop.f32.mrb[112].mxu0  ;;  %v2522_v29 = vpop.f32.mrb[120].mxu1 }
 0x9ff   :  { %7276 = vmatmul.mubr.msk.f32.vlgmr.msra.gmra.mrb[126].mxu1 %vm2634_vm10, %v2617_v28  ;;  %v7264_v31 = vpop.f32.mrb[113].mxu0  ;;  %7289 = vmatmul.mubr.msk.f32.vlgmr.msra.gmra.mrb[118].mxu0 %vm2634_vm10, %v2522_v29  ;;  %v7245_v32 = vpop.f32.mrb[121].mxu1  ;;  %v5982_v28 = vld [vmem:[%s9865_s7 + $0x40] sm:$0xff]  ;;  %v5983_v29 = vld [vmem:[%s9865_s7 + $0x48] sm:$0x3] }
 0xa00   :  { %8026 = vmatpush3.bf16.msra.mxu1 %v9224_v6  ;;  %7278 = vmatprep.mubr.msk.f32.mxu1 %vm8138_vm1, %v8139_v15 }
 0xa01   :  { %8027 = vmatprep.subr.bf16.mxu1 %v8137_v0  ;;  %7291 = vmatprep.mubr.msk.f32.mxu0 %vm8138_vm1, %v8139_v15 }
 0xa02   :  { %v2622_v33 = vpop.f32.mrb[114].mxu0  ;;  %v2527_v34 = vpop.f32.mrb[122].mxu1 }
 0xa03   :  { %7279 = vmatmul.mubr.msk.f32.gmra.mrb[128].mxu1 %vm2634_vm10, %v2622_v33  ;;  %v7267_v36 = vpop.f32.mrb[115].mxu0  ;;  %7292 = vmatmul.mubr.msk.f32.gmra.mrb[120].mxu0 %vm2634_vm10, %v2527_v34  ;;  %v7248_v38 = vpop.f32.mrb[123].mxu1  ;;  %v8051_v33 = vpack.c.bf16 %v5983_v29, %v5982_v28 }
 0xa04   :  { %8029 = vmatpush3.bf16.msra.mxu1 %v9230_v18  ;;  %7281 = vmatprep.mubr.msk.f32.mxu1 %vm8138_vm1, %v8139_v15 }
 0xa05   :  { %7305 = vmatprep.subr.mxu1 %v8139_v15  ;;  %7294 = vmatprep.mubr.msk.f32.mxu0 %vm8138_vm1, %v8139_v15 }
 0xa06   :  { %v2627_v35 = vpop.f32.mrb[116].mxu0  ;;  %v2532_v39 = vpop.f32.mrb[124].mxu1 }
 0xa07   :  { %7282 = vmatmul.mubr.msk.f32.gmra.mrb[130].mxu1 %vm2634_vm10, %v2627_v35  ;;  %v7270_v40 = vpop.f32.mrb[117].mxu0  ;;  %7295 = vmatmul.mubr.msk.f32.gmra.mrb[122].mxu0 %vm2634_vm10, %v2532_v39  ;;  %v7251_v41 = vpop.f32.mrb[125].mxu1  ;;  %v5995_v39 = vld [vmem:[%s9865_s7 + $0x50] sm:$0xff] }
 0xa08   :  { %7306 = vmatpush3.msk.msra.mxu1 %vm2452_vm6, %v9242_v44  ;;  %7307 = vmatprep.mubr.msk.f32.mxu1 %vm8138_vm1, %v8139_v15  ;;  %v5996_v40 = vld [vmem:[%s9865_s7 + $0x58] sm:$0x3] }
 0xa09   :  { %8034 = vmatprep.subr.bf16.mxu1 %v8137_v0  ;;  %7320 = vmatprep.mubr.msk.f32.mxu0 %vm8138_vm1, %v8139_v15 }
 0xa0b   :  { %7308 = vmatmul.mubr.msk.f32.vlgmr.msra.gmra.mrb[132].mxu1 %vm2442_vm7, %v5949_v42 }
 0xa0c   :  { %8036 = vmatpush3.bf16.msra.mxu1 %v9224_v6  ;;  %7310 = vmatprep.mubr.msk.f32.mxu1 %vm8138_vm1, %v8139_v15 }
 0xa0d   :  { %8037 = vmatprep.subr.bf16.mxu1 %v8137_v0 }
 0xa0f   :  { %7311 = vmatmul.mubr.msk.f32.gmra.mrb[134].mxu1 %vm2442_vm7, %v5950_v43  ;;  %v8061_v43 = vpack.c.bf16 %v5996_v40, %v5995_v39 }
 0xa10   :  { %8039 = vmatpush3.bf16.msra.mxu1 %v9230_v18  ;;  %7313 = vmatprep.mubr.msk.f32.mxu1 %vm8138_vm1, %v8139_v15 }
 0xa11   :  { %7337 = vmatprep.subr.mxu1 %v8139_v15 }
 0xa13   :  { %7314 = vmatmul.mubr.msk.f32.gmra.mrb[136].mxu1 %vm2442_vm7, %v5951_v45 }
 0xa14   :  { %7338 = vmatpush3.msk.msra.mxu1 %vm2452_vm6, %v9242_v44  ;;  %7339 = vmatprep.mubr.msk.f32.mxu1 %vm8138_vm1, %v8139_v15 }
 0xa15   :  { %8044 = vmatprep.subr.bf16.mxu1 %v8137_v0 }
 0xa17   :  { %7340 = vmatmul.mubr.msk.f32.vlgmr.msra.gmra.mrb[138].mxu1 %vm2442_vm7, %v5962_v46 }
 0xa18   :  { %8046 = vmatpush3.bf16.msra.mxu1 %v9224_v6  ;;  %7342 = vmatprep.mubr.msk.f32.mxu1 %vm8138_vm1, %v8139_v15 }
 0xa19   :  { %8047 = vmatprep.subr.bf16.mxu1 %v8137_v0 }
 0xa1b   :  { %7343 = vmatmul.mubr.msk.f32.gmra.mrb[140].mxu1 %vm2442_vm7, %v5963_v47 }
 0xa1c   :  { %8049 = vmatpush3.bf16.msra.mxu1 %v9230_v18  ;;  %7345 = vmatprep.mubr.msk.f32.mxu1 %vm8138_vm1, %v8139_v15 }
 0xa1d   :  { %7369 = vmatprep.subr.mxu1 %v8139_v15 }
 0xa1f   :  { %7346 = vmatmul.mubr.msk.f32.gmra.mrb[142].mxu1 %vm2442_vm7, %v5964_v48 }
 0xa20   :  { %7370 = vmatpush3.msk.msra.mxu1 %vm2452_vm6, %v9242_v44  ;;  %7371 = vmatprep.mubr.msk.f32.mxu1 %vm8138_vm1, %v8139_v15 }
 0xa21   :  { %8054 = vmatprep.subr.bf16.mxu1 %v8137_v0 }
 0xa23   :  { %7372 = vmatmul.mubr.msk.f32.vlgmr.msra.gmra.mrb[144].mxu1 %vm2442_vm7, %v5975_v49  ;;  %v6008_v49 = vld [vmem:[%s9865_s7 + $0x60] sm:$0xff] }
 0xa24   :  { %8056 = vmatpush3.bf16.msra.mxu1 %v9224_v6  ;;  %7374 = vmatprep.mubr.msk.f32.mxu1 %vm8138_vm1, %v8139_v15 }
 0xa25   :  { %8057 = vmatprep.subr.bf16.mxu1 %v8137_v0 }
 0xa27   :  { %7375 = vmatmul.mubr.msk.f32.gmra.mrb[146].mxu1 %vm2442_vm7, %v5976_v50  ;;  %v6009_v50 = vld [vmem:[%s9865_s7 + $0x68] sm:$0x3] }
 0xa28   :  { %8059 = vmatpush3.bf16.msra.mxu1 %v9230_v18  ;;  %7377 = vmatprep.mubr.msk.f32.mxu1 %vm8138_vm1, %v8139_v15 }
 0xa29   :  { %7401 = vmatprep.subr.mxu1 %v8139_v15 }
 0xa2b   :  { %7378 = vmatmul.mubr.msk.f32.gmra.mrb[148].mxu1 %vm2442_vm7, %v5977_v52 }
 0xa2c   :  { %7402 = vmatpush3.msk.msra.mxu1 %vm2452_vm6, %v9242_v44  ;;  %7403 = vmatprep.mubr.msk.f32.mxu1 %vm8138_vm1, %v8139_v15 }
 0xa2d   :  { %8064 = vmatprep.subr.bf16.mxu1 %v8137_v0 }
 0xa2f   :  { %7404 = vmatmul.mubr.msk.f32.vlgmr.msra.gmra.mrb[150].mxu1 %vm2442_vm7, %v5988_v53 }
 0xa30   :  { %8066 = vmatpush3.bf16.msra.mxu1 %v9224_v6  ;;  %7406 = vmatprep.mubr.msk.f32.mxu1 %vm8138_vm1, %v8139_v15 }
 0xa31   :  { %8067 = vmatprep.subr.bf16.mxu1 %v8137_v0 }
 0xa33   :  { %7407 = vmatmul.mubr.msk.f32.gmra.mrb[152].mxu1 %vm2442_vm7, %v5989_v54  ;;  %v8071_v54 = vpack.c.bf16 %v6009_v50, %v6008_v49 }
 0xa34   :  { %8069 = vmatpush3.bf16.msra.mxu1 %v9230_v18  ;;  %7409 = vmatprep.mubr.msk.f32.mxu1 %vm8138_vm1, %v8139_v15 }
 0xa35   :  { %7433 = vmatprep.subr.mxu1 %v8139_v15 }
 0xa37   :  { %7410 = vmatmul.mubr.msk.f32.gmra.mrb[154].mxu1 %vm2442_vm7, %v5990_v55 }
 0xa38   :  { %7434 = vmatpush3.msk.msra.mxu1 %vm2452_vm6, %v9242_v44  ;;  %7435 = vmatprep.mubr.msk.f32.mxu1 %vm8138_vm1, %v8139_v15 }
 0xa39   :  { %8074 = vmatprep.subr.bf16.mxu1 %v8137_v0 }
 0xa3b   :  { %7436 = vmatmul.mubr.msk.f32.vlgmr.msra.gmra.mrb[156].mxu1 %vm2442_vm7, %v6001_v56 }
 0xa3c   :  { %8076 = vmatpush3.bf16.msra.mxu1 %v9224_v6  ;;  %7438 = vmatprep.mubr.msk.f32.mxu1 %vm8138_vm1, %v8139_v15 }
 0xa3d   :  { %8077 = vmatprep.subr.bf16.mxu1 %v8137_v0 }
 0xa3f   :  { %7439 = vmatmul.mubr.msk.f32.gmra.mrb[158].mxu1 %vm2442_vm7, %v6002_v57 }
 0xa40   :  { %8079 = vmatpush3.bf16.msra.mxu1 %v9230_v18  ;;  %7441 = vmatprep.mubr.msk.f32.mxu1 %vm8138_vm1, %v8139_v15 }
 0xa41   :  { %7465 = vmatprep.subr.mxu1 %v8139_v15 }
 0xa43   :  { %7442 = vmatmul.mubr.msk.f32.gmra.mrb[160].mxu1 %vm2442_vm7, %v6003_v59 }
 0xa44   :  { %7466 = vmatpush3.msk.msra.mxu1 %vm2452_vm6, %v9242_v44  ;;  %7467 = vmatprep.mubr.msk.f32.mxu1 %vm8138_vm1, %v8139_v15 }
 0xa45   :  { %8084 = vmatprep.subr.bf16.mxu1 %v8137_v0 }
 0xa47   :  { %7468 = vmatmul.mubr.msk.f32.vlgmr.msra.gmra.mrb[162].mxu1 %vm2442_vm7, %v6014_v60  ;;  %v6021_v60 = vld [vmem:[%s9865_s7 + $0x70] sm:$0xff] }
 0xa48   :  { %8086 = vmatpush3.bf16.msra.mxu1 %v9224_v6  ;;  %7470 = vmatprep.mubr.msk.f32.mxu1 %vm8138_vm1, %v8139_v15 }
 0xa49   :  { %8087 = vmatprep.subr.bf16.mxu1 %v8137_v0 }
 0xa4b   :  { %7471 = vmatmul.mubr.msk.f32.gmra.mrb[164].mxu1 %vm2442_vm7, %v6015_v61  ;;  %v6022_v61 = vld [vmem:[%s9865_s7 + $0x78] sm:$0x3] }
 0xa4c   :  { %8089 = vmatpush3.bf16.msra.mxu1 %v9230_v18  ;;  %7473 = vmatprep.mubr.msk.f32.mxu1 %vm8138_vm1, %v8139_v15 }
 0xa4d   :  { %7497 = vmatprep.subr.mxu1 %v8139_v15 }
 0xa4f   :  { %7474 = vmatmul.mubr.msk.f32.gmra.mrb[166].mxu1 %vm2442_vm7, %v6016_v62 }
 0xa50   :  { %7498 = vmatpush3.msk.msra.mxu1 %vm2452_vm6, %v9242_v44  ;;  %7499 = vmatprep.mubr.msk.f32.mxu1 %vm8138_vm1, %v8139_v15 }
 0xa51   :  { %8094 = vmatprep.subr.bf16.mxu1 %v8137_v0 }
 0xa53   :  { %7500 = vmatmul.mubr.msk.f32.vlgmr.msra.gmra.mrb[168].mxu1 %vm2442_vm7, %v6027_v63 }
 0xa54   :  { %8096 = vmatpush3.bf16.msra.mxu1 %v9224_v6  ;;  %7502 = vmatprep.mubr.msk.f32.mxu1 %vm8138_vm1, %v8139_v15  ;;  %v8031_v6 = vpack.c.bf16 %v5957_v5, %v5956_v4 }
 0xa55   :  { %8097 = vmatprep.subr.bf16.mxu1 %v8137_v0 }
 0xa56   :  { %8033 = vmatpush3.bf16.msk.msra.mxu0 %vm9258_vm9, %v8031_v6 }
 0xa57   :  { %7503 = vmatmul.mubr.msk.f32.gmra.mrb[170].mxu1 %vm2442_vm7, %v6028_v1  ;;  %8040 = vmatprep.subr.bf16.mxu0 %v8137_v0  ;;  %v8081_v1 = vpack.c.bf16 %v6022_v61, %v6021_v60 }
 0xa58   :  { %8099 = vmatpush3.bf16.msra.mxu1 %v9230_v18  ;;  %7505 = vmatprep.mubr.msk.f32.mxu1 %vm8138_vm1, %v8139_v15 }
 0xa59   :  { %7529 = vmatprep.subr.mxu1 %v8139_v15 }
 0xa5b   :  { %7506 = vmatmul.mubr.msk.f32.gmra.mrb[172].mxu1 %vm2442_vm7, %v6029_v3 }
 0xa5c   :  { %7530 = vmatpush3.msk.msra.mxu1 %vm2452_vm6, %v9242_v44  ;;  %7531 = vmatprep.mubr.msk.f32.mxu1 %vm8138_vm1, %v8139_v15  ;;  %v5970_v44 = vld [vmem:[%s9865_s7 + $0x38] sm:$0x3] }
 0xa5d   :  { %8104 = vmatprep.subr.bf16.mxu1 %v8137_v0  ;;  %v8041_v22 = vpack.c.bf16 %v5970_v44, %v5969_v37 }
 0xa5f   :  { %7532 = vmatmul.mubr.msk.f32.vlgmr.msra.gmra.mrb[174].mxu1 %vm2442_vm7, %v6040_v7  ;;  %v6034_v7 = vld [vmem:[%s9865_s7 + $0x80] sm:$0xff] }
 0xa60   :  { %7534 = vmatprep.mubr.msk.f32.mxu1 %vm8138_vm1, %v8139_v15 }
 0xa63   :  { %7535 = vmatmul.mubr.msk.f32.gmra.mrb[176].mxu1 %vm2442_vm7, %v6041_v8  ;;  %v6035_v8 = vld [vmem:[%s9865_s7 + $0x88] sm:$0x3] }
 0xa64   :  { %7537 = vmatprep.mubr.msk.f32.mxu1 %vm8138_vm1, %v8139_v15 }
 0xa67   :  { %7538 = vmatmul.mubr.msk.f32.gmra.mrb[178].mxu1 %vm2442_vm7, %v6042_v10 }
 0xa68   :  { %7559 = vmatprep.mubr.msk.f32.mxu1 %vm8138_vm1, %v8139_v15 }
 0xad2   :  { %v2714_v11 = vpop.f32.mrb[126].mxu1  ;;  %v2806_v12 = vpop.f32.mrb[118].mxu0 }
 0xad3   :  { %v7277_v13 = vpop.f32.mrb[127].mxu1  ;;  %v9531_v14 = vadd.f32 %v2806_v12, %v2714_v11  ;;  %v7290_v16 = vpop.f32.mrb[119].mxu0  ;;  %v8091_v12 = vpack.c.bf16 %v6035_v8, %v6034_v7 }
 0xad6   :  { %v2719_v17 = vpop.f32.mrb[128].mxu1  ;;  %v2811_v23 = vpop.f32.mrb[120].mxu0 }
 0xad7   :  { %v7280_v18 = vpop.f32.mrb[129].mxu1  ;;  %v9533_v30 = vadd.f32 %v2811_v23, %v2719_v17  ;;  %v7293_v19 = vpop.f32.mrb[121].mxu0 }
 0xad8   :  { %v6047_v18 = vld [vmem:[%s9865_s7 + $0x90] sm:$0xff]  ;;  %v6048_v19 = vld [vmem:[%s9865_s7 + $0x98] sm:$0x3] }
 0xada   :  { %v2724_v51 = vpop.f32.mrb[130].mxu1  ;;  %v2816_v58 = vpop.f32.mrb[122].mxu0 }
 0xadb   :  { %v7283_v2 = vpop.f32.mrb[131].mxu1  ;;  %v9541_v20 = vadd.f32 %v2816_v58, %v2724_v51  ;;  %v7296_v21 = vpop.f32.mrb[123].mxu0  ;;  %v8101_v51 = vpack.c.bf16 %v6048_v19, %v6047_v18 }
 0xade   :  { %v2899_v24 = vpop.f32.mrb[132].mxu1 }
 0xadf   :  { %7321 = vmatmul.mubr.msk.f32.vlgmr.msra.gmra.mrb[124].mxu0 %vm2634_vm10, %v2899_v24  ;;  %v7309_v25 = vpop.f32.mrb[133].mxu1 }
 0xae0   :  { %7323 = vmatprep.mubr.msk.f32.mxu0 %vm8138_vm1, %v8139_v15  ;;  %8043 = vmatpush3.bf16.msk.msra.mxu0 %vm9258_vm9, %v8041_v22 }
 0xae1   :  { %8050 = vmatprep.subr.bf16.mxu0 %v8137_v0 }
 0xae2   :  { %v2904_v26 = vpop.f32.mrb[134].mxu1 }
 0xae3   :  { %7324 = vmatmul.mubr.msk.f32.gmra.mrb[126].mxu0 %vm2634_vm10, %v2904_v26  ;;  %v7312_v27 = vpop.f32.mrb[135].mxu1 }
 0xae4   :  { %7326 = vmatprep.mubr.msk.f32.mxu0 %vm8138_vm1, %v8139_v15 }
 0xae6   :  { %v2909_v31 = vpop.f32.mrb[136].mxu1 }
 0xae7   :  { %7327 = vmatmul.mubr.msk.f32.gmra.mrb[128].mxu0 %vm2634_vm10, %v2909_v31  ;;  %v7315_v32 = vpop.f32.mrb[137].mxu1 }
 0xae8   :  { %7352 = vmatprep.mubr.msk.f32.mxu0 %vm8138_vm1, %v8139_v15 }
 0xaea   :  { %v3090_v34 = vpop.f32.mrb[138].mxu1 }
 0xaeb   :  { %7353 = vmatmul.mubr.msk.f32.vlgmr.msra.gmra.mrb[130].mxu0 %vm2634_vm10, %v3090_v34  ;;  %v7341_v36 = vpop.f32.mrb[139].mxu1 }
 0xaec   :  { %7355 = vmatprep.mubr.msk.f32.mxu0 %vm8138_vm1, %v8139_v15  ;;  %8053 = vmatpush3.bf16.msk.msra.mxu0 %vm9258_vm9, %v8051_v33 }
 0xaed   :  { %8060 = vmatprep.subr.bf16.mxu0 %v8137_v0 }
 0xaee   :  { %v3095_v38 = vpop.f32.mrb[140].mxu1 }
 0xaef   :  { %7356 = vmatmul.mubr.msk.f32.gmra.mrb[132].mxu0 %vm2634_vm10, %v3095_v38  ;;  %v7344_v35 = vpop.f32.mrb[141].mxu1 }
 0xaf0   :  { %7358 = vmatprep.mubr.msk.f32.mxu0 %vm8138_vm1, %v8139_v15 }
 0xaf2   :  { %v3100_v41 = vpop.f32.mrb[142].mxu1 }
 0xaf3   :  { %7359 = vmatmul.mubr.msk.f32.gmra.mrb[134].mxu0 %vm2634_vm10, %v3100_v41  ;;  %v7347_v42 = vpop.f32.mrb[143].mxu1 }
 0xaf4   :  { %7384 = vmatprep.mubr.msk.f32.mxu0 %vm8138_vm1, %v8139_v15 }
 0xaf6   :  { %v3281_v45 = vpop.f32.mrb[144].mxu1 }
 0xaf7   :  { %7385 = vmatmul.mubr.msk.f32.vlgmr.msra.gmra.mrb[136].mxu0 %vm2634_vm10, %v3281_v45  ;;  %v7373_v46 = vpop.f32.mrb[145].mxu1 }
 0xaf8   :  { %7387 = vmatprep.mubr.msk.f32.mxu0 %vm8138_vm1, %v8139_v15  ;;  %8063 = vmatpush3.bf16.msk.msra.mxu0 %vm9258_vm9, %v8061_v43 }
 0xaf9   :  { %8070 = vmatprep.subr.bf16.mxu0 %v8137_v0 }
 0xafa   :  { %v3286_v47 = vpop.f32.mrb[146].mxu1 }
 0xafb   :  { %7388 = vmatmul.mubr.msk.f32.gmra.mrb[138].mxu0 %vm2634_vm10, %v3286_v47  ;;  %v7376_v48 = vpop.f32.mrb[147].mxu1 }
 0xafc   :  { %7390 = vmatprep.mubr.msk.f32.mxu0 %vm8138_vm1, %v8139_v15 }
 0xafe   :  { %v3291_v52 = vpop.f32.mrb[148].mxu1 }
 0xaff   :  { %7391 = vmatmul.mubr.msk.f32.gmra.mrb[140].mxu0 %vm2634_vm10, %v3291_v52  ;;  %v7379_v53 = vpop.f32.mrb[149].mxu1 }
 0xb00   :  { %7416 = vmatprep.mubr.msk.f32.mxu0 %vm8138_vm1, %v8139_v15 }
 0xb02   :  { %v3472_v55 = vpop.f32.mrb[150].mxu1 }
 0xb03   :  { %7417 = vmatmul.mubr.msk.f32.vlgmr.msra.gmra.mrb[142].mxu0 %vm2634_vm10, %v3472_v55  ;;  %v7405_v56 = vpop.f32.mrb[151].mxu1 }
 0xb04   :  { %7419 = vmatprep.mubr.msk.f32.mxu0 %vm8138_vm1, %v8139_v15  ;;  %8073 = vmatpush3.bf16.msk.msra.mxu0 %vm9258_vm9, %v8071_v54 }
 0xb05   :  { %8080 = vmatprep.subr.bf16.mxu0 %v8137_v0 }
 0xb06   :  { %v3477_v57 = vpop.f32.mrb[152].mxu1 }
 0xb07   :  { %7420 = vmatmul.mubr.msk.f32.gmra.mrb[144].mxu0 %vm2634_vm10, %v3477_v57  ;;  %v7408_v59 = vpop.f32.mrb[153].mxu1 }
 0xb08   :  { %7422 = vmatprep.mubr.msk.f32.mxu0 %vm8138_vm1, %v8139_v15 }
 0xb0a   :  { %v3482_v62 = vpop.f32.mrb[154].mxu1 }
 0xb0b   :  { %7423 = vmatmul.mubr.msk.f32.gmra.mrb[146].mxu0 %vm2634_vm10, %v3482_v62  ;;  %v7411_v63 = vpop.f32.mrb[155].mxu1 }
 0xb0c   :  { %7448 = vmatprep.mubr.msk.f32.mxu0 %vm8138_vm1, %v8139_v15 }
 0xb0e   :  { %v3663_v3 = vpop.f32.mrb[156].mxu1 }
 0xb0f   :  { %7449 = vmatmul.mubr.msk.f32.vlgmr.msra.gmra.mrb[148].mxu0 %vm2634_vm10, %v3663_v3  ;;  %v7437_v4 = vpop.f32.mrb[157].mxu1 }
 0xb10   :  { %7451 = vmatprep.mubr.msk.f32.mxu0 %vm8138_vm1, %v8139_v15  ;;  %8083 = vmatpush3.bf16.msk.msra.mxu0 %vm9258_vm9, %v8081_v1 }
 0xb11   :  { %8090 = vmatprep.subr.bf16.mxu0 %v8137_v0 }
 0xb12   :  { %v3668_v5 = vpop.f32.mrb[158].mxu1 }
 0xb13   :  { %7452 = vmatmul.mubr.msk.f32.gmra.mrb[150].mxu0 %vm2634_vm10, %v3668_v5  ;;  %v7440_v6 = vpop.f32.mrb[159].mxu1 }
 0xb14   :  { %7454 = vmatprep.mubr.msk.f32.mxu0 %vm8138_vm1, %v8139_v15 }
 0xb16   :  { %v3673_v10 = vpop.f32.mrb[160].mxu1 }
 0xb17   :  { %7455 = vmatmul.mubr.msk.f32.gmra.mrb[152].mxu0 %vm2634_vm10, %v3673_v10  ;;  %v7443_v11 = vpop.f32.mrb[161].mxu1 }
 0xb18   :  { %7480 = vmatprep.mubr.msk.f32.mxu0 %vm8138_vm1, %v8139_v15 }
 0xb1a   :  { %v3854_v13 = vpop.f32.mrb[162].mxu1 }
 0xb1b   :  { %7481 = vmatmul.mubr.msk.f32.vlgmr.msra.gmra.mrb[154].mxu0 %vm2634_vm10, %v3854_v13  ;;  %v7469_v16 = vpop.f32.mrb[163].mxu1 }
 0xb1c   :  { %7483 = vmatprep.mubr.msk.f32.mxu0 %vm8138_vm1, %v8139_v15  ;;  %8093 = vmatpush3.bf16.msk.msra.mxu0 %vm9258_vm9, %v8091_v12 }
 0xb1d   :  { %8100 = vmatprep.subr.bf16.mxu0 %v8137_v0 }
 0xb1e   :  { %v3859_v17 = vpop.f32.mrb[164].mxu1 }
 0xb1f   :  { %7484 = vmatmul.mubr.msk.f32.gmra.mrb[156].mxu0 %vm2634_vm10, %v3859_v17  ;;  %v7472_v23 = vpop.f32.mrb[165].mxu1 }
 0xb20   :  { %7486 = vmatprep.mubr.msk.f32.mxu0 %vm8138_vm1, %v8139_v15 }
 0xb22   :  { %v3864_v37 = vpop.f32.mrb[166].mxu1 }
 0xb23   :  { %7487 = vmatmul.mubr.msk.f32.gmra.mrb[158].mxu0 %vm2634_vm10, %v3864_v37  ;;  %v7475_v44 = vpop.f32.mrb[167].mxu1 }
 0xb24   :  { %7512 = vmatprep.mubr.msk.f32.mxu0 %vm8138_vm1, %v8139_v15 }
 0xb26   :  { %v4045_v58 = vpop.f32.mrb[168].mxu1 }
 0xb27   :  { %7513 = vmatmul.mubr.msk.f32.vlgmr.msra.gmra.mrb[160].mxu0 %vm2634_vm10, %v4045_v58  ;;  %v7501_v2 = vpop.f32.mrb[169].mxu1 }
 0xb28   :  { %7515 = vmatprep.mubr.msk.f32.mxu0 %vm8138_vm1, %v8139_v15  ;;  %8103 = vmatpush3.bf16.msk.msra.mxu0 %vm9258_vm9, %v8101_v51 }
 0xb29   :  { %7576 = vmatprep.subr.mxu0 %v8139_v15 }
 0xb2a   :  { %v4050_v21 = vpop.f32.mrb[170].mxu1 }
 0xb2b   :  { %7516 = vmatmul.mubr.msk.f32.gmra.mrb[162].mxu0 %vm2634_vm10, %v4050_v21  ;;  %v7504_v22 = vpop.f32.mrb[171].mxu1 }
 0xb2c   :  { %7518 = vmatprep.mubr.msk.f32.mxu0 %vm8138_vm1, %v8139_v15 }
 0xb2e   :  { %v4055_v24 = vpop.f32.mrb[172].mxu1 }
 0xb2f   :  { %7519 = vmatmul.mubr.msk.f32.gmra.mrb[164].mxu0 %vm2634_vm10, %v4055_v24  ;;  %v7507_v25 = vpop.f32.mrb[173].mxu1 }
 0xb30   :  { %7544 = vmatprep.mubr.msk.f32.mxu0 %vm8138_vm1, %v8139_v15 }
 0xb32   :  { %v4236_v26 = vpop.f32.mrb[174].mxu1 }
 0xb33   :  { %7545 = vmatmul.mubr.msk.f32.vlgmr.msra.gmra.mrb[166].mxu0 %vm2634_vm10, %v4236_v26  ;;  %v7533_v9 = vpop.f32.mrb[175].mxu1 }
 0xb34   :  { %7547 = vmatprep.mubr.msk.f32.mxu0 %vm8138_vm1, %v8139_v15 }
 0xb36   :  { %v4241_v27 = vpop.f32.mrb[176].mxu1 }
 0xb37   :  { %7548 = vmatmul.mubr.msk.f32.gmra.mrb[168].mxu0 %vm2634_vm10, %v4241_v27  ;;  %v7536_v28 = vpop.f32.mrb[177].mxu1 }
 0xb38   :  { %7550 = vmatprep.mubr.msk.f32.mxu0 %vm8138_vm1, %v8139_v15 }
 0xb3a   :  { %v4246_v29 = vpop.f32.mrb[178].mxu1 }
 0xb3b   :  { %7551 = vmatmul.mubr.msk.f32.gmra.mrb[170].mxu0 %vm2634_vm10, %v4246_v29  ;;  %v7539_v31 = vpop.f32.mrb[179].mxu1 }
 0xb3c   :  { %7578 = vmatprep.mubr.msk.f32.mxu0 %vm8138_vm1, %v8139_v15 }
 0xbb2   :  { %v2994_v32 = vpop.f32.mrb[124].mxu0 }
 0xbb3   :  { %v3008_v33 = vadd.f32 %v2994_v32, %v9531_v14  ;;  %v7322_v34 = vpop.f32.mrb[125].mxu0 }
 0xbb6   :  { %v2999_v36 = vpop.f32.mrb[126].mxu0 }
 0xbb7   :  { %v3009_v38 = vadd.f32 %v2999_v36, %v9533_v30  ;;  %v7325_v35 = vpop.f32.mrb[127].mxu0 }
 0xbba   :  { %v3004_v39 = vpop.f32.mrb[128].mxu0 }
 0xbbb   :  { %v3010_v40 = vadd.f32 %v3004_v39, %v9541_v20  ;;  %v7328_v41 = vpop.f32.mrb[129].mxu0 }
 0xbbe   :  { %v3185_v42 = vpop.f32.mrb[130].mxu0 }
 0xbbf   :  { %v3199_v43 = vadd.f32 %v3185_v42, %v3008_v33  ;;  %v7354_v45 = vpop.f32.mrb[131].mxu0 }
 0xbc2   :  { %v3190_v46 = vpop.f32.mrb[132].mxu0 }
 0xbc3   :  { %v3200_v47 = vadd.f32 %v3190_v46, %v3009_v38  ;;  %v7357_v48 = vpop.f32.mrb[133].mxu0  ;;  %v6053_v38 = vld [vmem:[%s9867_s8] ss:$0 sm:$0xff] }
 0xbc6   :  { %v3195_v49 = vpop.f32.mrb[134].mxu0 }
 0xbc7   :  { %v3201_v50 = vadd.f32 %v3195_v49, %v3010_v40  ;;  %v7360_v52 = vpop.f32.mrb[135].mxu0 }
 0xbca   :  { %v3376_v53 = vpop.f32.mrb[136].mxu0 }
 0xbcb   :  { %v3390_v14 = vadd.f32 %v3376_v53, %v3199_v43  ;;  %v7386_v54 = vpop.f32.mrb[137].mxu0  ;;  %v4361_v53 = vld [vmem:[%s9868_s9] sm:$0x3] }
 0xbcc   :  { %v4439_v54 = vld [vmem:[%s9869_s10] sm:$0x1f] }
 0xbcd   :  { %7577 = vmatpush3.msk.msra.mxu0 %vm4521_vm12, %v4439_v54 }
 0xbce   :  { %v3381_v55 = vpop.f32.mrb[138].mxu0  ;;  %7590 = vmatprep.subr.mxu0 %v8139_v15 }
 0xbcf   :  { %v3391_v56 = vadd.f32 %v3381_v55, %v3200_v47  ;;  %v7389_v30 = vpop.f32.mrb[139].mxu0  ;;  %v6059_v55 = vld [vmem:[%s9869_s10 + $0x8] sm:$0x1f] }
 0xbd2   :  { %v3386_v57 = vpop.f32.mrb[140].mxu0 }
 0xbd3   :  { %v3392_v59 = vadd.f32 %v3386_v57, %v3201_v50  ;;  %v7392_v60 = vpop.f32.mrb[141].mxu0 }
 0xbd4   :  { %v6064_v60 = vld [vmem:[%s9868_s9 + $0x4] sm:$0x3] }
 0xbd6   :  { %v3567_v20 = vpop.f32.mrb[142].mxu0 }
 0xbd7   :  { %v3581_v61 = vadd.f32 %v3567_v20, %v3390_v14  ;;  %v7418_v62 = vpop.f32.mrb[143].mxu0  ;;  %v6056_v14 = vld [vmem:[%s9868_s9 + $0x2] sm:$0x3]  ;;  %v6067_v20 = vld [vmem:[%s9869_s10 + $0x10] sm:$0x1f] }
 0xbda   :  { %v3572_v63 = vpop.f32.mrb[144].mxu0 }
 0xbdb   :  { %v3582_v1 = vadd.f32 %v3572_v63, %v3391_v56  ;;  %v7421_v3 = vpop.f32.mrb[145].mxu0 }
 0xbde   :  { %v3577_v4 = vpop.f32.mrb[146].mxu0 }
 0xbdf   :  { %v3583_v5 = vadd.f32 %v3577_v4, %v3392_v59  ;;  %v7424_v6 = vpop.f32.mrb[147].mxu0 }
 0xbe0   :  { %v6070_v6 = vld [vmem:[%s9868_s9 + $0x6] sm:$0x3] }
 0xbe2   :  { %v3758_v7 = vpop.f32.mrb[148].mxu0 }
 0xbe3   :  { %v3772_v8 = vadd.f32 %v3758_v7, %v3581_v61  ;;  %v7450_v10 = vpop.f32.mrb[149].mxu0  ;;  %v6073_v7 = vld [vmem:[%s9869_s10 + $0x18] sm:$0x1f] }
 0xbe6   :  { %v3763_v11 = vpop.f32.mrb[150].mxu0 }
 0xbe7   :  { %v3773_v12 = vadd.f32 %v3763_v11, %v3582_v1  ;;  %v7453_v13 = vpop.f32.mrb[151].mxu0 }
 0xbea   :  { %v3768_v16 = vpop.f32.mrb[152].mxu0 }
 0xbeb   :  { %v3774_v17 = vadd.f32 %v3768_v16, %v3583_v5  ;;  %v7456_v23 = vpop.f32.mrb[153].mxu0  ;;  %v6076_v16 = vld [vmem:[%s9868_s9 + $0x8] sm:$0x3] }
 0xbee   :  { %v3949_v18 = vpop.f32.mrb[154].mxu0 }
 0xbef   :  { %v3963_v19 = vadd.f32 %v3949_v18, %v3772_v8  ;;  %v7482_v37 = vpop.f32.mrb[155].mxu0 }
 0xbf2   :  { %v3954_v44 = vpop.f32.mrb[156].mxu0 }
 0xbf3   :  { %v3964_v51 = vadd.f32 %v3954_v44, %v3773_v12  ;;  %v7485_v58 = vpop.f32.mrb[157].mxu0 }
 0xbf4   :  { %v6085_v58 = vld [vmem:[%s9869_s10 + $0x28] sm:$0x1f] }
 0xbf6   :  { %v3959_v2 = vpop.f32.mrb[158].mxu0 }
 0xbf7   :  { %v3965_v21 = vadd.f32 %v3959_v2, %v3774_v17  ;;  %v7488_v22 = vpop.f32.mrb[159].mxu0  ;;  %v6079_v17 = vld [vmem:[%s9869_s10 + $0x20] sm:$0x1f] }
 0xbfa   :  { %v4140_v24 = vpop.f32.mrb[160].mxu0 }
 0xbfb   :  { %v4154_v25 = vadd.f32 %v4140_v24, %v3963_v19  ;;  %v7514_v26 = vpop.f32.mrb[161].mxu0 }
 0xbfc   :  { %v6088_v26 = vld [vmem:[%s9868_s9 + $0xc] sm:$0x3] }
 0xbfe   :  { %v4145_v9 = vpop.f32.mrb[162].mxu0 }
 0xbff   :  { %v4155_v27 = vadd.f32 %v4145_v9, %v3964_v51  ;;  %v7517_v28 = vpop.f32.mrb[163].mxu0  ;;  %v6082_v51 = vld [vmem:[%s9868_s9 + $0xa] sm:$0x3]  ;;  %v6091_v9 = vld [vmem:[%s9869_s10 + $0x30] sm:$0x1f] }
 0xc02   :  { %v4150_v29 = vpop.f32.mrb[164].mxu0 }
 0xc03   :  { %v4156_v31 = vadd.f32 %v4150_v29, %v3965_v21  ;;  %v7520_v32 = vpop.f32.mrb[165].mxu0 }
 0xc06   :  { %v4331_v33 = vpop.f32.mrb[166].mxu0 }
 0xc07   :  { %v4345_v34 = vadd.f32 %v4331_v33, %v4154_v25  ;;  %v7546_v36 = vpop.f32.mrb[167].mxu0  ;;  %v6094_v33 = vld [vmem:[%s9868_s9 + $0xe] sm:$0x3] }
 0xc09   :  { %v4355_v39 = vadd.f32 %v6053_v38, %v4345_v34  ;;  %v6097_v34 = vld [vmem:[%s9869_s10 + $0x38] sm:$0x1f] }
 0xc0a   :  { %v4336_v35 = vpop.f32.mrb[168].mxu0 }
 0xc0b   :  { %v4346_v40 = vadd.f32 %v4336_v35, %v4155_v27  ;;  %v7549_v41 = vpop.f32.mrb[169].mxu0  ;;  %v4358_v45 = vmax.f32 %v4355_v39, 0.0 }
 0xc0c   :  { %v6100_v41 = vld [vmem:[%s9868_s9 + $0x10] sm:$0x3] }
 0xc0d   :  { %v4356_v42 = vadd.f32 %v6053_v38, %v4346_v40 }
 0xc0e   :  { %v4341_v43 = vpop.f32.mrb[170].mxu0 }
 0xc0f   :  { %v4359_v46 = vmax.f32 %v4356_v42, 0.0  ;;  %v4347_v47 = vadd.f32 %v4341_v43, %v4156_v31  ;;  %v7552_v48 = vpop.f32.mrb[171].mxu0 }
 0xc11   :  { %v9678_v49 = vpack.c.bf16 %v4359_v46, %v4358_v45  ;;  %v4357_v50 = vadd.f32 %v6053_v38, %v4347_v47  ;;  %v19_v47 = vstv %s9870_s13 }
 0xc12   :  { %20 = vst [vmem:[#allocation2] sm:$0x1] %v19_v47 }
 0xc13   :  { %8106 = vmatpush3.bf16.msra.mxu1 %v9678_v49  ;;  %v9682_v52 = vmax.f32 %v4357_v50, 0.0 }
 0xc14   :  { %7557 = vmatprep.subr.mxu1 %v8139_v15 }
 0xc17   :  { %7558 = vmatpush3.msk.msra.mxu1 %vm2644_vm8, %v9682_v52 }
 0xc18   :  { %8107 = vmatprep.subr.bf16.mxu1 %v8137_v0  ;;  %7560 = vmatmul.mubr.msk.f32.vlgmr.msra.gmra.mrb[180].mxu1 %vm4362_vm11, %v4361_v53  ;;  %v6107_v53 = vld [vmem:[%s9872_s12] ss:$0 sm:$0xff] }
 0xc19   :  { %8109 = vmatpush3.bf16.msra.mxu1 %v9678_v49  ;;  %7568 = vmatprep.mubr.msk.f32.mxu1 %vm8138_vm1, %v8139_v15 }
 0xc1a   :  { %7566 = vmatprep.subr.mxu1 %v8139_v15 }
 0xc1d   :  { %7567 = vmatpush3.msk.msra.mxu1 %vm2644_vm8, %v9682_v52 }
 0xc1e   :  { %7569 = vmatmul.mubr.msk.f32.vlgmr.msra.gmra.mrb[182].mxu1 %vm4362_vm11, %v6056_v14  ;;  %7571 = vmatprep.subr.mxu1 %v8139_v15 }
 0xc1f   :  { %7573 = vmatprep.mubr.msk.f32.mxu1 %vm8138_vm1, %v8139_v15  ;;  %7572 = vmatpush3.msk.msra.mxu1 %vm4521_vm12, %v6059_v55 }
 0xc20   :  { %8110 = vmatprep.subr.bf16.mxu1 %v8137_v0 }
 0xceb   :  { %v4435_v56 = vpop.f32.mrb[180].mxu1 }
 0xcec   :  { %v7561_v30 = vpop.f32.mrb[181].mxu1  ;;  %7579 = vmatmul.mubr.msk.f32.vlgmr.msra.gmra.mrb[172].mxu0 %vm4517_vm13, %v4435_v56  ;;  %v6108_v56 = vld [vmem:[#allocation2] ss:$0 sm:$0xff] }
 0xced   :  { %7592 = vmatprep.mubr.msk.f32.mxu0 %vm8138_vm1, %v8139_v15  ;;  %7591 = vmatpush3.msk.msra.mxu0 %vm4521_vm12, %v6067_v20 }
 0xcee   :  { %8113 = vmatprep.subr.bf16.mxu0 %v8137_v0 }
 0xcf1   :  { %v4511_v57 = vpop.f32.mrb[182].mxu1 }
 0xcf2   :  { %7574 = vmatmul.mubr.msk.f32.vlgmr.msra.gmra.mrb[184].mxu1 %vm4517_vm13, %v4511_v57  ;;  %v7570_v59 = vpop.f32.mrb[183].mxu1 }
 0xcf3   :  { %8112 = vmatpush3.bf16.msra.mxu1 %v9678_v49  ;;  %7587 = vmatprep.mubr.msk.f32.mxu1 %vm8138_vm1, %v8139_v15 }
 0xcf4   :  { %7585 = vmatprep.subr.mxu1 %v8139_v15 }
 0xcf7   :  { %7586 = vmatpush3.msk.msra.mxu1 %vm2644_vm8, %v9682_v52 }
 0xcf8   :  { %7588 = vmatmul.mubr.msk.f32.vlgmr.msra.gmra.mrb[186].mxu1 %vm4362_vm11, %v6064_v60  ;;  %7604 = vmatprep.subr.mxu1 %v8139_v15 }
 0xcf9   :  { %7606 = vmatprep.mubr.msk.f32.mxu1 %vm8138_vm1, %v8139_v15  ;;  %7605 = vmatpush3.msk.msra.mxu1 %vm4521_vm12, %v6073_v7 }
 0xcfa   :  { %8116 = vmatprep.subr.bf16.mxu1 %v8137_v0 }
 0xdbf   :  { %v4667_v61 = vpop.f32.mrb[172].mxu0 }
 0xdc0   :  { %v7580_v62 = vpop.f32.mrb[173].mxu0 }
 0xdc5   :  { %v4591_v63 = vpop.f32.mrb[184].mxu1 }
 0xdc6   :  { %v4668_v1 = vadd.f32 %v4667_v61, %v4591_v63  ;;  %v7575_v3 = vpop.f32.mrb[185].mxu1 }
 0xdcb   :  { %v4742_v4 = vpop.f32.mrb[186].mxu1 }
 0xdcc   :  { %7593 = vmatmul.mubr.msk.f32.vlgmr.msra.gmra.mrb[174].mxu0 %vm4517_vm13, %v4742_v4  ;;  %v7589_v5 = vpop.f32.mrb[187].mxu1 }
 0xdcd   :  { %8115 = vmatpush3.bf16.msra.mxu0 %v9678_v49  ;;  %7601 = vmatprep.mubr.msk.f32.mxu0 %vm8138_vm1, %v8139_v15 }
 0xdce   :  { %7599 = vmatprep.subr.mxu0 %v8139_v15 }
 0xdd1   :  { %7600 = vmatpush3.msk.msra.mxu0 %vm2644_vm8, %v9682_v52 }
 0xdd2   :  { %7602 = vmatmul.mubr.msk.f32.vlgmr.msra.gmra.mrb[176].mxu0 %vm4362_vm11, %v6070_v6  ;;  %7618 = vmatprep.subr.mxu0 %v8139_v15 }
 0xdd3   :  { %7620 = vmatprep.mubr.msk.f32.mxu0 %vm8138_vm1, %v8139_v15  ;;  %7619 = vmatpush3.msk.msra.mxu0 %vm4521_vm12, %v6079_v17 }
 0xdd4   :  { %8119 = vmatprep.subr.bf16.mxu0 %v8137_v0 }
 0xe9f   :  { %v4820_v8 = vpop.f32.mrb[174].mxu0 }
 0xea0   :  { %v4824_v10 = vadd.f32 %v4820_v8, %v4668_v1  ;;  %v7594_v11 = vpop.f32.mrb[175].mxu0 }
 0xea5   :  { %v4896_v12 = vpop.f32.mrb[176].mxu0 }
 0xea6   :  { %7607 = vmatmul.mubr.msk.f32.vlgmr.msra.gmra.mrb[188].mxu1 %vm4517_vm13, %v4896_v12  ;;  %v7603_v13 = vpop.f32.mrb[177].mxu0 }
 0xea7   :  { %8118 = vmatpush3.bf16.msra.mxu1 %v9678_v49  ;;  %7615 = vmatprep.mubr.msk.f32.mxu1 %vm8138_vm1, %v8139_v15 }
 0xea8   :  { %7613 = vmatprep.subr.mxu1 %v8139_v15 }
 0xeab   :  { %7614 = vmatpush3.msk.msra.mxu1 %vm2644_vm8, %v9682_v52 }
 0xeac   :  { %7616 = vmatmul.mubr.msk.f32.vlgmr.msra.gmra.mrb[190].mxu1 %vm4362_vm11, %v6076_v16  ;;  %7632 = vmatprep.subr.mxu1 %v8139_v15 }
 0xead   :  { %7634 = vmatprep.mubr.msk.f32.mxu1 %vm8138_vm1, %v8139_v15  ;;  %7633 = vmatpush3.msk.msra.mxu1 %vm4521_vm12, %v6085_v58 }
 0xeae   :  { %8122 = vmatprep.subr.bf16.mxu1 %v8137_v0 }
 0xf79   :  { %v4974_v23 = vpop.f32.mrb[188].mxu1 }
 0xf7a   :  { %v4978_v18 = vadd.f32 %v4974_v23, %v4824_v10  ;;  %v7608_v19 = vpop.f32.mrb[189].mxu1 }
 0xf7f   :  { %v5050_v37 = vpop.f32.mrb[190].mxu1 }
 0xf80   :  { %7621 = vmatmul.mubr.msk.f32.vlgmr.msra.gmra.mrb[178].mxu0 %vm4517_vm13, %v5050_v37  ;;  %v7617_v44 = vpop.f32.mrb[191].mxu1 }
 0xf81   :  { %8121 = vmatpush3.bf16.msra.mxu0 %v9678_v49  ;;  %7629 = vmatprep.mubr.msk.f32.mxu0 %vm8138_vm1, %v8139_v15 }
 0xf82   :  { %7627 = vmatprep.subr.mxu0 %v8139_v15 }
 0xf85   :  { %7628 = vmatpush3.msk.msra.mxu0 %vm2644_vm8, %v9682_v52 }
 0xf86   :  { %7630 = vmatmul.mubr.msk.f32.vlgmr.msra.gmra.mrb[180].mxu0 %vm4362_vm11, %v6082_v51  ;;  %7646 = vmatprep.subr.mxu0 %v8139_v15 }
 0xf87   :  { %7648 = vmatprep.mubr.msk.f32.mxu0 %vm8138_vm1, %v8139_v15  ;;  %7647 = vmatpush3.msk.msra.mxu0 %vm4521_vm12, %v6091_v9 }
 0xf88   :  { %8125 = vmatprep.subr.bf16.mxu0 %v8137_v0 }
0x1053   :  { %v5128_v2 = vpop.f32.mrb[178].mxu0 }
0x1054   :  { %v5132_v21 = vadd.f32 %v5128_v2, %v4978_v18  ;;  %v7622_v22 = vpop.f32.mrb[179].mxu0 }
0x1059   :  { %v5204_v24 = vpop.f32.mrb[180].mxu0 }
0x105a   :  { %7635 = vmatmul.mubr.msk.f32.vlgmr.msra.gmra.mrb[192].mxu1 %vm4517_vm13, %v5204_v24  ;;  %v7631_v25 = vpop.f32.mrb[181].mxu0 }
0x105b   :  { %8124 = vmatpush3.bf16.msra.mxu1 %v9678_v49  ;;  %7643 = vmatprep.mubr.msk.f32.mxu1 %vm8138_vm1, %v8139_v15 }
0x105c   :  { %7641 = vmatprep.subr.mxu1 %v8139_v15 }
0x105f   :  { %7642 = vmatpush3.msk.msra.mxu1 %vm2644_vm8, %v9682_v52 }
0x1060   :  { %7644 = vmatmul.mubr.msk.f32.vlgmr.msra.gmra.mrb[194].mxu1 %vm4362_vm11, %v6088_v26  ;;  %7660 = vmatprep.subr.mxu1 %v8139_v15 }
0x1061   :  { %7662 = vmatprep.mubr.msk.f32.mxu1 %vm8138_vm1, %v8139_v15  ;;  %7661 = vmatpush3.msk.msra.mxu1 %vm4521_vm12, %v6097_v34 }
0x1062   :  { %8128 = vmatprep.subr.bf16.mxu1 %v8137_v0  ;;  %v6103_v0 = vld [vmem:[%s9869_s10 + $0x40] sm:$0x1f] }
0x112d   :  { %v5282_v27 = vpop.f32.mrb[192].mxu1 }
0x112e   :  { %v5286_v28 = vadd.f32 %v5282_v27, %v5132_v21  ;;  %v7636_v29 = vpop.f32.mrb[193].mxu1 }
0x1133   :  { %v5358_v31 = vpop.f32.mrb[194].mxu1 }
0x1134   :  { %7649 = vmatmul.mubr.msk.f32.vlgmr.msra.gmra.mrb[182].mxu0 %vm4517_vm13, %v5358_v31  ;;  %v7645_v32 = vpop.f32.mrb[195].mxu1 }
0x1135   :  { %8127 = vmatpush3.bf16.msra.mxu0 %v9678_v49  ;;  %7657 = vmatprep.mubr.msk.f32.mxu0 %vm8138_vm1, %v8139_v15 }
0x1136   :  { %7655 = vmatprep.subr.mxu0 %v8139_v15 }
0x1139   :  { %7656 = vmatpush3.msk.msra.mxu0 %vm2644_vm8, %v9682_v52 }
0x113a   :  { %7658 = vmatmul.mubr.msk.f32.vlgmr.msra.gmra.mrb[184].mxu0 %vm4362_vm11, %v6094_v33  ;;  %7674 = vmatprep.subr.mxu0 %v8139_v15 }
0x113b   :  { %7676 = vmatprep.mubr.msk.f32.mxu0 %vm8138_vm1, %v8139_v15  ;;  %7675 = vmatpush3.msk.msra.mxu0 %vm4521_vm12, %v6103_v0 }
0x1207   :  { %v5436_v36 = vpop.f32.mrb[182].mxu0 }
0x1208   :  { %v5440_v38 = vadd.f32 %v5436_v36, %v5286_v28  ;;  %v7650_v35 = vpop.f32.mrb[183].mxu0 }
0x120d   :  { %v5512_v39 = vpop.f32.mrb[184].mxu0 }
0x120e   :  { %7663 = vmatmul.mubr.msk.f32.vlgmr.msra.gmra.mrb[196].mxu1 %vm4517_vm13, %v5512_v39  ;;  %v7659_v40 = vpop.f32.mrb[185].mxu0 }
0x120f   :  { %8130 = vmatpush3.bf16.msra.mxu1 %v9678_v49  ;;  %7671 = vmatprep.mubr.msk.f32.mxu1 %vm8138_vm1, %v8139_v15  ;;  %v6106_v49 = vld [vmem:[%s9871_s11] ss:$0 sm:$0xff] }
0x1210   :  { %7669 = vmatprep.subr.mxu1 %v8139_v15 }
0x1213   :  { %7670 = vmatpush3.msk.msra.mxu1 %vm2644_vm8, %v9682_v52 }
0x1214   :  { %7672 = vmatmul.mubr.msk.f32.vlgmr.msra.gmra.mrb[198].mxu1 %vm4362_vm11, %v6100_v41 }
0x12e1   :  { %v5590_v42 = vpop.f32.mrb[196].mxu1 }
0x12e2   :  { %v5594_v43 = vadd.f32 %v5590_v42, %v5440_v38  ;;  %v7664_v45 = vpop.f32.mrb[197].mxu1 }
0x12e7   :  { %v5666_v46 = vpop.f32.mrb[198].mxu1 }
0x12e8   :  { %7677 = vmatmul.mubr.msk.f32.vlgmr.msra.gmra.mrb[186].mxu0 %vm4517_vm13, %v5666_v46  ;;  %v7673_v15 = vpop.f32.mrb[199].mxu1 }
0x13bb   :  { %v5744_v48 = vpop.f32.mrb[186].mxu0 }
0x13bc   :  { %v5748_v50 = vadd.f32 %v5744_v48, %v5594_v43  ;;  %v7678_v52 = vpop.f32.mrb[187].mxu0 }
0x13be   :  { %v5756_v14 = vadd.f32 %v6106_v49, %v5748_v50 }
0x13c0   :  { %v5764_v54 = vmul.f32 %v6107_v53, %v5756_v14 }
0x13c2   :  { %v5766_v55 = vsel %vm5765_vm14, %v5764_v54, 0.0 }
0x13c3   :  { %5767 = vadd.xlane.f32.xlu0 %v5766_v55 }
0x1450   :  { %v5768_v30 = vpop.xlane.xlu0 %5767 }
0x1451   :  { %v5776_v57 = vadd.f32 %v6108_v56, %v5768_v30 }
0x1453   :  { %v5777_v59 = vmul.f32 0.5, %v5776_v57 }
0x1455   :  { %8135 = vtanh.f32 %v5777_v59 }
0x145f   :  { %v8136_v60 = vpop.eup %8135 }
0x1460   :  { %v5779_v20 = vadd.f32 1.0, %v8136_v60 }
0x1462   :  { %v5780_v61 = vmul.f32 0.5, %v5779_v20 }
0x1464   :  { %5782 = vst.msk [vmem:[%s9873_s14] sm:$0x3] %vm5781_vm15, %v5780_v61 }

</bundles_post_ra>
